<compile_context>
chip_gen: v5e
topology: v5e:2x2
jax: 0.10.0
libtpu: 0.0.40
codegen_flags: <defaults>
</compile_context>

<pallas_src>
import functools

import jax
import jax.numpy as jnp
from jax.experimental import pallas as pl
from jax.experimental.pallas import tpu as pltpu

# ----------------------------- dimensions -----------------------------------
B = 2                    # batch
C_IN, H, W = 3, 16, 16   # image: channels / spatial (small synthetic shapes)
K_RAW = 9 * C_IN         # im2col K (27)
K_PAD = 32               # padded K for aligned loads
C_IMG = 512              # image trunk output dim (image_fc = Linear(512, 256))
S = 8                    # text sequence length
D_H = 128                # synthetic "BERT" hidden size (bert-base would be 768)
VOCAB = 1000
D_F = 256                # text_fc / image_fc / fusion_fc output dim
NUM_CLASSES = (3, 2, 2, 2)
N_OUT = sum(NUM_CLASSES)
N_OUT_PAD = 128          # lane-dense padded output width
DROPOUT_P = 0.3


# ------------------------------ fused kernel ---------------------------------
def fused_kernel(*refs, training, p, batch, hw):
    """Image stem + text pooler + text_fc/image_fc/fusion_fc + dropout + heads."""
    if training:
        seed_ref, *refs = refs
    (patches_ref, emb_ref, mask_ref,
     w_conv_ref, b_conv_ref,
     w_pool_ref, b_pool_ref,
     w_text_ref, b_text_ref,
     w_img_ref, b_img_ref,
     w_fuse_t_ref, w_fuse_i_ref, b_fuse_ref,
     w_clf_ref, b_clf_ref, o_ref) = refs

    # --- image branch -------------------------------------------------------
    # TODO(synk): pretrained ResNet18 trunk not reproduced; stand-in is a single
    # 3x3 conv stem (as im2col matmul) + ReLU + global average pool -> 512-d.
    y = jnp.dot(patches_ref[...], w_conv_ref[...],
                preferred_element_type=jnp.float32) + b_conv_ref[...]   # (B*HW, 512)
    y = jnp.maximum(y, 0.0)
    img_raw = jnp.mean(y.reshape(batch, hw, C_IMG), axis=1)             # (B, 512)

    # --- text branch --------------------------------------------------------
    # TODO(synk): full pretrained BERT transformer stack not reproduced; pooler
    # stand-in = masked-mean pooling over token embeddings + tanh(Linear).
    emb = emb_ref[...]                                                  # (B, S, D_H)
    mask = mask_ref[...]                                                # (B, S)
    denom = jnp.maximum(jnp.sum(mask, axis=1, keepdims=True), 1.0)
    pooled = jnp.sum(emb * mask[:, :, None], axis=1) / denom            # (B, D_H)
    pooler_out = jnp.tanh(
        jnp.dot(pooled.astype(jnp.bfloat16), w_pool_ref[...],
                preferred_element_type=jnp.float32) + b_pool_ref[...])  # (B, D_H)

    # --- projections --------------------------------------------------------
    text_feat = jnp.dot(pooler_out.astype(jnp.bfloat16), w_text_ref[...],
                        preferred_element_type=jnp.float32) + b_text_ref[...]  # (B,256)
    img_feat = jnp.dot(img_raw.astype(jnp.bfloat16), w_img_ref[...],
                       preferred_element_type=jnp.float32) + b_img_ref[...]    # (B,256)

    # fusion_fc(concat([text, img])) == text @ Wf_t + img @ Wf_i + b
    fused = (jnp.dot(text_feat.astype(jnp.bfloat16), w_fuse_t_ref[...],
                     preferred_element_type=jnp.float32)
             + jnp.dot(img_feat.astype(jnp.bfloat16), w_fuse_i_ref[...],
                       preferred_element_type=jnp.float32)
             + b_fuse_ref[...])                                         # (B, 256)

    if training:  # nn.Dropout(0.3); identity in eval/inference mode
        pltpu.prng_seed(seed_ref[0])
        bits = pltpu.bitcast(pltpu.prng_random_bits(fused.shape), jnp.uint32)
        keep = bits >= jnp.uint32(int(p * (2 ** 32)))
        fused = jnp.where(keep, fused * (1.0 / (1.0 - p)), 0.0)

    # 4 classifier heads packed into one lane-dense (256, 128) matmul
    # (only the first N_OUT=9 columns are meaningful; sliced in glue).
    o_ref[...] = jnp.dot(fused.astype(jnp.bfloat16), w_clf_ref[...],
                         preferred_element_type=jnp.float32) + b_clf_ref[...]


# ------------------------------ wrapper ---------------------------------------
@functools.partial(jax.jit, static_argnames=("training",))
def multimodal_classifier_forward(params, image, input_ids, attention_mask,
                                  *, training=False, seed=0):
    """image: (B, C_IN, H, W) NCHW (PyTorch convention); input_ids/attention_mask: (B, S)."""
    bsz = image.shape[0]

    # --- image glue: NCHW -> NHWC, SAME pad, im2col for 3x3 conv, pad K ------
    x = jnp.transpose(image, (0, 2, 3, 1)).astype(jnp.float32)      # (B, H, W, C)
    x_pad = jnp.pad(x, ((0, 0), (1, 1), (1, 1), (0, 0)))
    patches = jnp.stack(
        [x_pad[:, kh:kh + H, kw:kw + W, :] for kh in range(3) for kw in range(3)],
        axis=-2)                                                    # (B, H, W, 9, C)
    patches = patches.reshape(bsz * H * W, K_RAW)
    patches = jnp.pad(patches, ((0, 0), (0, K_PAD - K_RAW)))        # (B*HW, 32)
    patches = patches.astype(jnp.bfloat16)

    # --- text glue: embedding lookup ----------------------------------------
    emb = jnp.take(params["emb_table"], input_ids, axis=0)          # (B, S, D_H) f32
    mask = attention_mask.astype(jnp.float32)

    vmem = pl.BlockSpec(memory_space=pltpu.MemorySpace.VMEM)
    smem = pl.BlockSpec(memory_space=pltpu.MemorySpace.SMEM)

    args = [patches, emb, mask,
            params["w_conv"], params["b_conv"],
            params["w_pool"], params["b_pool"],
            params["w_text"], params["b_text"],
            params["w_img"], params["b_img"],
            params["w_fuse_t"], params["w_fuse_i"], params["b_fuse"],
            params["w_clf"], params["b_clf"]]
    in_specs = [vmem] * len(args)
    if training:
        args = [jnp.asarray([seed], jnp.int32)] + args
        in_specs = [smem] + in_specs

    logits_pad = pl.pallas_call(
        functools.partial(fused_kernel, training=training, p=DROPOUT_P,
                          batch=bsz, hw=H * W),
        out_shape=jax.ShapeDtypeStruct((bsz, N_OUT_PAD), jnp.float32),
        in_specs=in_specs,
        out_specs=vmem,
    )(*args)                                                        # (B, 128)

    logits = logits_pad[:, :N_OUT]                                  # (B, 9)
    outs, off = [], 0
    for c in NUM_CLASSES:
        outs.append(logits[:, off:off + c])
        off += c
    return outs                                                     # [(B,3),(B,2),(B,2),(B,2)]


# -------------------------- deterministic params ------------------------------
def init_params(key):
    ks = jax.random.split(key, 8)

    def lin(k, fan_in, shape):
        return (jax.random.normal(k, shape, jnp.float32)
                / jnp.sqrt(float(fan_in))).astype(jnp.bfloat16)

    w_conv = lin(ks[1], K_RAW, (K_RAW, C_IMG))
    w_conv = jnp.pad(w_conv, ((0, K_PAD - K_RAW), (0, 0)))          # (32, 512) bf16
    w_fuse = lin(ks[5], 2 * D_F, (2 * D_F, D_F))                    # fusion_fc (512,256)
    w_clf = lin(ks[6], D_F, (D_F, N_OUT))                           # 4 heads packed
    w_clf = jnp.pad(w_clf, ((0, 0), (0, N_OUT_PAD - N_OUT)))        # (256, 128) bf16

    return {
        "emb_table": jax.random.normal(ks[0], (VOCAB, D_H), jnp.float32) * 0.02,
        "w_conv": w_conv,
        "b_conv": jnp.zeros((1, C_IMG), jnp.float32),
        "w_pool": lin(ks[2], D_H, (D_H, D_H)),
        "b_pool": jnp.zeros((1, D_H), jnp.float32),
        "w_text": lin(ks[3], D_H, (D_H, D_F)),       # text_fc
        "b_text": jnp.zeros((1, D_F), jnp.float32),
        "w_img": lin(ks[4], C_IMG, (C_IMG, D_F)),    # image_fc
        "b_img": jnp.zeros((1, D_F), jnp.float32),
        "w_fuse_t": w_fuse[:D_F],                    # fusion_fc, text half (256,256)
        "w_fuse_i": w_fuse[D_F:],                    # fusion_fc, image half (256,256)
        "b_fuse": jnp.zeros((1, D_F), jnp.float32),
        "w_clf": w_clf,
        "b_clf": jnp.zeros((1, N_OUT_PAD), jnp.float32),
    }


# --------------------------------- main ---------------------------------------
if __name__ == "__main__":
    key = jax.random.PRNGKey(0)
    kp, ki, kt = jax.random.split(key, 3)

    params = init_params(kp)
    image = jax.random.normal(ki, (B, C_IN, H, W), jnp.float32)
    input_ids = jax.random.randint(kt, (B, S), 0, VOCAB, dtype=jnp.int32)
    attention_mask = jnp.array([[1] * S, [1] * (S - 2) + [0, 0]], dtype=jnp.int32)

    outs = multimodal_classifier_forward(params, image, input_ids, attention_mask,
                                         training=False)
    outs = jax.block_until_ready(outs)

    assert [tuple(o.shape) for o in outs] == [(B, c) for c in NUM_CLASSES]
    assert all(bool(jnp.all(jnp.isfinite(o))) for o in outs)
    print("KERNEL_OK")
</pallas_src>

<mosaic_0001>
module attributes {stable_mosaic.version = 11 : i64} {
  func.func @fused_kernel(%arg0: memref<512x32xbf16, #tpu.memory_space<vmem>>, %arg1: memref<2x8x128xf32, #tpu.memory_space<vmem>>, %arg2: memref<2x8xf32, #tpu.memory_space<vmem>>, %arg3: memref<32x512xbf16, #tpu.memory_space<vmem>>, %arg4: memref<1x512xf32, #tpu.memory_space<vmem>>, %arg5: memref<128x128xbf16, #tpu.memory_space<vmem>>, %arg6: memref<1x128xf32, #tpu.memory_space<vmem>>, %arg7: memref<128x256xbf16, #tpu.memory_space<vmem>>, %arg8: memref<1x256xf32, #tpu.memory_space<vmem>>, %arg9: memref<512x256xbf16, #tpu.memory_space<vmem>>, %arg10: memref<1x256xf32, #tpu.memory_space<vmem>>, %arg11: memref<256x256xbf16, #tpu.memory_space<vmem>>, %arg12: memref<256x256xbf16, #tpu.memory_space<vmem>>, %arg13: memref<1x256xf32, #tpu.memory_space<vmem>>, %arg14: memref<256x128xbf16, #tpu.memory_space<vmem>>, %arg15: memref<1x128xf32, #tpu.memory_space<vmem>>, %arg16: memref<2x128xf32, #tpu.memory_space<vmem>>) attributes {dimension_semantics = [], scalar_prefetch = 0 : i64, scratch_operands = 0 : i64, tpu.core_type = #tpu.core_type<tc>} {
    %c0 = arith.constant 0 : index
    %c0_0 = arith.constant 0 : index
    %0 = vector.load %arg0[%c0, %c0_0] : memref<512x32xbf16, #tpu.memory_space<vmem>>, vector<512x32xbf16>
    %c0_1 = arith.constant 0 : index
    %c0_2 = arith.constant 0 : index
    %1 = vector.load %arg3[%c0_1, %c0_2] : memref<32x512xbf16, #tpu.memory_space<vmem>>, vector<32x512xbf16>
    %cst = arith.constant dense<0.000000e+00> : vector<512x512xf32>
    %2 = tpu.matmul %0, %1, %cst {dimension_numbers = #tpu.dot_dimension_numbers<[1], [0], [0], [1], [0, 0, 1, 1], [], []>} : vector<512x32xbf16>, vector<32x512xbf16>, vector<512x512xf32> -> vector<512x512xf32>
    %c0_3 = arith.constant 0 : index
    %c0_4 = arith.constant 0 : index
    %3 = vector.load %arg4[%c0_3, %c0_4] : memref<1x512xf32, #tpu.memory_space<vmem>>, vector<1x512xf32>
    %4 = vector.broadcast %3 : vector<1x512xf32> to vector<512x512xf32>
    %5 = arith.addf %2, %4 : vector<512x512xf32>
    %cst_5 = arith.constant 0.000000e+00 : f32
    %6 = vector.broadcast %cst_5 : f32 to vector<512x512xf32>
    %7 = arith.maximumf %5, %6 : vector<512x512xf32>
    %8 = vector.shape_cast %7 : vector<512x512xf32> to vector<2x256x512xf32>
    %cst_6 = arith.constant dense<0.000000e+00> : vector<2x512xf32>
    %9 = vector.multi_reduction <add>, %8, %cst_6 [1] : vector<2x256x512xf32> to vector<2x512xf32>
    %cst_7 = arith.constant 2.560000e+02 : f32
    %10 = vector.broadcast %cst_7 : f32 to vector<2x512xf32>
    %11 = arith.divf %9, %10 : vector<2x512xf32>
    %c0_8 = arith.constant 0 : index
    %c0_9 = arith.constant 0 : index
    %c0_10 = arith.constant 0 : index
    %12 = vector.load %arg1[%c0_8, %c0_9, %c0_10] : memref<2x8x128xf32, #tpu.memory_space<vmem>>, vector<2x8x128xf32>
    %c0_11 = arith.constant 0 : index
    %c0_12 = arith.constant 0 : index
    %13 = vector.load %arg2[%c0_11, %c0_12] : memref<2x8xf32, #tpu.memory_space<vmem>>, vector<2x8xf32>
    %cst_13 = arith.constant dense<0.000000e+00> : vector<2xf32>
    %14 = vector.multi_reduction <add>, %13, %cst_13 [1] : vector<2x8xf32> to vector<2xf32>
    %15 = vector.shape_cast %14 : vector<2xf32> to vector<2x1xf32>
    %cst_14 = arith.constant 1.000000e+00 : f32
    %16 = vector.broadcast %cst_14 : f32 to vector<2x1xf32>
    %17 = arith.maximumf %15, %16 : vector<2x1xf32>
    %18 = vector.shape_cast %13 : vector<2x8xf32> to vector<2x8x1xf32>
    %19 = vector.broadcast %18 : vector<2x8x1xf32> to vector<2x8x128xf32>
    %20 = arith.mulf %12, %19 : vector<2x8x128xf32>
    %cst_15 = arith.constant dense<0.000000e+00> : vector<2x128xf32>
    %21 = vector.multi_reduction <add>, %20, %cst_15 [1] : vector<2x8x128xf32> to vector<2x128xf32>
    %22 = vector.broadcast %17 : vector<2x1xf32> to vector<2x128xf32>
    %23 = arith.divf %21, %22 : vector<2x128xf32>
    %24 = arith.truncf %23 : vector<2x128xf32> to vector<2x128xbf16>
    %c0_16 = arith.constant 0 : index
    %c0_17 = arith.constant 0 : index
    %25 = vector.load %arg5[%c0_16, %c0_17] : memref<128x128xbf16, #tpu.memory_space<vmem>>, vector<128x128xbf16>
    %cst_18 = arith.constant dense<0.000000e+00> : vector<2x128xf32>
    %26 = tpu.matmul %24, %25, %cst_18 {dimension_numbers = #tpu.dot_dimension_numbers<[1], [0], [0], [1], [0, 0, 1, 1], [], []>} : vector<2x128xbf16>, vector<128x128xbf16>, vector<2x128xf32> -> vector<2x128xf32>
    %c0_19 = arith.constant 0 : index
    %c0_20 = arith.constant 0 : index
    %27 = vector.load %arg6[%c0_19, %c0_20] : memref<1x128xf32, #tpu.memory_space<vmem>>, vector<1x128xf32>
    %28 = vector.broadcast %27 : vector<1x128xf32> to vector<2x128xf32>
    %29 = arith.addf %26, %28 : vector<2x128xf32>
    %30 = math.tanh %29 : vector<2x128xf32>
    %31 = arith.truncf %30 : vector<2x128xf32> to vector<2x128xbf16>
    %c0_21 = arith.constant 0 : index
    %c0_22 = arith.constant 0 : index
    %32 = vector.load %arg7[%c0_21, %c0_22] : memref<128x256xbf16, #tpu.memory_space<vmem>>, vector<128x256xbf16>
    %cst_23 = arith.constant dense<0.000000e+00> : vector<2x256xf32>
    %33 = tpu.matmul %31, %32, %cst_23 {dimension_numbers = #tpu.dot_dimension_numbers<[1], [0], [0], [1], [0, 0, 1, 1], [], []>} : vector<2x128xbf16>, vector<128x256xbf16>, vector<2x256xf32> -> vector<2x256xf32>
    %c0_24 = arith.constant 0 : index
    %c0_25 = arith.constant 0 : index
    %34 = vector.load %arg8[%c0_24, %c0_25] : memref<1x256xf32, #tpu.memory_space<vmem>>, vector<1x256xf32>
    %35 = vector.broadcast %34 : vector<1x256xf32> to vector<2x256xf32>
    %36 = arith.addf %33, %35 : vector<2x256xf32>
    %37 = arith.truncf %11 : vector<2x512xf32> to vector<2x512xbf16>
    %c0_26 = arith.constant 0 : index
    %c0_27 = arith.constant 0 : index
    %38 = vector.load %arg9[%c0_26, %c0_27] : memref<512x256xbf16, #tpu.memory_space<vmem>>, vector<512x256xbf16>
    %cst_28 = arith.constant dense<0.000000e+00> : vector<2x256xf32>
    %39 = tpu.matmul %37, %38, %cst_28 {dimension_numbers = #tpu.dot_dimension_numbers<[1], [0], [0], [1], [0, 0, 1, 1], [], []>} : vector<2x512xbf16>, vector<512x256xbf16>, vector<2x256xf32> -> vector<2x256xf32>
    %c0_29 = arith.constant 0 : index
    %c0_30 = arith.constant 0 : index
    %40 = vector.load %arg10[%c0_29, %c0_30] : memref<1x256xf32, #tpu.memory_space<vmem>>, vector<1x256xf32>
    %41 = vector.broadcast %40 : vector<1x256xf32> to vector<2x256xf32>
    %42 = arith.addf %39, %41 : vector<2x256xf32>
    %43 = arith.truncf %36 : vector<2x256xf32> to vector<2x256xbf16>
    %c0_31 = arith.constant 0 : index
    %c0_32 = arith.constant 0 : index
    %44 = vector.load %arg11[%c0_31, %c0_32] : memref<256x256xbf16, #tpu.memory_space<vmem>>, vector<256x256xbf16>
    %cst_33 = arith.constant dense<0.000000e+00> : vector<2x256xf32>
    %45 = tpu.matmul %43, %44, %cst_33 {dimension_numbers = #tpu.dot_dimension_numbers<[1], [0], [0], [1], [0, 0, 1, 1], [], []>} : vector<2x256xbf16>, vector<256x256xbf16>, vector<2x256xf32> -> vector<2x256xf32>
    %46 = arith.truncf %42 : vector<2x256xf32> to vector<2x256xbf16>
    %c0_34 = arith.constant 0 : index
    %c0_35 = arith.constant 0 : index
    %47 = vector.load %arg12[%c0_34, %c0_35] : memref<256x256xbf16, #tpu.memory_space<vmem>>, vector<256x256xbf16>
    %cst_36 = arith.constant dense<0.000000e+00> : vector<2x256xf32>
    %48 = tpu.matmul %46, %47, %cst_36 {dimension_numbers = #tpu.dot_dimension_numbers<[1], [0], [0], [1], [0, 0, 1, 1], [], []>} : vector<2x256xbf16>, vector<256x256xbf16>, vector<2x256xf32> -> vector<2x256xf32>
    %49 = arith.addf %45, %48 : vector<2x256xf32>
    %c0_37 = arith.constant 0 : index
    %c0_38 = arith.constant 0 : index
    %50 = vector.load %arg13[%c0_37, %c0_38] : memref<1x256xf32, #tpu.memory_space<vmem>>, vector<1x256xf32>
    %51 = vector.broadcast %50 : vector<1x256xf32> to vector<2x256xf32>
    %52 = arith.addf %49, %51 : vector<2x256xf32>
    %53 = arith.truncf %52 : vector<2x256xf32> to vector<2x256xbf16>
    %c0_39 = arith.constant 0 : index
    %c0_40 = arith.constant 0 : index
    %54 = vector.load %arg14[%c0_39, %c0_40] : memref<256x128xbf16, #tpu.memory_space<vmem>>, vector<256x128xbf16>
    %cst_41 = arith.constant dense<0.000000e+00> : vector<2x128xf32>
    %55 = tpu.matmul %53, %54, %cst_41 {dimension_numbers = #tpu.dot_dimension_numbers<[1], [0], [0], [1], [0, 0, 1, 1], [], []>} : vector<2x256xbf16>, vector<256x128xbf16>, vector<2x128xf32> -> vector<2x128xf32>
    %c0_42 = arith.constant 0 : index
    %c0_43 = arith.constant 0 : index
    %56 = vector.load %arg15[%c0_42, %c0_43] : memref<1x128xf32, #tpu.memory_space<vmem>>, vector<1x128xf32>
    %57 = vector.broadcast %56 : vector<1x128xf32> to vector<2x128xf32>
    %58 = arith.addf %55, %57 : vector<2x128xf32>
    %c0_44 = arith.constant 0 : index
    %c0_45 = arith.constant 0 : index
    %59 = vector.load %arg16[%c0_44, %c0_45] : memref<2x128xf32, #tpu.memory_space<vmem>>, vector<2x128xf32>
    tpu.vector_store %arg16[%c0_44, %c0_45], %58 {strides = array<i32>} : memref<2x128xf32, #tpu.memory_space<vmem>>, vector<2x128xf32>,
    return
  }
}

</mosaic_0001>

<bundles_post_ra>
// kernel: multimodal_classifier_forward.1
= control target key start
LH: loop header
LB: loop body
LE: loop exit
PB: predicated region body
PF: predicated region fallthrough
CT: control target
= control target key end

     0   :  { %vm336_vm0 = vcmask 261120   ;;  %vm1679_vm1 = vcmask 58368   ;;  %vm1773_vm10 = vcmask 1041409   ;;  %s6275_s3 = inlined_call_operand.vmem [shape: bf16[32,512], index: 3, kind: input, shape index: {}]   ;;  %s6276_s0 = inlined_call_operand.vmem [shape: bf16[512,32], index: 0, kind: input, shape index: {}]   ;;  %s6277_s5 = inlined_call_operand.vmem [shape: bf16[128,128], index: 5, kind: input, shape index: {}]   ;;  %s6278_s7 = inlined_call_operand.vmem [shape: bf16[128,256], index: 7, kind: input, shape index: {}]   ;;  %s6279_s9 = inlined_call_operand.vmem [shape: bf16[512,256], index: 9, kind: input, shape index: {}]   ;;  %s6280_s4 = inlined_call_operand.vmem [shape: f32[1,512], index: 4, kind: input, shape index: {}]   ;;  %s6281_s2 = inlined_call_operand.vmem [shape: f32[2,8], index: 2, kind: input, shape index: {}]   ;;  %s6282_s1 = inlined_call_operand.vmem [shape: f32[2,8,128], index: 1, kind: input, shape index: {}]   ;;  %s6283_s6 = inlined_call_operand.vmem [shape: f32[1,128], index: 6, kind: input, shape index: {}]   ;;  %s6284_s12 = inlined_call_operand.vmem [shape: bf16[256,256], index: 12, kind: input, shape index: {}]   ;;  %s6285_s11 = inlined_call_operand.vmem [shape: bf16[256,256], index: 11, kind: input, shape index: {}]   ;;  %s6286_s10 = inlined_call_operand.vmem [shape: f32[1,256], index: 10, kind: input, shape index: {}]   ;;  %s6287_s8 = inlined_call_operand.vmem [shape: f32[1,256], index: 8, kind: input, shape index: {}]   ;;  %s6288_s15 = inlined_call_operand.vmem [shape: f32[1,128], index: 15, kind: input, shape index: {}]   ;;  %s6289_s14 = inlined_call_operand.vmem [shape: bf16[256,128], index: 14, kind: input, shape index: {}]   ;;  %s6290_s13 = inlined_call_operand.vmem [shape: f32[1,256], index: 13, kind: input, shape index: {}]   ;;  %s6291_s16 = inlined_call_operand.vmem [shape: f32[2,128], index: 16, kind: output, shape index: {}]  }
   0x1   :  { %6293 = sst [smem:[#allocation2_spill]] %s6275_s3  ;;  %v4123_v19 = vld [vmem:[%s6276_s0] sm:$0xff]  ;;  %v4154_v20 = vld [vmem:[%s6276_s0 + $0xf8] sm:$0xff]  ;;  %v4124_v27 = vld [vmem:[%s6276_s0 + $0x8] sm:$0xff] }
   0x2   :  { %s6294_s23 = sld [smem:[#allocation2_spill]]  ;;  %v4170_v25 = vld [vmem:[%s6277_s5 + $0x38] sm:$0xff]  ;;  %v4125_v28 = vld [vmem:[%s6276_s0 + $0x10] sm:$0xff]  ;;  %v4127_v31 = vld [vmem:[%s6276_s0 + $0x20] sm:$0xff] }
   0x3   :  { %v4126_v29 = vld [vmem:[%s6276_s0 + $0x18] sm:$0xff]  ;;  %v4169_v30 = vld [vmem:[%s6277_s5 + $0x30] sm:$0xff]  ;;  %v4128_v32 = vld [vmem:[%s6276_s0 + $0x28] sm:$0xff] }
   0x4   :  { %v4129_v33 = vld [vmem:[%s6276_s0 + $0x30] sm:$0xff]  ;;  %v4130_v34 = vld [vmem:[%s6276_s0 + $0x38] sm:$0xff]  ;;  %v4168_v37 = vld [vmem:[%s6277_s5 + $0x28] sm:$0xff] }
   0x5   :  { %v4185_v35 = vld [vmem:[%s6278_s7 + $0x74] sm:$0xf]  ;;  %v3543_v36 = vld [vmem:[%s6278_s7 + $0x78] sm:$0xf0]  ;;  %v3541_v39 = vld [vmem:[%s6278_s7 + $0x70] sm:$0xf] }
   0x6   :  { %v3546_v38 = vor.u32 %v4185_v35, %v3543_v36  ;;  %v4186_v40 = vld [vmem:[%s6278_s7 + $0x74] sm:$0xf0]  ;;  %v3605_v42 = vld [vmem:[%s6279_s9 + $0x70] sm:$0xf]  ;;  %v4131_v45 = vld [vmem:[%s6276_s0 + $0x40] sm:$0xff] }
   0x7   :  { %v3542_v41 = vor.u32 %v4186_v40, %v3541_v39  ;;  %v4202_v43 = vld [vmem:[%s6279_s9 + $0x74] sm:$0xf0]  ;;  %v126_v46 = vld [vmem:[%s6280_s4] sm:$0xf]  ;;  %v4133_v36 = vld [vmem:[%s6276_s0 + $0x50] sm:$0xff] }
   0x8   :  { %v3309_v0 = vld [vmem:[%s6294_s23 + $0x20] sm:$0xf]  ;;  %v4161_v1 = vld [vmem:[%s6294_s23 + $0x2c] sm:$0xf0]  ;;  %v3317_v2 = vld [vmem:[%s6294_s23 + $0x28] sm:$0xf]  ;;  %v3606_v44 = vor.u32 %v4202_v43, %v3605_v42 }
   0x9   :  { %v3310_v3 = vor.u32 %v4161_v1, %v3309_v0  ;;  %v4162_v4 = vld [vmem:[%s6294_s23 + $0x34] sm:$0xf0]  ;;  %v4160_v5 = vld [vmem:[%s6294_s23 + $0x2c] sm:$0xf]  ;;  %v3319_v6 = vld [vmem:[%s6294_s23 + $0x38] sm:$0xf0] }
   0xa   :  { %v3318_v7 = vor.u32 %v4162_v4, %v3317_v2  ;;  %v3322_v8 = vor.u32 %v4160_v5, %v3319_v6  ;;  %v3293_v9 = vld [vmem:[%s6294_s23] sm:$0xf]  ;;  %v4157_v10 = vld [vmem:[%s6294_s23 + $0xc] sm:$0xf0]  ;;  %v3301_v11 = vld [vmem:[%s6294_s23 + $0x8] sm:$0xf] }
   0xb   :  { %439 = vmatpush.bf16.msra.mxu0 %v3310_v3  ;;  %4331 = vmatpush.bf16.msra.mxu1 %v3310_v3  ;;  %v3294_v12 = vor.u32 %v4157_v10, %v3293_v9  ;;  %v4158_v13 = vld [vmem:[%s6294_s23 + $0x14] sm:$0xf0]  ;;  %v4156_v14 = vld [vmem:[%s6294_s23 + $0xc] sm:$0xf]  ;;  %v3303_v15 = vld [vmem:[%s6294_s23 + $0x18] sm:$0xf0] }
   0xc   :  { %777 = vmatpush.bf16.msra.mxu2 %v3318_v7  ;;  %946 = vmatpush.bf16.msra.mxu3 %v3322_v8  ;;  %v3302_v16 = vor.u32 %v4158_v13, %v3301_v11  ;;  %v3306_v17 = vor.u32 %v4156_v14, %v3303_v15  ;;  %v4159_v18 = vld [vmem:[%s6294_s23 + $0x24] sm:$0xf]  ;;  %v3311_v21 = vld [vmem:[%s6294_s23 + $0x30] sm:$0xf0]  ;;  %v4575_v49 = vperm.slane %v126_v46, 0  ;;  %v4582_v53 = vperm.slane %v126_v46, 2 }
   0xd   :  { %v3314_v22 = vor.u32 %v4159_v18, %v3311_v21  ;;  %v4155_v23 = vld [vmem:[%s6294_s23 + $0x4] sm:$0xf]  ;;  %v3295_v24 = vld [vmem:[%s6294_s23 + $0x10] sm:$0xf0]  ;;  %v4584_v54 = vperm.slane %v126_v46, 3  ;;  %v4132_v1 = vld [vmem:[%s6276_s0 + $0x48] sm:$0xff] }
   0xe   :  { %v3298_v26 = vor.u32 %v4155_v23, %v3295_v24 }
   0xf   :  { %440 = vmatpush.bf16.msra.mxu0 %v3294_v12  ;;  %4332 = vmatpush.bf16.msra.mxu1 %v3294_v12  ;;  %v4597_v12 = vperm.slane %v126_v46, 1 }
  0x10   :  { %778 = vmatpush.bf16.msra.mxu2 %v3302_v16  ;;  %947 = vmatpush.bf16.msra.mxu3 %v3306_v17 }
  0x12   :  { %3323 = vmatmul.msk.bf16.vlgmr.msra.gmra.mxu0 %vm336_vm0, %v4123_v19  ;;  %3354 = vmatmul.msk.bf16.vlgmr.msra.gmra.mxu1 %vm336_vm0, %v4154_v20 }
  0x13   :  { %608 = vmatpush.bf16.msrb.mxu1 %v3314_v22  ;;  %1825 = vmatpush.bf16.msrb.mxu0 %v4170_v25 }
  0x14   :  { %3387 = vmatmul.msk.bf16.vlgmr.msra.gmra.mxu2 %vm336_vm0, %v4123_v19  ;;  %3419 = vmatmul.msk.bf16.vlgmr.msra.gmra.mxu3 %vm336_vm0, %v4123_v19 }
  0x15   :  { %1955 = vmatpush.bf16.msrb.mxu2 %v3546_v38  ;;  %2394 = vmatpush.bf16.msrb.mxu3 %v3606_v44 }
  0x17   :  { %609 = vmatpush.bf16.msrb.mxu1 %v3298_v26  ;;  %1826 = vmatpush.bf16.msrb.mxu0 %v4169_v30 }
  0x1b   :  { %1827 = vmatpush.bf16.msrb.mxu0 %v4168_v37  ;;  %1942 = vmatpush.bf16.msra.mxu1 %v3542_v41 }
  0x22   :  { %3324 = vmatmul.msk.bf16.gmra.mxu0 %vm336_vm0, %v4124_v27  ;;  %3355 = vmatmul.msk.bf16.vlgmr.msrb.gmra.mxu1 %vm336_vm0, %v4123_v19 }
  0x24   :  { %3388 = vmatmul.msk.bf16.gmra.mxu2 %vm336_vm0, %v4124_v27  ;;  %3420 = vmatmul.msk.bf16.gmra.mxu3 %vm336_vm0, %v4124_v27 }
  0x32   :  { %3325 = vmatmul.msk.bf16.gmra.mxu0 %vm336_vm0, %v4125_v28  ;;  %3356 = vmatmul.msk.bf16.gmra.mxu1 %vm336_vm0, %v4124_v27 }
  0x34   :  { %3389 = vmatmul.msk.bf16.gmra.mxu2 %vm336_vm0, %v4125_v28  ;;  %3421 = vmatmul.msk.bf16.gmra.mxu3 %vm336_vm0, %v4125_v28 }
  0x42   :  { %3326 = vmatmul.msk.bf16.gmra.mxu0 %vm336_vm0, %v4126_v29  ;;  %3357 = vmatmul.msk.bf16.gmra.mxu1 %vm336_vm0, %v4125_v28 }
  0x44   :  { %3390 = vmatmul.msk.bf16.gmra.mxu2 %vm336_vm0, %v4126_v29  ;;  %3422 = vmatmul.msk.bf16.gmra.mxu3 %vm336_vm0, %v4126_v29 }
  0x52   :  { %3327 = vmatmul.msk.bf16.gmra.mxu0 %vm336_vm0, %v4127_v31  ;;  %3358 = vmatmul.msk.bf16.gmra.mxu1 %vm336_vm0, %v4126_v29 }
  0x54   :  { %3391 = vmatmul.msk.bf16.gmra.mxu2 %vm336_vm0, %v4127_v31  ;;  %3423 = vmatmul.msk.bf16.gmra.mxu3 %vm336_vm0, %v4127_v31 }
  0x62   :  { %3328 = vmatmul.msk.bf16.gmra.mxu0 %vm336_vm0, %v4128_v32  ;;  %3359 = vmatmul.msk.bf16.gmra.mxu1 %vm336_vm0, %v4127_v31 }
  0x64   :  { %3392 = vmatmul.msk.bf16.gmra.mxu2 %vm336_vm0, %v4128_v32  ;;  %3424 = vmatmul.msk.bf16.gmra.mxu3 %vm336_vm0, %v4128_v32 }
  0x72   :  { %3329 = vmatmul.msk.bf16.gmra.mxu0 %vm336_vm0, %v4129_v33  ;;  %3360 = vmatmul.msk.bf16.gmra.mxu1 %vm336_vm0, %v4128_v32 }
  0x74   :  { %3393 = vmatmul.msk.bf16.gmra.mxu2 %vm336_vm0, %v4129_v33  ;;  %3425 = vmatmul.msk.bf16.gmra.mxu3 %vm336_vm0, %v4129_v33 }
  0x82   :  { %3330 = vmatmul.msk.bf16.gmra.mxu0 %vm336_vm0, %v4130_v34  ;;  %3361 = vmatmul.msk.bf16.gmra.mxu1 %vm336_vm0, %v4129_v33 }
  0x84   :  { %3394 = vmatmul.msk.bf16.gmra.mxu2 %vm336_vm0, %v4130_v34  ;;  %3426 = vmatmul.msk.bf16.gmra.mxu3 %vm336_vm0, %v4130_v34 }
  0x8f   :  { %v442_v47 = vpop.f32.mrf.mxu0  ;;  %v4573_v48 = vpop.f32.mrf.mxu1 }
  0x90   :  { %v443_v50 = vadd.f32 %v442_v47, %v4575_v49 }
  0x92   :  { %3331 = vmatmul.msk.bf16.gmra.mxu0 %vm336_vm0, %v4131_v45  ;;  %3362 = vmatmul.msk.bf16.gmra.mxu1 %vm336_vm0, %v4130_v34  ;;  %v1109_v57 = vmax.f32 %v443_v50, 0.0 }
  0x94   :  { %3395 = vmatmul.msk.bf16.gmra.mxu2 %vm336_vm0, %v4131_v45  ;;  %3427 = vmatmul.msk.bf16.gmra.mxu3 %vm336_vm0, %v4131_v45 }
  0x97   :  { %v780_v51 = vpop.f32.mrf.mxu2  ;;  %v949_v52 = vpop.f32.mrf.mxu3 }
  0x98   :  { %v444_v55 = vpop.f32.mrf.mxu0  ;;  %v4586_v56 = vpop.f32.mrf.mxu1  ;;  %v781_v60 = vadd.f32 %v780_v51, %v4582_v53  ;;  %v950_v61 = vadd.f32 %v949_v52, %v4584_v54 }
  0x99   :  { %v445_v58 = vadd.f32 %v444_v55, %v4575_v49 }
  0x9a   :  { %v1111_v2 = vmax.f32 %v781_v60, 0.0  ;;  %v1112_v3 = vmax.f32 %v950_v61, 0.0 }
  0x9b   :  { %v1113_v59 = vmax.f32 %v445_v58, 0.0 }
  0x9d   :  { %v1365_v62 = vadd.f32 %v1113_v59, %v1109_v57 }
  0x9f   :  { %v782_v63 = vpop.f32.mrf.mxu2  ;;  %v951_v0 = vpop.f32.mrf.mxu3 }
  0xa0   :  { %v783_v4 = vadd.f32 %v782_v63, %v4582_v53  ;;  %v952_v5 = vadd.f32 %v951_v0, %v4584_v54  ;;  %v447_v6 = vpop.f32.mrf.mxu0  ;;  %v611_v7 = vpop.f32.mrf.mxu1 }
  0xa1   :  { %v448_v8 = vadd.f32 %v447_v6, %v4575_v49  ;;  %v612_v16 = vadd.f32 %v611_v7, %v4597_v12 }
  0xa2   :  { %v1115_v9 = vmax.f32 %v783_v4, 0.0  ;;  %v1116_v10 = vmax.f32 %v952_v5, 0.0  ;;  %3332 = vmatmul.msk.bf16.gmra.mxu0 %vm336_vm0, %v4132_v1  ;;  %3363 = vmatmul.msk.bf16.gmra.mxu1 %vm336_vm0, %v4131_v45 }
  0xa3   :  { %v1117_v11 = vmax.f32 %v448_v8, 0.0  ;;  %v1110_v27 = vmax.f32 %v612_v16, 0.0 }
  0xa4   :  { %v1439_v13 = vadd.f32 %v1115_v9, %v1111_v2  ;;  %v1476_v14 = vadd.f32 %v1116_v10, %v1112_v3  ;;  %3396 = vmatmul.msk.bf16.gmra.mxu2 %vm336_vm0, %v4132_v1  ;;  %3428 = vmatmul.msk.bf16.gmra.mxu3 %vm336_vm0, %v4132_v1  ;;  %v4626_v10 = vld [vmem:[%s6276_s0 + $0x58] sm:$0xff] }
  0xa5   :  { %v1366_v15 = vadd.f32 %v1365_v62, %v1117_v11 }
  0xa7   :  { %v785_v17 = vpop.f32.mrf.mxu2  ;;  %v954_v18 = vpop.f32.mrf.mxu3 }
  0xa8   :  { %v786_v19 = vadd.f32 %v785_v17, %v4582_v53  ;;  %v955_v20 = vadd.f32 %v954_v18, %v4584_v54  ;;  %v449_v21 = vpop.f32.mrf.mxu0  ;;  %v613_v22 = vpop.f32.mrf.mxu1 }
  0xa9   :  { %v450_v23 = vadd.f32 %v449_v21, %v4575_v49  ;;  %v614_v24 = vadd.f32 %v613_v22, %v4597_v12 }
  0xaa   :  { %v1119_v25 = vmax.f32 %v786_v19, 0.0  ;;  %v1120_v26 = vmax.f32 %v955_v20, 0.0 }
  0xab   :  { %v1121_v28 = vmax.f32 %v450_v23, 0.0  ;;  %v1114_v29 = vmax.f32 %v614_v24, 0.0 }
  0xac   :  { %v1440_v30 = vadd.f32 %v1439_v13, %v1119_v25  ;;  %v1477_v31 = vadd.f32 %v1476_v14, %v1120_v26  ;;  %v4183_v26 = vld [vmem:[%s6278_s7 + $0x64] sm:$0xf] }
  0xad   :  { %v1367_v32 = vadd.f32 %v1366_v15, %v1121_v28  ;;  %v1402_v33 = vadd.f32 %v1114_v29, %v1110_v27  ;;  %v3535_v27 = vld [vmem:[%s6278_s7 + $0x68] sm:$0xf0]  ;;  %v4167_v28 = vld [vmem:[%s6277_s5 + $0x20] sm:$0xff] }
  0xae   :  { %v3538_v29 = vor.u32 %v4183_v26, %v3535_v27  ;;  %1828 = vmatpush.bf16.msrb.mxu0 %v4167_v28 }
  0xaf   :  { %v787_v34 = vpop.f32.mrf.mxu2  ;;  %v956_v35 = vpop.f32.mrf.mxu3 }
  0xb0   :  { %v788_v37 = vadd.f32 %v787_v34, %v4582_v53  ;;  %v957_v38 = vadd.f32 %v956_v35, %v4584_v54  ;;  %v452_v39 = vpop.f32.mrf.mxu0  ;;  %v616_v40 = vpop.f32.mrf.mxu1  ;;  %1956 = vmatpush.bf16.msrb.mxu2 %v3538_v29  ;;  %v4136_v29 = vld [vmem:[%s6276_s0 + $0x68] sm:$0xff] }
  0xb1   :  { %v453_v41 = vadd.f32 %v452_v39, %v4575_v49  ;;  %v617_v42 = vadd.f32 %v616_v40, %v4597_v12 }
  0xb2   :  { %v1123_v43 = vmax.f32 %v788_v37, 0.0  ;;  %v1124_v44 = vmax.f32 %v957_v38, 0.0  ;;  %3333 = vmatmul.msk.bf16.gmra.mxu0 %vm336_vm0, %v4133_v36  ;;  %3364 = vmatmul.msk.bf16.gmra.mxu1 %vm336_vm0, %v4132_v1 }
  0xb3   :  { %v1125_v45 = vmax.f32 %v453_v41, 0.0  ;;  %v1118_v46 = vmax.f32 %v617_v42, 0.0 }
  0xb4   :  { %v1441_v47 = vadd.f32 %v1440_v30, %v1123_v43  ;;  %v1478_v50 = vadd.f32 %v1477_v31, %v1124_v44  ;;  %3397 = vmatmul.msk.bf16.gmra.mxu2 %vm336_vm0, %v4133_v36  ;;  %3429 = vmatmul.msk.bf16.gmra.mxu3 %vm336_vm0, %v4133_v36  ;;  %v3533_v44 = vld [vmem:[%s6278_s7 + $0x60] sm:$0xf] }
  0xb5   :  { %v1368_v51 = vadd.f32 %v1367_v32, %v1125_v45  ;;  %v1403_v52 = vadd.f32 %v1402_v33, %v1118_v46  ;;  %v4184_v45 = vld [vmem:[%s6278_s7 + $0x64] sm:$0xf0] }
  0xb7   :  { %v790_v55 = vpop.f32.mrf.mxu2  ;;  %v959_v57 = vpop.f32.mrf.mxu3 }
  0xb8   :  { %v791_v58 = vadd.f32 %v790_v55, %v4582_v53  ;;  %v960_v59 = vadd.f32 %v959_v57, %v4584_v54  ;;  %v454_v60 = vpop.f32.mrf.mxu0  ;;  %v618_v61 = vpop.f32.mrf.mxu1 }
  0xb9   :  { %v455_v62 = vadd.f32 %v454_v60, %v4575_v49  ;;  %v619_v63 = vadd.f32 %v618_v61, %v4597_v12 }
  0xba   :  { %v1127_v0 = vmax.f32 %v791_v58, 0.0  ;;  %v1128_v1 = vmax.f32 %v960_v59, 0.0  ;;  %v4135_v59 = vld [vmem:[%s6276_s0 + $0x60] sm:$0xff] }
  0xbb   :  { %v1129_v2 = vmax.f32 %v455_v62, 0.0  ;;  %v1122_v3 = vmax.f32 %v619_v63, 0.0 }
  0xbc   :  { %v1442_v4 = vadd.f32 %v1441_v47, %v1127_v0  ;;  %v1479_v5 = vadd.f32 %v1478_v50, %v1128_v1  ;;  %v3534_v50 = vor.u32 %v4184_v45, %v3533_v44 }
  0xbd   :  { %v1369_v6 = vadd.f32 %v1368_v51, %v1129_v2  ;;  %v1404_v7 = vadd.f32 %v1403_v52, %v1122_v3  ;;  %v3597_v51 = vld [vmem:[%s6279_s9 + $0x60] sm:$0xf]  ;;  %v4200_v52 = vld [vmem:[%s6279_s9 + $0x64] sm:$0xf0] }
  0xbe   :  { %v3598_v55 = vor.u32 %v4200_v52, %v3597_v51  ;;  %1943 = vmatpush.bf16.msra.mxu1 %v3534_v50 }
  0xbf   :  { %v792_v8 = vpop.f32.mrf.mxu2  ;;  %v961_v9 = vpop.f32.mrf.mxu3 }
  0xc0   :  { %v793_v11 = vadd.f32 %v792_v8, %v4582_v53  ;;  %v962_v13 = vadd.f32 %v961_v9, %v4584_v54  ;;  %v457_v14 = vpop.f32.mrf.mxu0  ;;  %v621_v15 = vpop.f32.mrf.mxu1  ;;  %2395 = vmatpush.bf16.msrb.mxu3 %v3598_v55 }
  0xc1   :  { %v458_v16 = vadd.f32 %v457_v14, %v4575_v49  ;;  %v622_v17 = vadd.f32 %v621_v15, %v4597_v12 }
  0xc2   :  { %v1131_v18 = vmax.f32 %v793_v11, 0.0  ;;  %v1132_v19 = vmax.f32 %v962_v13, 0.0  ;;  %3334 = vmatmul.msk.bf16.gmra.mxu0 %vm336_vm0, %v4626_v10  ;;  %3365 = vmatmul.msk.bf16.gmra.mxu1 %vm336_vm0, %v4133_v36 }
  0xc3   :  { %v1133_v20 = vmax.f32 %v458_v16, 0.0  ;;  %v1126_v21 = vmax.f32 %v622_v17, 0.0 }
  0xc4   :  { %v1443_v22 = vadd.f32 %v1442_v4, %v1131_v18  ;;  %v1480_v23 = vadd.f32 %v1479_v5, %v1132_v19  ;;  %3398 = vmatmul.msk.bf16.gmra.mxu2 %vm336_vm0, %v4626_v10  ;;  %3430 = vmatmul.msk.bf16.gmra.mxu3 %vm336_vm0, %v4626_v10 }
  0xc5   :  { %v1370_v24 = vadd.f32 %v1369_v6, %v1133_v20  ;;  %v1405_v25 = vadd.f32 %v1404_v7, %v1126_v21 }
  0xc7   :  { %v795_v30 = vpop.f32.mrf.mxu2  ;;  %v964_v31 = vpop.f32.mrf.mxu3 }
  0xc8   :  { %v796_v32 = vadd.f32 %v795_v30, %v4582_v53  ;;  %v965_v33 = vadd.f32 %v964_v31, %v4584_v54  ;;  %v459_v34 = vpop.f32.mrf.mxu0  ;;  %v623_v35 = vpop.f32.mrf.mxu1 }
  0xc9   :  { %v460_v36 = vadd.f32 %v459_v34, %v4575_v49  ;;  %v624_v37 = vadd.f32 %v623_v35, %v4597_v12 }
  0xca   :  { %v1135_v38 = vmax.f32 %v796_v32, 0.0  ;;  %v1136_v39 = vmax.f32 %v965_v33, 0.0 }
  0xcb   :  { %v1137_v40 = vmax.f32 %v460_v36, 0.0  ;;  %v1130_v41 = vmax.f32 %v624_v37, 0.0 }
  0xcc   :  { %v1444_v42 = vadd.f32 %v1443_v22, %v1135_v38  ;;  %v1481_v43 = vadd.f32 %v1480_v23, %v1136_v39 }
  0xcd   :  { %v1371_v46 = vadd.f32 %v1370_v24, %v1137_v40  ;;  %v1406_v47 = vadd.f32 %v1405_v25, %v1130_v41 }
  0xcf   :  { %v797_v57 = vpop.f32.mrf.mxu2  ;;  %v966_v58 = vpop.f32.mrf.mxu3 }
  0xd0   :  { %v798_v60 = vadd.f32 %v797_v57, %v4582_v53  ;;  %v967_v61 = vadd.f32 %v966_v58, %v4584_v54  ;;  %v462_v62 = vpop.f32.mrf.mxu0  ;;  %v626_v63 = vpop.f32.mrf.mxu1 }
  0xd1   :  { %v463_v0 = vadd.f32 %v462_v62, %v4575_v49  ;;  %v627_v1 = vadd.f32 %v626_v63, %v4597_v12 }
  0xd2   :  { %v1139_v2 = vmax.f32 %v798_v60, 0.0  ;;  %v1140_v3 = vmax.f32 %v967_v61, 0.0  ;;  %3335 = vmatmul.msk.bf16.gmra.mxu0 %vm336_vm0, %v4135_v59  ;;  %3366 = vmatmul.msk.bf16.gmra.mxu1 %vm336_vm0, %v4626_v10 }
  0xd3   :  { %v1141_v4 = vmax.f32 %v463_v0, 0.0  ;;  %v1134_v5 = vmax.f32 %v627_v1, 0.0 }
  0xd4   :  { %v1445_v6 = vadd.f32 %v1444_v42, %v1139_v2  ;;  %v1482_v7 = vadd.f32 %v1481_v43, %v1140_v3  ;;  %3399 = vmatmul.msk.bf16.gmra.mxu2 %vm336_vm0, %v4135_v59  ;;  %3431 = vmatmul.msk.bf16.gmra.mxu3 %vm336_vm0, %v4135_v59  ;;  %v4137_v3 = vld [vmem:[%s6276_s0 + $0x70] sm:$0xff] }
  0xd5   :  { %v1372_v8 = vadd.f32 %v1371_v46, %v1141_v4  ;;  %v1407_v9 = vadd.f32 %v1406_v47, %v1134_v5 }
  0xd7   :  { %v800_v11 = vpop.f32.mrf.mxu2  ;;  %v969_v13 = vpop.f32.mrf.mxu3 }
  0xd8   :  { %v801_v14 = vadd.f32 %v800_v11, %v4582_v53  ;;  %v970_v15 = vadd.f32 %v969_v13, %v4584_v54  ;;  %v464_v16 = vpop.f32.mrf.mxu0  ;;  %v628_v17 = vpop.f32.mrf.mxu1 }
  0xd9   :  { %v465_v18 = vadd.f32 %v464_v16, %v4575_v49  ;;  %v629_v10 = vadd.f32 %v628_v17, %v4597_v12 }
  0xda   :  { %v1143_v19 = vmax.f32 %v801_v14, 0.0  ;;  %v1144_v20 = vmax.f32 %v970_v15, 0.0 }
  0xdb   :  { %v1145_v21 = vmax.f32 %v465_v18, 0.0  ;;  %v1138_v22 = vmax.f32 %v629_v10, 0.0 }
  0xdc   :  { %v1446_v23 = vadd.f32 %v1445_v6, %v1143_v19  ;;  %v1483_v24 = vadd.f32 %v1482_v7, %v1144_v20 }
  0xdd   :  { %v1373_v25 = vadd.f32 %v1372_v8, %v1145_v21  ;;  %v1408_v26 = vadd.f32 %v1407_v9, %v1138_v22 }
  0xdf   :  { %v802_v27 = vpop.f32.mrf.mxu2  ;;  %v971_v28 = vpop.f32.mrf.mxu3 }
  0xe0   :  { %v803_v30 = vadd.f32 %v802_v27, %v4582_v53  ;;  %v972_v31 = vadd.f32 %v971_v28, %v4584_v54  ;;  %v467_v32 = vpop.f32.mrf.mxu0  ;;  %v631_v33 = vpop.f32.mrf.mxu1 }
  0xe1   :  { %v468_v34 = vadd.f32 %v467_v32, %v4575_v49  ;;  %v632_v35 = vadd.f32 %v631_v33, %v4597_v12 }
  0xe2   :  { %v1147_v36 = vmax.f32 %v803_v30, 0.0  ;;  %v1148_v37 = vmax.f32 %v972_v31, 0.0  ;;  %3336 = vmatmul.msk.bf16.gmra.mxu0 %vm336_vm0, %v4136_v29  ;;  %3367 = vmatmul.msk.bf16.gmra.mxu1 %vm336_vm0, %v4135_v59 }
  0xe3   :  { %v1149_v38 = vmax.f32 %v468_v34, 0.0  ;;  %v1142_v39 = vmax.f32 %v632_v35, 0.0 }
  0xe4   :  { %v1447_v40 = vadd.f32 %v1446_v23, %v1147_v36  ;;  %v1484_v41 = vadd.f32 %v1483_v24, %v1148_v37  ;;  %3400 = vmatmul.msk.bf16.gmra.mxu2 %vm336_vm0, %v4136_v29  ;;  %3432 = vmatmul.msk.bf16.gmra.mxu3 %vm336_vm0, %v4136_v29  ;;  %v4713_v37 = vld [vmem:[%s6276_s0 + $0x78] sm:$0xff] }
  0xe5   :  { %v1374_v42 = vadd.f32 %v1373_v25, %v1149_v38  ;;  %v1409_v43 = vadd.f32 %v1408_v26, %v1142_v39 }
  0xe7   :  { %v805_v44 = vpop.f32.mrf.mxu2  ;;  %v974_v45 = vpop.f32.mrf.mxu3 }
  0xe8   :  { %v806_v46 = vadd.f32 %v805_v44, %v4582_v53  ;;  %v975_v47 = vadd.f32 %v974_v45, %v4584_v54  ;;  %v469_v50 = vpop.f32.mrf.mxu0  ;;  %v633_v51 = vpop.f32.mrf.mxu1 }
  0xe9   :  { %v470_v52 = vadd.f32 %v469_v50, %v4575_v49  ;;  %v634_v55 = vadd.f32 %v633_v51, %v4597_v12 }
  0xea   :  { %v1151_v57 = vmax.f32 %v806_v46, 0.0  ;;  %v1152_v58 = vmax.f32 %v975_v47, 0.0 }
  0xeb   :  { %v1153_v59 = vmax.f32 %v470_v52, 0.0  ;;  %v1146_v60 = vmax.f32 %v634_v55, 0.0 }
  0xec   :  { %v1448_v61 = vadd.f32 %v1447_v40, %v1151_v57  ;;  %v1485_v62 = vadd.f32 %v1484_v41, %v1152_v58  ;;  %v4166_v57 = vld [vmem:[%s6277_s5 + $0x18] sm:$0xff]  ;;  %v4181_v58 = vld [vmem:[%s6278_s7 + $0x54] sm:$0xf] }
  0xed   :  { %v1375_v63 = vadd.f32 %v1374_v42, %v1153_v59  ;;  %v1410_v0 = vadd.f32 %v1409_v43, %v1146_v60  ;;  %v3527_v59 = vld [vmem:[%s6278_s7 + $0x58] sm:$0xf0]  ;;  %1829 = vmatpush.bf16.msrb.mxu0 %v4166_v57 }
  0xee   :  { %v3530_v60 = vor.u32 %v4181_v58, %v3527_v59 }
  0xef   :  { %v807_v1 = vpop.f32.mrf.mxu2  ;;  %v976_v2 = vpop.f32.mrf.mxu3 }
  0xf0   :  { %v808_v4 = vadd.f32 %v807_v1, %v4582_v53  ;;  %v977_v5 = vadd.f32 %v976_v2, %v4584_v54  ;;  %v472_v6 = vpop.f32.mrf.mxu0  ;;  %v636_v7 = vpop.f32.mrf.mxu1  ;;  %1957 = vmatpush.bf16.msrb.mxu2 %v3530_v60  ;;  %v4140_v60 = vld [vmem:[%s6276_s0 + $0x88] sm:$0xff] }
  0xf1   :  { %v473_v8 = vadd.f32 %v472_v6, %v4575_v49  ;;  %v637_v9 = vadd.f32 %v636_v7, %v4597_v12 }
  0xf2   :  { %v1155_v11 = vmax.f32 %v808_v4, 0.0  ;;  %v1156_v13 = vmax.f32 %v977_v5, 0.0  ;;  %3337 = vmatmul.msk.bf16.gmra.mxu0 %vm336_vm0, %v4137_v3  ;;  %3368 = vmatmul.msk.bf16.gmra.mxu1 %vm336_vm0, %v4136_v29 }
  0xf3   :  { %v1157_v14 = vmax.f32 %v473_v8, 0.0  ;;  %v1150_v15 = vmax.f32 %v637_v9, 0.0 }
  0xf4   :  { %v1449_v16 = vadd.f32 %v1448_v61, %v1155_v11  ;;  %v1486_v17 = vadd.f32 %v1485_v62, %v1156_v13  ;;  %3401 = vmatmul.msk.bf16.gmra.mxu2 %vm336_vm0, %v4137_v3  ;;  %3433 = vmatmul.msk.bf16.gmra.mxu3 %vm336_vm0, %v4137_v3  ;;  %v3525_v13 = vld [vmem:[%s6278_s7 + $0x50] sm:$0xf] }
  0xf5   :  { %v1376_v18 = vadd.f32 %v1375_v63, %v1157_v14  ;;  %v1411_v10 = vadd.f32 %v1410_v0, %v1150_v15  ;;  %v4182_v14 = vld [vmem:[%s6278_s7 + $0x54] sm:$0xf0] }
  0xf7   :  { %v810_v19 = vpop.f32.mrf.mxu2  ;;  %v979_v20 = vpop.f32.mrf.mxu3 }
  0xf8   :  { %v811_v21 = vadd.f32 %v810_v19, %v4582_v53  ;;  %v980_v22 = vadd.f32 %v979_v20, %v4584_v54  ;;  %v474_v23 = vpop.f32.mrf.mxu0  ;;  %v638_v24 = vpop.f32.mrf.mxu1 }
  0xf9   :  { %v475_v25 = vadd.f32 %v474_v23, %v4575_v49  ;;  %v639_v26 = vadd.f32 %v638_v24, %v4597_v12 }
  0xfa   :  { %v1159_v27 = vmax.f32 %v811_v21, 0.0  ;;  %v1160_v28 = vmax.f32 %v980_v22, 0.0  ;;  %v4139_v22 = vld [vmem:[%s6276_s0 + $0x80] sm:$0xff] }
  0xfb   :  { %v1161_v29 = vmax.f32 %v475_v25, 0.0  ;;  %v1154_v30 = vmax.f32 %v639_v26, 0.0 }
  0xfc   :  { %v1450_v31 = vadd.f32 %v1449_v16, %v1159_v27  ;;  %v1487_v32 = vadd.f32 %v1486_v17, %v1160_v28  ;;  %v3526_v17 = vor.u32 %v4182_v14, %v3525_v13 }
  0xfd   :  { %v1377_v33 = vadd.f32 %v1376_v18, %v1161_v29  ;;  %v1412_v34 = vadd.f32 %v1411_v10, %v1154_v30  ;;  %v3589_v18 = vld [vmem:[%s6279_s9 + $0x50] sm:$0xf]  ;;  %v4198_v10 = vld [vmem:[%s6279_s9 + $0x54] sm:$0xf0] }
  0xfe   :  { %v3590_v19 = vor.u32 %v4198_v10, %v3589_v18  ;;  %1944 = vmatpush.bf16.msra.mxu1 %v3526_v17 }
  0xff   :  { %v812_v35 = vpop.f32.mrf.mxu2  ;;  %v981_v36 = vpop.f32.mrf.mxu3 }
 0x100   :  { %v813_v38 = vadd.f32 %v812_v35, %v4582_v53  ;;  %v982_v39 = vadd.f32 %v981_v36, %v4584_v54  ;;  %v477_v40 = vpop.f32.mrf.mxu0  ;;  %v641_v41 = vpop.f32.mrf.mxu1  ;;  %2396 = vmatpush.bf16.msrb.mxu3 %v3590_v19 }
 0x101   :  { %v478_v42 = vadd.f32 %v477_v40, %v4575_v49  ;;  %v642_v43 = vadd.f32 %v641_v41, %v4597_v12 }
 0x102   :  { %v1163_v44 = vmax.f32 %v813_v38, 0.0  ;;  %v1164_v45 = vmax.f32 %v982_v39, 0.0  ;;  %3338 = vmatmul.msk.bf16.gmra.mxu0 %vm336_vm0, %v4713_v37  ;;  %3369 = vmatmul.msk.bf16.gmra.mxu1 %vm336_vm0, %v4137_v3 }
 0x103   :  { %v1165_v46 = vmax.f32 %v478_v42, 0.0  ;;  %v1158_v47 = vmax.f32 %v642_v43, 0.0 }
 0x104   :  { %v1451_v50 = vadd.f32 %v1450_v31, %v1163_v44  ;;  %v1488_v51 = vadd.f32 %v1487_v32, %v1164_v45  ;;  %3402 = vmatmul.msk.bf16.gmra.mxu2 %vm336_vm0, %v4713_v37  ;;  %3434 = vmatmul.msk.bf16.gmra.mxu3 %vm336_vm0, %v4713_v37 }
 0x105   :  { %v1378_v52 = vadd.f32 %v1377_v33, %v1165_v46  ;;  %v1413_v55 = vadd.f32 %v1412_v34, %v1158_v47 }
 0x107   :  { %v815_v61 = vpop.f32.mrf.mxu2  ;;  %v984_v62 = vpop.f32.mrf.mxu3 }
 0x108   :  { %v816_v63 = vadd.f32 %v815_v61, %v4582_v53  ;;  %v985_v0 = vadd.f32 %v984_v62, %v4584_v54  ;;  %v479_v1 = vpop.f32.mrf.mxu0  ;;  %v643_v2 = vpop.f32.mrf.mxu1 }
 0x109   :  { %v480_v3 = vadd.f32 %v479_v1, %v4575_v49  ;;  %v644_v4 = vadd.f32 %v643_v2, %v4597_v12 }
 0x10a   :  { %v1167_v5 = vmax.f32 %v816_v63, 0.0  ;;  %v1168_v6 = vmax.f32 %v985_v0, 0.0 }
 0x10b   :  { %v1169_v7 = vmax.f32 %v480_v3, 0.0  ;;  %v1162_v8 = vmax.f32 %v644_v4, 0.0 }
 0x10c   :  { %v1452_v9 = vadd.f32 %v1451_v50, %v1167_v5  ;;  %v1489_v11 = vadd.f32 %v1488_v51, %v1168_v6 }
 0x10d   :  { %v1379_v15 = vadd.f32 %v1378_v52, %v1169_v7  ;;  %v1414_v16 = vadd.f32 %v1413_v55, %v1162_v8 }
 0x10f   :  { %v817_v20 = vpop.f32.mrf.mxu2  ;;  %v986_v21 = vpop.f32.mrf.mxu3 }
 0x110   :  { %v818_v23 = vadd.f32 %v817_v20, %v4582_v53  ;;  %v987_v24 = vadd.f32 %v986_v21, %v4584_v54  ;;  %v482_v25 = vpop.f32.mrf.mxu0  ;;  %v646_v26 = vpop.f32.mrf.mxu1 }
 0x111   :  { %v483_v27 = vadd.f32 %v482_v25, %v4575_v49  ;;  %v647_v28 = vadd.f32 %v646_v26, %v4597_v12 }
 0x112   :  { %v1171_v29 = vmax.f32 %v818_v23, 0.0  ;;  %v1172_v30 = vmax.f32 %v987_v24, 0.0  ;;  %3339 = vmatmul.msk.bf16.gmra.mxu0 %vm336_vm0, %v4139_v22  ;;  %3370 = vmatmul.msk.bf16.gmra.mxu1 %vm336_vm0, %v4713_v37 }
 0x113   :  { %v1173_v31 = vmax.f32 %v483_v27, 0.0  ;;  %v1166_v32 = vmax.f32 %v647_v28, 0.0 }
 0x114   :  { %v1453_v33 = vadd.f32 %v1452_v9, %v1171_v29  ;;  %v1490_v34 = vadd.f32 %v1489_v11, %v1172_v30  ;;  %3403 = vmatmul.msk.bf16.gmra.mxu2 %vm336_vm0, %v4139_v22  ;;  %3435 = vmatmul.msk.bf16.gmra.mxu3 %vm336_vm0, %v4139_v22  ;;  %v4141_v30 = vld [vmem:[%s6276_s0 + $0x90] sm:$0xff] }
 0x115   :  { %v1380_v35 = vadd.f32 %v1379_v15, %v1173_v31  ;;  %v1415_v36 = vadd.f32 %v1414_v16, %v1166_v32 }
 0x117   :  { %v820_v38 = vpop.f32.mrf.mxu2  ;;  %v989_v39 = vpop.f32.mrf.mxu3 }
 0x118   :  { %v821_v40 = vadd.f32 %v820_v38, %v4582_v53  ;;  %v990_v41 = vadd.f32 %v989_v39, %v4584_v54  ;;  %v484_v42 = vpop.f32.mrf.mxu0  ;;  %v648_v43 = vpop.f32.mrf.mxu1 }
 0x119   :  { %v485_v44 = vadd.f32 %v484_v42, %v4575_v49  ;;  %v649_v37 = vadd.f32 %v648_v43, %v4597_v12 }
 0x11a   :  { %v1175_v45 = vmax.f32 %v821_v40, 0.0  ;;  %v1176_v46 = vmax.f32 %v990_v41, 0.0 }
 0x11b   :  { %v1177_v47 = vmax.f32 %v485_v44, 0.0  ;;  %v1170_v50 = vmax.f32 %v649_v37, 0.0 }
 0x11c   :  { %v1454_v51 = vadd.f32 %v1453_v33, %v1175_v45  ;;  %v1491_v52 = vadd.f32 %v1490_v34, %v1176_v46 }
 0x11d   :  { %v1381_v55 = vadd.f32 %v1380_v35, %v1177_v47  ;;  %v1416_v57 = vadd.f32 %v1415_v36, %v1170_v50 }
 0x11f   :  { %v822_v58 = vpop.f32.mrf.mxu2  ;;  %v991_v59 = vpop.f32.mrf.mxu3 }
 0x120   :  { %v823_v61 = vadd.f32 %v822_v58, %v4582_v53  ;;  %v992_v62 = vadd.f32 %v991_v59, %v4584_v54  ;;  %v487_v63 = vpop.f32.mrf.mxu0  ;;  %v651_v0 = vpop.f32.mrf.mxu1 }
 0x121   :  { %v488_v1 = vadd.f32 %v487_v63, %v4575_v49  ;;  %v652_v2 = vadd.f32 %v651_v0, %v4597_v12 }
 0x122   :  { %v1179_v3 = vmax.f32 %v823_v61, 0.0  ;;  %v1180_v4 = vmax.f32 %v992_v62, 0.0  ;;  %3340 = vmatmul.msk.bf16.gmra.mxu0 %vm336_vm0, %v4140_v60  ;;  %3371 = vmatmul.msk.bf16.gmra.mxu1 %vm336_vm0, %v4139_v22  ;;  %v4800_v62 = vld [vmem:[%s6281_s2] sm:$0x3] }
 0x123   :  { %v1181_v5 = vmax.f32 %v488_v1, 0.0  ;;  %v1174_v6 = vmax.f32 %v652_v2, 0.0  ;;  %v1680_v1 = vsel %vm1679_vm1, %v4800_v62, 0.0 }
 0x124   :  { %v1455_v7 = vadd.f32 %v1454_v51, %v1179_v3  ;;  %v1492_v8 = vadd.f32 %v1491_v52, %v1180_v4  ;;  %3404 = vmatmul.msk.bf16.gmra.mxu2 %vm336_vm0, %v4140_v60  ;;  %3436 = vmatmul.msk.bf16.gmra.mxu3 %vm336_vm0, %v4140_v60 }
 0x125   :  { %v1382_v9 = vadd.f32 %v1381_v55, %v1181_v5  ;;  %v1417_v11 = vadd.f32 %v1416_v57, %v1174_v6  ;;  %1681 = vadd.xlane.f32.xlu0 %v1680_v1  ;;  %v4806_v6 = vld [vmem:[%s6276_s0 + $0x98] sm:$0xff] }
 0x127   :  { %v825_v13 = vpop.f32.mrf.mxu2  ;;  %v994_v14 = vpop.f32.mrf.mxu3 }
 0x128   :  { %v826_v15 = vadd.f32 %v825_v13, %v4582_v53  ;;  %v995_v16 = vadd.f32 %v994_v14, %v4584_v54  ;;  %v489_v17 = vpop.f32.mrf.mxu0  ;;  %v653_v18 = vpop.f32.mrf.mxu1 }
 0x129   :  { %v490_v10 = vadd.f32 %v489_v17, %v4575_v49  ;;  %v654_v19 = vadd.f32 %v653_v18, %v4597_v12 }
 0x12a   :  { %v1183_v20 = vmax.f32 %v826_v15, 0.0  ;;  %v1184_v21 = vmax.f32 %v995_v16, 0.0 }
 0x12b   :  { %v1185_v22 = vmax.f32 %v490_v10, 0.0  ;;  %v1178_v23 = vmax.f32 %v654_v19, 0.0 }
 0x12c   :  { %v1456_v24 = vadd.f32 %v1455_v7, %v1183_v20  ;;  %v1493_v25 = vadd.f32 %v1492_v8, %v1184_v21  ;;  %v4165_v20 = vld [vmem:[%s6277_s5 + $0x10] sm:$0xff] }
 0x12d   :  { %v1383_v26 = vadd.f32 %v1382_v9, %v1185_v22  ;;  %v1418_v27 = vadd.f32 %v1417_v11, %v1178_v23  ;;  %v4179_v23 = vld [vmem:[%s6278_s7 + $0x44] sm:$0xf]  ;;  %1830 = vmatpush.bf16.msrb.mxu0 %v4165_v20 }
 0x12f   :  { %v827_v28 = vpop.f32.mrf.mxu2  ;;  %v996_v29 = vpop.f32.mrf.mxu3 }
 0x130   :  { %v828_v31 = vadd.f32 %v827_v28, %v4582_v53  ;;  %v997_v32 = vadd.f32 %v996_v29, %v4584_v54  ;;  %v492_v33 = vpop.f32.mrf.mxu0  ;;  %v656_v34 = vpop.f32.mrf.mxu1 }
 0x131   :  { %v493_v35 = vadd.f32 %v492_v33, %v4575_v49  ;;  %v657_v36 = vadd.f32 %v656_v34, %v4597_v12 }
 0x132   :  { %v1187_v38 = vmax.f32 %v828_v31, 0.0  ;;  %v1188_v39 = vmax.f32 %v997_v32, 0.0  ;;  %3341 = vmatmul.msk.bf16.gmra.mxu0 %vm336_vm0, %v4141_v30  ;;  %3372 = vmatmul.msk.bf16.gmra.mxu1 %vm336_vm0, %v4140_v60 }
 0x133   :  { %v1189_v40 = vmax.f32 %v493_v35, 0.0  ;;  %v1182_v41 = vmax.f32 %v657_v36, 0.0 }
 0x134   :  { %v1457_v42 = vadd.f32 %v1456_v24, %v1187_v38  ;;  %v1494_v43 = vadd.f32 %v1493_v25, %v1188_v39  ;;  %3405 = vmatmul.msk.bf16.gmra.mxu2 %vm336_vm0, %v4141_v30  ;;  %3437 = vmatmul.msk.bf16.gmra.mxu3 %vm336_vm0, %v4141_v30  ;;  %v3519_v24 = vld [vmem:[%s6278_s7 + $0x48] sm:$0xf0]  ;;  %v1685_v25 = vlaneseq }
 0x135   :  { %v1384_v44 = vadd.f32 %v1383_v26, %v1189_v40  ;;  %v1419_v37 = vadd.f32 %v1418_v27, %v1182_v41  ;;  %v3522_v26 = vor.u32 %v4179_v23, %v3519_v24 }
 0x136   :  { %v1686_v29 = vshrl.u32 %v1685_v25, 7 }
 0x137   :  { %v830_v45 = vpop.f32.mrf.mxu2  ;;  %v999_v46 = vpop.f32.mrf.mxu3  ;;  %1958 = vmatpush.bf16.msrb.mxu2 %v3522_v26 }
 0x138   :  { %v831_v47 = vadd.f32 %v830_v45, %v4582_v53  ;;  %v1000_v50 = vadd.f32 %v999_v46, %v4584_v54  ;;  %v494_v51 = vpop.f32.mrf.mxu0  ;;  %v658_v52 = vpop.f32.mrf.mxu1  ;;  %4334 = vset.pattern.permute.xlu0 %v1686_v29  ;;  %4335 = vset.pattern.permute.xlu1 %v1686_v29  ;;  %v4144_v29 = vld [vmem:[%s6276_s0 + $0xa8] sm:$0xff] }
 0x139   :  { %v495_v55 = vadd.f32 %v494_v51, %v4575_v49  ;;  %v659_v57 = vadd.f32 %v658_v52, %v4597_v12 }
 0x13a   :  { %v1191_v58 = vmax.f32 %v831_v47, 0.0  ;;  %v1192_v59 = vmax.f32 %v1000_v50, 0.0  ;;  %v3581_v47 = vld [vmem:[%s6279_s9 + $0x40] sm:$0xf]  ;;  %v4196_v50 = vld [vmem:[%s6279_s9 + $0x44] sm:$0xf0] }
 0x13b   :  { %v1193_v60 = vmax.f32 %v495_v55, 0.0  ;;  %v1186_v61 = vmax.f32 %v659_v57, 0.0  ;;  %v3582_v51 = vor.u32 %v4196_v50, %v3581_v47  ;;  %v4143_v57 = vld [vmem:[%s6276_s0 + $0xa0] sm:$0xff] }
 0x13c   :  { %v1458_v63 = vadd.f32 %v1457_v42, %v1191_v58  ;;  %v1495_v0 = vadd.f32 %v1494_v43, %v1192_v59  ;;  %v3517_v43 = vld [vmem:[%s6278_s7 + $0x40] sm:$0xf]  ;;  %v1691_v58 = vperm.slane %v4800_v62, 1 }
 0x13d   :  { %v1385_v2 = vadd.f32 %v1384_v44, %v1193_v60  ;;  %v1420_v3 = vadd.f32 %v1419_v37, %v1186_v61  ;;  %v4180_v44 = vld [vmem:[%s6278_s7 + $0x44] sm:$0xf0]  ;;  %2397 = vmatpush.bf16.msrb.mxu3 %v3582_v51 }
 0x13e   :  { %v3518_v46 = vor.u32 %v4180_v44, %v3517_v43 }
 0x13f   :  { %v832_v4 = vpop.f32.mrf.mxu2  ;;  %v1001_v5 = vpop.f32.mrf.mxu3 }
 0x140   :  { %v833_v7 = vadd.f32 %v832_v4, %v4582_v53  ;;  %v1002_v8 = vadd.f32 %v1001_v5, %v4584_v54  ;;  %v497_v9 = vpop.f32.mrf.mxu0  ;;  %v661_v11 = vpop.f32.mrf.mxu1  ;;  %1945 = vmatpush.bf16.msra.mxu1 %v3518_v46  ;;  %1696 = vperm.xlu0 %4334, %v1691_v58  }
 0x141   :  { %v498_v13 = vadd.f32 %v497_v9, %v4575_v49  ;;  %v662_v14 = vadd.f32 %v661_v11, %v4597_v12 }
 0x142   :  { %v1195_v15 = vmax.f32 %v833_v7, 0.0  ;;  %v1196_v16 = vmax.f32 %v1002_v8, 0.0  ;;  %3342 = vmatmul.msk.bf16.gmra.mxu0 %vm336_vm0, %v4806_v6  ;;  %3373 = vmatmul.msk.bf16.gmra.mxu1 %vm336_vm0, %v4141_v30 }
 0x143   :  { %v1197_v17 = vmax.f32 %v498_v13, 0.0  ;;  %v1190_v18 = vmax.f32 %v662_v14, 0.0 }
 0x144   :  { %v1459_v10 = vadd.f32 %v1458_v63, %v1195_v15  ;;  %v1496_v19 = vadd.f32 %v1495_v0, %v1196_v16  ;;  %3406 = vmatmul.msk.bf16.gmra.mxu2 %vm336_vm0, %v4806_v6  ;;  %3438 = vmatmul.msk.bf16.gmra.mxu3 %vm336_vm0, %v4806_v6 }
 0x145   :  { %v1386_v21 = vadd.f32 %v1385_v2, %v1197_v17  ;;  %v1421_v22 = vadd.f32 %v1420_v3, %v1190_v18  ;;  %v1684_v2 = vperm.slane %v4800_v62, 0 }
 0x147   :  { %v835_v27 = vpop.f32.mrf.mxu2  ;;  %v1004_v28 = vpop.f32.mrf.mxu3  ;;  %1689 = vperm.xlu1 %4335, %v1684_v2  }
 0x148   :  { %v836_v30 = vadd.f32 %v835_v27, %v4582_v53  ;;  %v1005_v31 = vadd.f32 %v1004_v28, %v4584_v54  ;;  %v499_v32 = vpop.f32.mrf.mxu0  ;;  %v663_v33 = vpop.f32.mrf.mxu1 }
 0x149   :  { %v500_v34 = vadd.f32 %v499_v32, %v4575_v49  ;;  %v664_v35 = vadd.f32 %v663_v33, %v4597_v12 }
 0x14a   :  { %v1199_v36 = vmax.f32 %v836_v30, 0.0  ;;  %v1200_v38 = vmax.f32 %v1005_v31, 0.0 }
 0x14b   :  { %v1201_v39 = vmax.f32 %v500_v34, 0.0  ;;  %v1194_v40 = vmax.f32 %v664_v35, 0.0 }
 0x14c   :  { %v1460_v41 = vadd.f32 %v1459_v10, %v1199_v36  ;;  %v1497_v42 = vadd.f32 %v1496_v19, %v1200_v38 }
 0x14d   :  { %v1387_v37 = vadd.f32 %v1386_v21, %v1201_v39  ;;  %v1422_v45 = vadd.f32 %v1421_v22, %v1194_v40 }
 0x14f   :  { %v837_v52 = vpop.f32.mrf.mxu2  ;;  %v1006_v55 = vpop.f32.mrf.mxu3 }
 0x150   :  { %v838_v59 = vadd.f32 %v837_v52, %v4582_v53  ;;  %v1007_v60 = vadd.f32 %v1006_v55, %v4584_v54  ;;  %v502_v61 = vpop.f32.mrf.mxu0  ;;  %v666_v63 = vpop.f32.mrf.mxu1 }
 0x151   :  { %v503_v0 = vadd.f32 %v502_v61, %v4575_v49  ;;  %v667_v1 = vadd.f32 %v666_v63, %v4597_v12 }
 0x152   :  { %v1203_v3 = vmax.f32 %v838_v59, 0.0  ;;  %v1204_v4 = vmax.f32 %v1007_v60, 0.0  ;;  %3343 = vmatmul.msk.bf16.gmra.mxu0 %vm336_vm0, %v4143_v57  ;;  %3374 = vmatmul.msk.bf16.gmra.mxu1 %vm336_vm0, %v4806_v6 }
 0x153   :  { %v1205_v5 = vmax.f32 %v503_v0, 0.0  ;;  %v1198_v7 = vmax.f32 %v667_v1, 0.0 }
 0x154   :  { %v1461_v8 = vadd.f32 %v1460_v41, %v1203_v3  ;;  %v1498_v9 = vadd.f32 %v1497_v42, %v1204_v4  ;;  %3407 = vmatmul.msk.bf16.gmra.mxu2 %vm336_vm0, %v4143_v57  ;;  %3439 = vmatmul.msk.bf16.gmra.mxu3 %vm336_vm0, %v4143_v57  ;;  %v4145_v4 = vld [vmem:[%s6276_s0 + $0xb0] sm:$0xff] }
 0x155   :  { %v1388_v11 = vadd.f32 %v1387_v37, %v1205_v5  ;;  %v1423_v13 = vadd.f32 %v1422_v45, %v1198_v7 }
 0x157   :  { %v840_v14 = vpop.f32.mrf.mxu2  ;;  %v1009_v62 = vpop.f32.mrf.mxu3 }
 0x158   :  { %v841_v15 = vadd.f32 %v840_v14, %v4582_v53  ;;  %v1010_v16 = vadd.f32 %v1009_v62, %v4584_v54  ;;  %v504_v17 = vpop.f32.mrf.mxu0  ;;  %v668_v18 = vpop.f32.mrf.mxu1 }
 0x159   :  { %v505_v10 = vadd.f32 %v504_v17, %v4575_v49  ;;  %v669_v6 = vadd.f32 %v668_v18, %v4597_v12 }
 0x15a   :  { %v1207_v19 = vmax.f32 %v841_v15, 0.0  ;;  %v1208_v20 = vmax.f32 %v1010_v16, 0.0 }
 0x15b   :  { %v1209_v21 = vmax.f32 %v505_v10, 0.0  ;;  %v1202_v22 = vmax.f32 %v669_v6, 0.0 }
 0x15c   :  { %v1462_v23 = vadd.f32 %v1461_v8, %v1207_v19  ;;  %v1499_v24 = vadd.f32 %v1498_v9, %v1208_v20 }
 0x15d   :  { %v1389_v25 = vadd.f32 %v1388_v11, %v1209_v21  ;;  %v1424_v26 = vadd.f32 %v1423_v13, %v1202_v22 }
 0x15f   :  { %v842_v27 = vpop.f32.mrf.mxu2  ;;  %v1011_v28 = vpop.f32.mrf.mxu3 }
 0x160   :  { %v843_v30 = vadd.f32 %v842_v27, %v4582_v53  ;;  %v1012_v31 = vadd.f32 %v1011_v28, %v4584_v54  ;;  %v507_v32 = vpop.f32.mrf.mxu0  ;;  %v671_v33 = vpop.f32.mrf.mxu1 }
 0x161   :  { %v508_v34 = vadd.f32 %v507_v32, %v4575_v49  ;;  %v672_v35 = vadd.f32 %v671_v33, %v4597_v12 }
 0x162   :  { %v1211_v36 = vmax.f32 %v843_v30, 0.0  ;;  %v1212_v38 = vmax.f32 %v1012_v31, 0.0  ;;  %3344 = vmatmul.msk.bf16.gmra.mxu0 %vm336_vm0, %v4144_v29  ;;  %3375 = vmatmul.msk.bf16.gmra.mxu1 %vm336_vm0, %v4143_v57 }
 0x163   :  { %v1213_v39 = vmax.f32 %v508_v34, 0.0  ;;  %v1206_v40 = vmax.f32 %v672_v35, 0.0 }
 0x164   :  { %v1463_v41 = vadd.f32 %v1462_v23, %v1211_v36  ;;  %v1500_v42 = vadd.f32 %v1499_v24, %v1212_v38  ;;  %3408 = vmatmul.msk.bf16.gmra.mxu2 %vm336_vm0, %v4144_v29  ;;  %3440 = vmatmul.msk.bf16.gmra.mxu3 %vm336_vm0, %v4144_v29  ;;  %v4146_v38 = vld [vmem:[%s6276_s0 + $0xb8] sm:$0xff] }
 0x165   :  { %v1390_v43 = vadd.f32 %v1389_v25, %v1213_v39  ;;  %v1425_v44 = vadd.f32 %v1424_v26, %v1206_v40 }
 0x167   :  { %v845_v37 = vpop.f32.mrf.mxu2  ;;  %v1014_v45 = vpop.f32.mrf.mxu3 }
 0x168   :  { %v846_v46 = vadd.f32 %v845_v37, %v4582_v53  ;;  %v1015_v47 = vadd.f32 %v1014_v45, %v4584_v54  ;;  %v509_v50 = vpop.f32.mrf.mxu0  ;;  %v673_v51 = vpop.f32.mrf.mxu1 }
 0x169   :  { %v510_v52 = vadd.f32 %v509_v50, %v4575_v49  ;;  %v674_v55 = vadd.f32 %v673_v51, %v4597_v12 }
 0x16a   :  { %v1215_v57 = vmax.f32 %v846_v46, 0.0  ;;  %v1216_v58 = vmax.f32 %v1015_v47, 0.0 }
 0x16b   :  { %v1217_v59 = vmax.f32 %v510_v52, 0.0  ;;  %v1210_v60 = vmax.f32 %v674_v55, 0.0 }
 0x16c   :  { %v1464_v61 = vadd.f32 %v1463_v41, %v1215_v57  ;;  %v1501_v63 = vadd.f32 %v1500_v42, %v1216_v58 }
 0x16d   :  { %v1391_v0 = vadd.f32 %v1390_v43, %v1217_v59  ;;  %v1426_v1 = vadd.f32 %v1425_v44, %v1210_v60 }
 0x16f   :  { %v847_v2 = vpop.f32.mrf.mxu2  ;;  %v1016_v3 = vpop.f32.mrf.mxu3 }
 0x170   :  { %v848_v5 = vadd.f32 %v847_v2, %v4582_v53  ;;  %v1017_v7 = vadd.f32 %v1016_v3, %v4584_v54  ;;  %v512_v8 = vpop.f32.mrf.mxu0  ;;  %v676_v9 = vpop.f32.mrf.mxu1 }
 0x171   :  { %v513_v11 = vadd.f32 %v512_v8, %v4575_v49  ;;  %v677_v13 = vadd.f32 %v676_v9, %v4597_v12 }
 0x172   :  { %v1219_v14 = vmax.f32 %v848_v5, 0.0  ;;  %v1220_v62 = vmax.f32 %v1017_v7, 0.0  ;;  %3345 = vmatmul.msk.bf16.gmra.mxu0 %vm336_vm0, %v4145_v4  ;;  %3376 = vmatmul.msk.bf16.gmra.mxu1 %vm336_vm0, %v4144_v29 }
 0x173   :  { %v1221_v15 = vmax.f32 %v513_v11, 0.0  ;;  %v1214_v16 = vmax.f32 %v677_v13, 0.0  ;;  %v4147_v13 = vld [vmem:[%s6276_s0 + $0xc0] sm:$0xff] }
 0x174   :  { %v1465_v17 = vadd.f32 %v1464_v61, %v1219_v14  ;;  %v1502_v18 = vadd.f32 %v1501_v63, %v1220_v62  ;;  %3409 = vmatmul.msk.bf16.gmra.mxu2 %vm336_vm0, %v4145_v4  ;;  %3441 = vmatmul.msk.bf16.gmra.mxu3 %vm336_vm0, %v4145_v4 }
 0x175   :  { %v1392_v10 = vadd.f32 %v1391_v0, %v1221_v15  ;;  %v1427_v6 = vadd.f32 %v1426_v1, %v1214_v16  ;;  %v4164_v15 = vld [vmem:[%s6277_s5 + $0x8] sm:$0xff]  ;;  %v4177_v16 = vld [vmem:[%s6278_s7 + $0x34] sm:$0xf] }
 0x176   :  { %1831 = vmatpush.bf16.msrb.mxu0 %v4164_v15 }
 0x177   :  { %v850_v19 = vpop.f32.mrf.mxu2  ;;  %v1019_v20 = vpop.f32.mrf.mxu3 }
 0x178   :  { %v851_v21 = vadd.f32 %v850_v19, %v4582_v53  ;;  %v1020_v22 = vadd.f32 %v1019_v20, %v4584_v54  ;;  %v514_v23 = vpop.f32.mrf.mxu0  ;;  %v678_v24 = vpop.f32.mrf.mxu1 }
 0x179   :  { %v515_v25 = vadd.f32 %v514_v23, %v4575_v49  ;;  %v679_v26 = vadd.f32 %v678_v24, %v4597_v12  ;;  %v3573_v23 = vld [vmem:[%s6279_s9 + $0x30] sm:$0xf] }
 0x17a   :  { %v1223_v27 = vmax.f32 %v851_v21, 0.0  ;;  %v1224_v28 = vmax.f32 %v1020_v22, 0.0  ;;  %v3509_v21 = vld [vmem:[%s6278_s7 + $0x30] sm:$0xf]  ;;  %v4178_v22 = vld [vmem:[%s6278_s7 + $0x34] sm:$0xf0] }
 0x17b   :  { %v1225_v29 = vmax.f32 %v515_v25, 0.0  ;;  %v1218_v30 = vmax.f32 %v679_v26, 0.0  ;;  %v3510_v25 = vor.u32 %v4178_v22, %v3509_v21  ;;  %v4194_v26 = vld [vmem:[%s6279_s9 + $0x34] sm:$0xf0] }
 0x17c   :  { %v1466_v31 = vadd.f32 %v1465_v17, %v1223_v27  ;;  %v1503_v32 = vadd.f32 %v1502_v18, %v1224_v28  ;;  %v3511_v17 = vld [vmem:[%s6278_s7 + $0x38] sm:$0xf0] }
 0x17d   :  { %v1393_v33 = vadd.f32 %v1392_v10, %v1225_v29  ;;  %v1428_v34 = vadd.f32 %v1427_v6, %v1218_v30  ;;  %v3514_v20 = vor.u32 %v4177_v16, %v3511_v17  ;;  %v3574_v29 = vor.u32 %v4194_v26, %v3573_v23  ;;  %1946 = vmatpush.bf16.msra.mxu1 %v3510_v25 }
 0x17f   :  { %v852_v35 = vpop.f32.mrf.mxu2  ;;  %v1021_v36 = vpop.f32.mrf.mxu3  ;;  %1959 = vmatpush.bf16.msrb.mxu2 %v3514_v20  ;;  %2398 = vmatpush.bf16.msrb.mxu3 %v3574_v29 }
 0x180   :  { %v853_v39 = vadd.f32 %v852_v35, %v4582_v53  ;;  %v1022_v40 = vadd.f32 %v1021_v36, %v4584_v54  ;;  %v517_v41 = vpop.f32.mrf.mxu0  ;;  %v681_v42 = vpop.f32.mrf.mxu1 }
 0x181   :  { %v518_v43 = vadd.f32 %v517_v41, %v4575_v49  ;;  %v682_v44 = vadd.f32 %v681_v42, %v4597_v12 }
 0x182   :  { %v1227_v37 = vmax.f32 %v853_v39, 0.0  ;;  %v1228_v45 = vmax.f32 %v1022_v40, 0.0  ;;  %3346 = vmatmul.msk.bf16.gmra.mxu0 %vm336_vm0, %v4146_v38  ;;  %3377 = vmatmul.msk.bf16.gmra.mxu1 %vm336_vm0, %v4145_v4 }
 0x183   :  { %v1229_v46 = vmax.f32 %v518_v43, 0.0  ;;  %v1222_v47 = vmax.f32 %v682_v44, 0.0 }
 0x184   :  { %v1467_v50 = vadd.f32 %v1466_v31, %v1227_v37  ;;  %v1504_v51 = vadd.f32 %v1503_v32, %v1228_v45  ;;  %3410 = vmatmul.msk.bf16.gmra.mxu2 %vm336_vm0, %v4146_v38  ;;  %3442 = vmatmul.msk.bf16.gmra.mxu3 %vm336_vm0, %v4146_v38 }
 0x185   :  { %v1394_v52 = vadd.f32 %v1393_v33, %v1229_v46  ;;  %v1429_v55 = vadd.f32 %v1428_v34, %v1222_v47 }
 0x187   :  { %v855_v57 = vpop.f32.mrf.mxu2  ;;  %v1024_v58 = vpop.f32.mrf.mxu3 }
 0x188   :  { %v856_v59 = vadd.f32 %v855_v57, %v4582_v53  ;;  %v1025_v60 = vadd.f32 %v1024_v58, %v4584_v54  ;;  %v519_v61 = vpop.f32.mrf.mxu0  ;;  %v683_v63 = vpop.f32.mrf.mxu1 }
 0x189   :  { %v520_v0 = vadd.f32 %v519_v61, %v4575_v49  ;;  %v684_v1 = vadd.f32 %v683_v63, %v4597_v12 }
 0x18a   :  { %v1231_v2 = vmax.f32 %v856_v59, 0.0  ;;  %v1232_v3 = vmax.f32 %v1025_v60, 0.0 }
 0x18b   :  { %v1233_v4 = vmax.f32 %v520_v0, 0.0  ;;  %v1226_v5 = vmax.f32 %v684_v1, 0.0 }
 0x18c   :  { %v1468_v7 = vadd.f32 %v1467_v50, %v1231_v2  ;;  %v1505_v8 = vadd.f32 %v1504_v51, %v1232_v3 }
 0x18d   :  { %v4907_v9 = vadd.f32 %v1394_v52, %v1233_v4  ;;  %v1430_v11 = vadd.f32 %v1429_v55, %v1226_v5  ;;  %v4148_v52 = vld [vmem:[%s6276_s0 + $0xc8] sm:$0xff] }
 0x18f   :  { %v857_v14 = vpop.f32.mrf.mxu2  ;;  %v1026_v62 = vpop.f32.mrf.mxu3 }
 0x190   :  { %v858_v18 = vadd.f32 %v857_v14, %v4582_v53  ;;  %v1027_v10 = vadd.f32 %v1026_v62, %v4584_v54  ;;  %v522_v6 = vpop.f32.mrf.mxu0  ;;  %v686_v19 = vpop.f32.mrf.mxu1 }
 0x191   :  { %v687_v24 = vadd.f32 %v686_v19, %v4597_v12  ;;  %v523_v33 = vadd.f32 %v522_v6, %v4575_v49 }
 0x192   :  { %v1235_v27 = vmax.f32 %v858_v18, 0.0  ;;  %v1236_v28 = vmax.f32 %v1027_v10, 0.0  ;;  %3347 = vmatmul.msk.bf16.gmra.mxu0 %vm336_vm0, %v4147_v13  ;;  %3378 = vmatmul.msk.bf16.gmra.mxu1 %vm336_vm0, %v4146_v38 }
 0x193   :  { %v1230_v30 = vmax.f32 %v687_v24, 0.0  ;;  %v1237_v41 = vmax.f32 %v523_v33, 0.0 }
 0x194   :  { %v4938_v31 = vadd.f32 %v1468_v7, %v1235_v27  ;;  %v4940_v32 = vadd.f32 %v1505_v8, %v1236_v28  ;;  %3411 = vmatmul.msk.bf16.gmra.mxu2 %vm336_vm0, %v4147_v13  ;;  %3443 = vmatmul.msk.bf16.gmra.mxu3 %vm336_vm0, %v4147_v13  ;;  %v4149_v27 = vld [vmem:[%s6276_s0 + $0xd0] sm:$0xff] }
 0x195   :  { %v1431_v34 = vadd.f32 %v1430_v11, %v1230_v30 }
 0x197   :  { %v860_v35 = vpop.f32.mrf.mxu2  ;;  %v1029_v36 = vpop.f32.mrf.mxu3 }
 0x198   :  { %v524_v39 = vpop.f32.mrf.mxu0  ;;  %v688_v40 = vpop.f32.mrf.mxu1  ;;  %v861_v37 = vadd.f32 %v860_v35, %v4582_v53  ;;  %v1030_v45 = vadd.f32 %v1029_v36, %v4584_v54 }
 0x199   :  { %v525_v38 = vadd.f32 %v524_v39, %v4575_v49  ;;  %v689_v42 = vadd.f32 %v688_v40, %v4597_v12 }
 0x19a   :  { %v1239_v55 = vmax.f32 %v861_v37, 0.0  ;;  %v1240_v57 = vmax.f32 %v1030_v45, 0.0 }
 0x19b   :  { %v1241_v43 = vmax.f32 %v525_v38, 0.0  ;;  %v1234_v44 = vmax.f32 %v689_v42, 0.0 }
 0x19d   :  { %v1513_v46 = vadd.f32 %v1241_v43, %v1237_v41  ;;  %v4949_v47 = vadd.f32 %v1431_v34, %v1234_v44 }
 0x19f   :  { %v862_v50 = vpop.f32.mrf.mxu2  ;;  %v1031_v51 = vpop.f32.mrf.mxu3 }
 0x1a0   :  { %v863_v58 = vadd.f32 %v862_v50, %v4582_v53  ;;  %v1032_v59 = vadd.f32 %v1031_v51, %v4584_v54  ;;  %v527_v60 = vpop.f32.mrf.mxu0  ;;  %v691_v61 = vpop.f32.mrf.mxu1 }
 0x1a1   :  { %v528_v63 = vadd.f32 %v527_v60, %v4575_v49  ;;  %v692_v7 = vadd.f32 %v691_v61, %v4597_v12 }
 0x1a2   :  { %v1243_v0 = vmax.f32 %v863_v58, 0.0  ;;  %v1244_v1 = vmax.f32 %v1032_v59, 0.0  ;;  %3348 = vmatmul.msk.bf16.gmra.mxu0 %vm336_vm0, %v4148_v52  ;;  %3379 = vmatmul.msk.bf16.gmra.mxu1 %vm336_vm0, %v4147_v13 }
 0x1a3   :  { %v1245_v2 = vmax.f32 %v528_v63, 0.0  ;;  %v1238_v6 = vmax.f32 %v692_v7, 0.0  ;;  %v4987_v7 = vld [vmem:[%s6276_s0 + $0xd8] sm:$0xff] }
 0x1a4   :  { %v1587_v3 = vadd.f32 %v1243_v0, %v1239_v55  ;;  %v1624_v4 = vadd.f32 %v1244_v1, %v1240_v57  ;;  %3412 = vmatmul.msk.bf16.gmra.mxu2 %vm336_vm0, %v4148_v52  ;;  %3444 = vmatmul.msk.bf16.gmra.mxu3 %vm336_vm0, %v4148_v52 }
 0x1a5   :  { %v1514_v5 = vadd.f32 %v1513_v46, %v1245_v2 }
 0x1a7   :  { %v865_v8 = vpop.f32.mrf.mxu2  ;;  %v1034_v11 = vpop.f32.mrf.mxu3 }
 0x1a8   :  { %v866_v14 = vadd.f32 %v865_v8, %v4582_v53  ;;  %v1035_v62 = vadd.f32 %v1034_v11, %v4584_v54  ;;  %v529_v15 = vpop.f32.mrf.mxu0  ;;  %v693_v16 = vpop.f32.mrf.mxu1 }
 0x1a9   :  { %v530_v17 = vadd.f32 %v529_v15, %v4575_v49  ;;  %v694_v13 = vadd.f32 %v693_v16, %v4597_v12 }
 0x1aa   :  { %v1247_v18 = vmax.f32 %v866_v14, 0.0  ;;  %v1248_v10 = vmax.f32 %v1035_v62, 0.0 }
 0x1ab   :  { %v1249_v19 = vmax.f32 %v530_v17, 0.0  ;;  %v1242_v20 = vmax.f32 %v694_v13, 0.0 }
 0x1ac   :  { %v1588_v21 = vadd.f32 %v1587_v3, %v1247_v18  ;;  %v1625_v22 = vadd.f32 %v1624_v4, %v1248_v10  ;;  %v4163_v3 = vld [vmem:[%s6277_s5] sm:$0xff]  ;;  %v1682_v18 = vpop.xlane.xlu0 %1681 }
 0x1ad   :  { %v1515_v23 = vadd.f32 %v1514_v5, %v1249_v19  ;;  %v1550_v24 = vadd.f32 %v1242_v20, %v1238_v6  ;;  %1832 = vmatpush.bf16.msrb.mxu0 %v4163_v3 }
 0x1af   :  { %v867_v25 = vpop.f32.mrf.mxu2  ;;  %v1036_v26 = vpop.f32.mrf.mxu3 }
 0x1b0   :  { %v868_v28 = vadd.f32 %v867_v25, %v4582_v53  ;;  %v1037_v29 = vadd.f32 %v1036_v26, %v4584_v54  ;;  %v532_v30 = vpop.f32.mrf.mxu0  ;;  %v696_v33 = vpop.f32.mrf.mxu1  ;;  %v3503_v25 = vld [vmem:[%s6278_s7 + $0x28] sm:$0xf0] }
 0x1b1   :  { %v533_v34 = vadd.f32 %v532_v30, %v4575_v49  ;;  %v697_v35 = vadd.f32 %v696_v33, %v4597_v12 }
 0x1b2   :  { %v1251_v36 = vmax.f32 %v868_v28, 0.0  ;;  %v1252_v39 = vmax.f32 %v1037_v29, 0.0  ;;  %3349 = vmatmul.msk.bf16.gmra.mxu0 %vm336_vm0, %v4149_v27  ;;  %3380 = vmatmul.msk.bf16.gmra.mxu1 %vm336_vm0, %v4148_v52 }
 0x1b3   :  { %v1253_v40 = vmax.f32 %v533_v34, 0.0  ;;  %v1246_v41 = vmax.f32 %v697_v35, 0.0 }
 0x1b4   :  { %v1589_v38 = vadd.f32 %v1588_v21, %v1251_v36  ;;  %v1626_v42 = vadd.f32 %v1625_v22, %v1252_v39  ;;  %3413 = vmatmul.msk.bf16.gmra.mxu2 %vm336_vm0, %v4149_v27  ;;  %3445 = vmatmul.msk.bf16.gmra.mxu3 %vm336_vm0, %v4149_v27 }
 0x1b5   :  { %v1516_v43 = vadd.f32 %v1515_v23, %v1253_v40  ;;  %v1551_v44 = vadd.f32 %v1550_v24, %v1246_v41  ;;  %v5000_v23 = vmax.f32 %v1682_v18, 1.0  ;;  %v4175_v24 = vld [vmem:[%s6278_s7 + $0x24] sm:$0xf] }
 0x1b6   :  { %v3506_v26 = vor.u32 %v4175_v24, %v3503_v25 }
 0x1b7   :  { %v870_v37 = vpop.f32.mrf.mxu2  ;;  %v1039_v45 = vpop.f32.mrf.mxu3  ;;  %v5013_v39 = vrot.slane %v5000_v23, 1  ;;  %vm1721_vm5 = vweird.f32 %v5000_v23 }
 0x1b8   :  { %v871_v46 = vadd.f32 %v870_v37, %v4582_v53  ;;  %v1040_v50 = vadd.f32 %v1039_v45, %v4584_v54  ;;  %v534_v51 = vpop.f32.mrf.mxu0  ;;  %v698_v55 = vpop.f32.mrf.mxu1  ;;  %1960 = vmatpush.bf16.msrb.mxu2 %v3506_v26  ;;  %v3501_v37 = vld [vmem:[%s6278_s7 + $0x20] sm:$0xf]  ;;  %v4176_v45 = vld [vmem:[%s6278_s7 + $0x24] sm:$0xf0] }
 0x1b9   :  { %v535_v57 = vadd.f32 %v534_v51, %v4575_v49  ;;  %v699_v52 = vadd.f32 %v698_v55, %v4597_v12  ;;  %4338 = vrcp.f32 %v5013_v39  ;;  %v3565_v51 = vld [vmem:[%s6279_s9 + $0x20] sm:$0xf]  ;;  %v4192_v55 = vld [vmem:[%s6279_s9 + $0x24] sm:$0xf0]  ;;  %vm1736_vm2 = vweird.f32 %v5013_v39 }
 0x1ba   :  { %v1255_v58 = vmax.f32 %v871_v46, 0.0  ;;  %v1256_v59 = vmax.f32 %v1040_v50, 0.0  ;;  %4340 = vrcp.f32 %v5000_v23 }
 0x1bb   :  { %v1257_v60 = vmax.f32 %v535_v57, 0.0  ;;  %v1250_v61 = vmax.f32 %v699_v52, 0.0  ;;  %v1697_v57 = vpop.permute.xlu0 %1696  ;;  %v1677_v52 = vld [vmem:[%s6282_s1 + $0x8] sm:$0xff] }
 0x1bc   :  { %v1590_v63 = vadd.f32 %v1589_v38, %v1255_v58  ;;  %v1627_v0 = vadd.f32 %v1626_v42, %v1256_v59 }
 0x1bd   :  { %v1517_v1 = vadd.f32 %v1516_v43, %v1257_v60  ;;  %v1552_v2 = vadd.f32 %v1551_v44, %v1250_v61  ;;  %v5034_v60 = vld [vmem:[%s6276_s0 + $0xe0] sm:$0xff]  ;;  %v3502_v61 = vor.u32 %v4176_v45, %v3501_v37 }
 0x1bf   :  { %v872_v4 = vpop.f32.mrf.mxu2  ;;  %v1041_v5 = vpop.f32.mrf.mxu3  ;;  %1947 = vmatpush.bf16.msra.mxu1 %v3502_v61 }
 0x1c0   :  { %v873_v8 = vadd.f32 %v872_v4, %v4582_v53  ;;  %v1042_v11 = vadd.f32 %v1041_v5, %v4584_v54  ;;  %v537_v14 = vpop.f32.mrf.mxu0  ;;  %v701_v62 = vpop.f32.mrf.mxu1 }
 0x1c1   :  { %v538_v15 = vadd.f32 %v537_v14, %v4575_v49  ;;  %v702_v16 = vadd.f32 %v701_v62, %v4597_v12  ;;  %v1690_v62 = vpop.permute.xlu1 %1689 }
 0x1c2   :  { %v1259_v17 = vmax.f32 %v873_v8, 0.0  ;;  %v1260_v13 = vmax.f32 %v1042_v11, 0.0  ;;  %3350 = vmatmul.msk.bf16.gmra.mxu0 %vm336_vm0, %v4987_v7  ;;  %3381 = vmatmul.msk.bf16.gmra.mxu1 %vm336_vm0, %v4149_v27  ;;  %v1699_v8 = vmul.f32 %v1697_v57, %v1677_v52 }
 0x1c3   :  { %v1261_v10 = vmax.f32 %v538_v15, 0.0  ;;  %v1254_v6 = vmax.f32 %v702_v16, 0.0  ;;  %v1676_v15 = vld [vmem:[%s6282_s1] sm:$0xff]  ;;  %v5044_v16 = vpop.eup %4338 }
 0x1c4   :  { %v1591_v19 = vadd.f32 %v1590_v63, %v1259_v17  ;;  %v1628_v20 = vadd.f32 %v1627_v0, %v1260_v13  ;;  %3414 = vmatmul.msk.bf16.gmra.mxu2 %vm336_vm0, %v4987_v7  ;;  %3446 = vmatmul.msk.bf16.gmra.mxu3 %vm336_vm0, %v4987_v7  ;;  %v3566_v63 = vor.u32 %v4192_v55, %v3565_v51  ;;  %v5056_v26 = vpop.eup %4340  ;;  %vm1737_vm3 = vweird.f32 %v5044_v16 }
 0x1c5   :  { %v1518_v21 = vadd.f32 %v1517_v1, %v1261_v10  ;;  %v1553_v22 = vadd.f32 %v1552_v2, %v1254_v6  ;;  %vm5079_vm4 = vmor %vm1736_vm2, %vm1737_vm3  ;;  %vm1722_vm6 = vweird.f32 %v5056_v26 }
 0x1c6   :  { %2399 = vmatpush.bf16.msrb.mxu3 %v3566_v63  ;;  %v1742_v63 = vand.u32 2147483648, %v5013_v39  ;;  %vm5104_vm8 = vmor %vm1721_vm5, %vm1722_vm6 }
 0x1c7   :  { %v875_v27 = vpop.f32.mrf.mxu2  ;;  %v1044_v28 = vpop.f32.mrf.mxu3 }
 0x1c8   :  { %v876_v29 = vadd.f32 %v875_v27, %v4582_v53  ;;  %v1045_v30 = vadd.f32 %v1044_v28, %v4584_v54  ;;  %v539_v33 = vpop.f32.mrf.mxu0  ;;  %v703_v34 = vpop.f32.mrf.mxu1 }
 0x1c9   :  { %v540_v35 = vadd.f32 %v539_v33, %v4575_v49  ;;  %v704_v36 = vadd.f32 %v703_v34, %v4597_v12 }
 0x1ca   :  { %v1263_v40 = vmax.f32 %v876_v29, 0.0  ;;  %v1264_v41 = vmax.f32 %v1045_v30, 0.0 }
 0x1cb   :  { %v1265_v38 = vmax.f32 %v540_v35, 0.0  ;;  %v1258_v42 = vmax.f32 %v704_v36, 0.0 }
 0x1cc   :  { %v1592_v43 = vadd.f32 %v1591_v19, %v1263_v40  ;;  %v1629_v44 = vadd.f32 %v1628_v20, %v1264_v41  ;;  %v1706_v20 = vrot.slane %v1699_v8, 4 }
 0x1cd   :  { %v1519_v46 = vadd.f32 %v1518_v21, %v1265_v38  ;;  %v1554_v50 = vadd.f32 %v1553_v22, %v1258_v42  ;;  %v1698_v21 = vmul.f32 %v1690_v62, %v1676_v15  ;;  %v1732_v22 = vmul.f32 %v5044_v16, %v5013_v39 }
 0x1ce   :  { %v1707_v33 = vadd.f32 %v1706_v20, %v1699_v8  ;;  %v1717_v42 = vmul.f32 %v5056_v26, %v5000_v23 }
 0x1cf   :  { %v877_v58 = vpop.f32.mrf.mxu2  ;;  %v1046_v59 = vpop.f32.mrf.mxu3  ;;  %v1700_v34 = vrot.slane %v1698_v21, 4  ;;  %v1733_v40 = vsub.f32 1.0, %v1732_v22 }
 0x1d0   :  { %v878_v0 = vadd.f32 %v877_v58, %v4582_v53  ;;  %v1047_v1 = vadd.f32 %v1046_v59, %v4584_v54  ;;  %v542_v2 = vpop.f32.mrf.mxu0  ;;  %v706_v3 = vpop.f32.mrf.mxu1  ;;  %v1708_v45 = vrot.slane %v1707_v33, 2  ;;  %v1718_v55 = vsub.f32 1.0, %v1717_v42  ;;  %v5068_v58 = vld [vmem:[%s6276_s0 + $0xe8] sm:$0xff] }
 0x1d1   :  { %v543_v4 = vadd.f32 %v542_v2, %v4575_v49  ;;  %v707_v5 = vadd.f32 %v706_v3, %v4597_v12 }
 0x1d2   :  { %v1267_v11 = vmax.f32 %v878_v0, 0.0  ;;  %v1268_v14 = vmax.f32 %v1047_v1, 0.0  ;;  %3351 = vmatmul.msk.bf16.gmra.mxu0 %vm336_vm0, %v5034_v60  ;;  %3382 = vmatmul.msk.bf16.gmra.mxu1 %vm336_vm0, %v4987_v7  ;;  %v1709_v2 = vadd.f32 %v1708_v45, %v1707_v33 }
 0x1d3   :  { %v1269_v17 = vmax.f32 %v543_v4, 0.0  ;;  %v1262_v13 = vmax.f32 %v707_v5, 0.0 }
 0x1d4   :  { %v1593_v18 = vadd.f32 %v1592_v43, %v1267_v11  ;;  %v1630_v10 = vadd.f32 %v1629_v44, %v1268_v14  ;;  %3415 = vmatmul.msk.bf16.gmra.mxu2 %vm336_vm0, %v5034_v60  ;;  %3447 = vmatmul.msk.bf16.gmra.mxu3 %vm336_vm0, %v5034_v60  ;;  %v1740_v11 = vand.u32 2147483647, %v5013_v39  ;;  %v1727_v39 = vand.u32 2147483648, %v5000_v23 }
 0x1d5   :  { %v1520_v6 = vadd.f32 %v1519_v46, %v1269_v17  ;;  %v1555_v19 = vadd.f32 %v1554_v50, %v1262_v13  ;;  %v1701_v46 = vadd.f32 %v1700_v34, %v1698_v21  ;;  %v1734_v50 = vmul.f32 %v5044_v16, %v1733_v40 }
 0x1d6   :  { %v1719_v13 = vmul.f32 %v5056_v26, %v1718_v55  ;;  %vm1741_vm7 = vcmp.eq.f32.partialorder %v1740_v11, 8.507059e+37  ;;  %v1728_v40 = vor.u32 1.1754944e-38, %v1727_v39 }
 0x1d7   :  { %v880_v24 = vpop.f32.mrf.mxu2  ;;  %v1049_v25 = vpop.f32.mrf.mxu3  ;;  %v1702_v3 = vrot.slane %v1701_v46, 2  ;;  %v1735_v8 = vadd.f32 %v5044_v16, %v1734_v50 }
 0x1d8   :  { %v881_v7 = vadd.f32 %v880_v24, %v4582_v53  ;;  %v1050_v27 = vadd.f32 %v1049_v25, %v4584_v54  ;;  %v544_v28 = vpop.f32.mrf.mxu0  ;;  %v708_v29 = vpop.f32.mrf.mxu1  ;;  %v1720_v24 = vadd.f32 %v5056_v26, %v1719_v13  ;;  %v1725_v25 = vand.u32 2147483647, %v5000_v23 }
 0x1d9   :  { %v709_v30 = vadd.f32 %v708_v29, %v4597_v12  ;;  %v545_v41 = vadd.f32 %v544_v28, %v4575_v49  ;;  %v1703_v20 = vadd.f32 %v1702_v3, %v1701_v46  ;;  %v1739_v22 = vsel %vm5079_vm4, %v5044_v16, %v1735_v8 }
 0x1da   :  { %v1271_v35 = vmax.f32 %v881_v7, 0.0  ;;  %v1272_v36 = vmax.f32 %v1050_v27, 0.0  ;;  %v1724_v23 = vsel %vm5104_vm8, %v5056_v26, %v1720_v24  ;;  %vm1726_vm9 = vcmp.eq.f32.partialorder %v1725_v25, 8.507059e+37 }
 0x1db   :  { %v1266_v38 = vmax.f32 %v709_v30, 0.0  ;;  %v1273_v51 = vmax.f32 %v545_v41, 0.0 }
 0x1dc   :  { %v1594_v43 = vadd.f32 %v1593_v18, %v1271_v35  ;;  %v1631_v44 = vadd.f32 %v1630_v10, %v1272_v36  ;;  %v1743_v18 = vor.u32 1.1754944e-38, %v1742_v63  ;;  %v1704_v36 = vrot.slane %v1703_v20, 1  ;;  %v4153_v63 = vld [vmem:[%s6276_s0 + $0xf0] sm:$0xff] }
 0x1dd   :  { %v1556_v37 = vadd.f32 %v1555_v19, %v1266_v38  ;;  %v1521_v14 = vadd.f32 %v1520_v6, %v1273_v51  ;;  %v1710_v19 = vrot.slane %v1709_v2, 1 }
 0x1de   :  { %v1744_v34 = vsel %vm1741_vm7, %v1743_v18, %v1739_v22 }
 0x1df   :  { %v882_v57 = vpop.f32.mrf.mxu2  ;;  %v1051_v52 = vpop.f32.mrf.mxu3  ;;  %v1711_v35 = vadd.f32 %v1710_v19, %v1709_v2 }
 0x1e0   :  { %v547_v59 = vpop.f32.mrf.mxu0  ;;  %v711_v61 = vpop.f32.mrf.mxu1  ;;  %v883_v4 = vadd.f32 %v882_v57, %v4582_v53  ;;  %v1052_v5 = vadd.f32 %v1051_v52, %v4584_v54  ;;  %v1705_v57 = vadd.f32 %v1704_v36, %v1703_v20  ;;  %v1729_v52 = vsel %vm1726_vm9, %v1728_v40, %v1724_v23 }
 0x1e1   :  { %v548_v0 = vadd.f32 %v547_v59, %v4575_v49  ;;  %v712_v1 = vadd.f32 %v711_v61, %v4597_v12  ;;  %v1745_v55 = vmul.f32 %v1744_v34, %v1711_v35 }
 0x1e2   :  { %3352 = vmatmul.msk.bf16.gmra.mxu0 %vm336_vm0, %v5068_v58  ;;  %3383 = vmatmul.msk.bf16.gmra.mxu1 %vm336_vm0, %v5034_v60  ;;  %v1275_v60 = vmax.f32 %v883_v4, 0.0  ;;  %v1276_v21 = vmax.f32 %v1052_v5, 0.0  ;;  %v1730_v2 = vmul.f32 %v1729_v52, %v1705_v57 }
 0x1e3   :  { %v1277_v62 = vmax.f32 %v548_v0, 0.0  ;;  %v1270_v15 = vmax.f32 %v712_v1, 0.0  ;;  %v1747_v1 = vpack.c.bf16 %v1745_v55, %v1745_v55 }
 0x1e4   :  { %3416 = vmatmul.msk.bf16.gmra.mxu2 %vm336_vm0, %v5068_v58  ;;  %3448 = vmatmul.msk.bf16.gmra.mxu3 %vm336_vm0, %v5068_v58  ;;  %v1595_v41 = vadd.f32 %v1594_v43, %v1275_v60  ;;  %v1632_v38 = vadd.f32 %v1631_v44, %v1276_v21  ;;  %v1746_v13 = vpack.c.bf16 %v1730_v2, %v1730_v2 }
 0x1e5   :  { %v1522_v10 = vadd.f32 %v1521_v14, %v1277_v62  ;;  %v1557_v6 = vadd.f32 %v1556_v37, %v1270_v15  ;;  %v1771_v17 = vunpack.c.l.b16 %v1747_v1 }
 0x1e7   :  { %v885_v7 = vpop.f32.mrf.mxu2  ;;  %v1054_v27 = vpop.f32.mrf.mxu3  ;;  %v1772_v25 = vrot.slane %v1771_v17, 7 }
 0x1e8   :  { %v886_v29 = vadd.f32 %v885_v7, %v4582_v53  ;;  %v1055_v30 = vadd.f32 %v1054_v27, %v4584_v54  ;;  %v549_v16 = vpop.f32.mrf.mxu0  ;;  %v713_v33 = vpop.f32.mrf.mxu1 }
 0x1e9   :  { %v550_v45 = vadd.f32 %v549_v16, %v4575_v49  ;;  %v714_v46 = vadd.f32 %v713_v33, %v4597_v12 }
 0x1ea   :  { %v1279_v42 = vmax.f32 %v886_v29, 0.0  ;;  %v1280_v37 = vmax.f32 %v1055_v30, 0.0 }
 0x1eb   :  { %v1281_v59 = vmax.f32 %v550_v45, 0.0  ;;  %v1274_v61 = vmax.f32 %v714_v46, 0.0 }
 0x1ec   :  { %v1596_v50 = vadd.f32 %v1595_v41, %v1279_v42  ;;  %v1633_v51 = vadd.f32 %v1632_v38, %v1280_v37 }
 0x1ed   :  { %v1523_v11 = vadd.f32 %v1522_v10, %v1281_v59  ;;  %v1558_v14 = vadd.f32 %v1557_v6, %v1274_v61  ;;  %v4346_v61 = vld [vmem:[%s6276_s0 + $0xf8] sm:$0xff] }
 0x1ef   :  { %v887_v43 = vpop.f32.mrf.mxu2  ;;  %v1056_v44 = vpop.f32.mrf.mxu3 }
 0x1f0   :  { %v552_v0 = vpop.f32.mrf.mxu0  ;;  %v716_v26 = vpop.f32.mrf.mxu1  ;;  %v888_v5 = vadd.f32 %v887_v43, %v4582_v53  ;;  %v1057_v8 = vadd.f32 %v1056_v44, %v4584_v54 }
 0x1f1   :  { %v553_v3 = vadd.f32 %v552_v0, %v4575_v49  ;;  %v717_v4 = vadd.f32 %v716_v26, %v4597_v12  ;;  %v4173_v0 = vld [vmem:[%s6278_s7 + $0x14] sm:$0xf]  ;;  %v3495_v26 = vld [vmem:[%s6278_s7 + $0x18] sm:$0xf0] }
 0x1f2   :  { %3353 = vmatmul.msk.bf16.gmra.mxu0 %vm336_vm0, %v4153_v63  ;;  %3384 = vmatmul.msk.bf16.gmra.mxu1 %vm336_vm0, %v5068_v58  ;;  %v1283_v19 = vmax.f32 %v888_v5, 0.0  ;;  %v1284_v20 = vmax.f32 %v1057_v8, 0.0  ;;  %v1770_v58 = vunpack.c.l.b16 %v1746_v13  ;;  %v3498_v2 = vor.u32 %v4173_v0, %v3495_v26 }
 0x1f3   :  { %v1285_v62 = vmax.f32 %v553_v3, 0.0  ;;  %v1278_v15 = vmax.f32 %v717_v4, 0.0 }
 0x1f4   :  { %3417 = vmatmul.msk.bf16.gmra.mxu2 %vm336_vm0, %v4153_v63  ;;  %3449 = vmatmul.msk.bf16.gmra.mxu3 %vm336_vm0, %v4153_v63  ;;  %v1597_v7 = vadd.f32 %v1596_v50, %v1283_v19  ;;  %v1634_v27 = vadd.f32 %v1633_v51, %v1284_v20  ;;  %v1774_v35 = vsel %vm1773_vm10, %v1772_v25, %v1770_v58 }
 0x1f5   :  { %v1524_v18 = vadd.f32 %v1523_v11, %v1285_v62  ;;  %v1559_v39 = vadd.f32 %v1558_v14, %v1278_v15  ;;  %v1775_v46 = vpack.c.b16 %v1774_v35, %v1774_v35  ;;  %1961 = vmatpush.bf16.msrb.mxu2 %v3498_v2 }
 0x1f7   :  { %v890_v60 = vpop.f32.mrf.mxu2  ;;  %v1059_v10 = vpop.f32.mrf.mxu3 }
 0x1f8   :  { %v891_v6 = vadd.f32 %v890_v60, %v4582_v53  ;;  %v1060_v21 = vadd.f32 %v1059_v10, %v4584_v54  ;;  %v554_v22 = vpop.f32.mrf.mxu0  ;;  %v718_v24 = vpop.f32.mrf.mxu1  ;;  %v3493_v60 = vld [vmem:[%s6278_s7 + $0x10] sm:$0xf]  ;;  %v4174_v10 = vld [vmem:[%s6278_s7 + $0x14] sm:$0xf0] }
 0x1f9   :  { %v555_v30 = vadd.f32 %v554_v22, %v4575_v49  ;;  %v719_v16 = vadd.f32 %v718_v24, %v4597_v12  ;;  %v4190_v22 = vld [vmem:[%s6279_s9 + $0x14] sm:$0xf0] }
 0x1fa   :  { %v1287_v28 = vmax.f32 %v891_v6, 0.0  ;;  %v1288_v29 = vmax.f32 %v1060_v21, 0.0  ;;  %v3494_v6 = vor.u32 %v4174_v10, %v3493_v60  ;;  %v3557_v21 = vld [vmem:[%s6279_s9 + $0x10] sm:$0xf] }
 0x1fb   :  { %v1289_v36 = vmax.f32 %v555_v30, 0.0  ;;  %v1282_v40 = vmax.f32 %v719_v16, 0.0 }
 0x1fc   :  { %v1598_v33 = vadd.f32 %v1597_v7, %v1287_v28  ;;  %v1635_v34 = vadd.f32 %v1634_v27, %v1288_v29  ;;  %v3558_v27 = vor.u32 %v4190_v22, %v3557_v21  ;;  %1948 = vmatpush.bf16.msra.mxu1 %v3494_v6 }
 0x1fd   :  { %v1525_v55 = vadd.f32 %v1524_v18, %v1289_v36  ;;  %v1560_v57 = vadd.f32 %v1559_v39, %v1282_v40 }
 0x1fe   :  { %2400 = vmatpush.bf16.msrb.mxu3 %v3558_v27 }
 0x1ff   :  { %v892_v41 = vpop.f32.mrf.mxu2  ;;  %v1061_v38 = vpop.f32.mrf.mxu3 }
 0x200   :  { %v557_v42 = vpop.f32.mrf.mxu0  ;;  %v721_v37 = vpop.f32.mrf.mxu1  ;;  %v893_v50 = vadd.f32 %v892_v41, %v4582_v53  ;;  %v1062_v51 = vadd.f32 %v1061_v38, %v4584_v54 }
 0x201   :  { %v558_v23 = vadd.f32 %v557_v42, %v4575_v49  ;;  %v722_v45 = vadd.f32 %v721_v37, %v4597_v12 }
 0x202   :  { %3385 = vmatmul.msk.bf16.gmra.mxu1 %vm336_vm0, %v4153_v63  ;;  %1833 = vmatmul.bf16.vlgmr.msrb.gmra.mxu0 %v1775_v46  ;;  %v1291_v63 = vmax.f32 %v893_v50, 0.0  ;;  %v1292_v1 = vmax.f32 %v1062_v51, 0.0 }
 0x203   :  { %v1293_v52 = vmax.f32 %v558_v23, 0.0  ;;  %v1286_v59 = vmax.f32 %v722_v45, 0.0 }
 0x204   :  { %3418 = vmatmul.msk.bf16.gmra.mxu2 %vm336_vm0, %v4346_v61  ;;  %3450 = vmatmul.msk.bf16.gmra.mxu3 %vm336_vm0, %v4346_v61  ;;  %v1599_v62 = vadd.f32 %v1598_v33, %v1291_v63  ;;  %v1636_v15 = vadd.f32 %v1635_v34, %v1292_v1 }
 0x205   :  { %v1526_v43 = vadd.f32 %v1525_v55, %v1293_v52  ;;  %v1561_v44 = vadd.f32 %v1560_v57, %v1286_v59 }
 0x207   :  { %v895_v3 = vpop.f32.mrf.mxu2  ;;  %v1064_v4 = vpop.f32.mrf.mxu3 }
 0x208   :  { %v896_v5 = vadd.f32 %v895_v3, %v4582_v53  ;;  %v1065_v8 = vadd.f32 %v1064_v4, %v4584_v54  ;;  %v559_v11 = vpop.f32.mrf.mxu0  ;;  %v723_v14 = vpop.f32.mrf.mxu1 }
 0x209   :  { %v560_v18 = vadd.f32 %v559_v11, %v4575_v49  ;;  %v724_v39 = vadd.f32 %v723_v14, %v4597_v12 }
 0x20a   :  { %v1295_v17 = vmax.f32 %v896_v5, 0.0  ;;  %v1296_v13 = vmax.f32 %v1065_v8, 0.0 }
 0x20b   :  { %v1297_v24 = vmax.f32 %v560_v18, 0.0  ;;  %v1290_v25 = vmax.f32 %v724_v39, 0.0 }
 0x20c   :  { %v1600_v19 = vadd.f32 %v1599_v62, %v1295_v17  ;;  %v1637_v20 = vadd.f32 %v1636_v15, %v1296_v13 }
 0x20d   :  { %v1527_v35 = vadd.f32 %v1526_v43, %v1297_v24  ;;  %v1562_v36 = vadd.f32 %v1561_v44, %v1290_v25 }
 0x20f   :  { %v897_v58 = vpop.f32.mrf.mxu2  ;;  %v1066_v7 = vpop.f32.mrf.mxu3 }
 0x210   :  { %v562_v28 = vpop.f32.mrf.mxu0  ;;  %v726_v29 = vpop.f32.mrf.mxu1  ;;  %v898_v30 = vadd.f32 %v897_v58, %v4582_v53  ;;  %v1067_v34 = vadd.f32 %v1066_v7, %v4584_v54 }
 0x211   :  { %v563_v16 = vadd.f32 %v562_v28, %v4575_v49  ;;  %v727_v33 = vadd.f32 %v726_v29, %v4597_v12 }
 0x212   :  { %3386 = vmatmul.msk.bf16.gmra.mxu1 %vm336_vm0, %v4346_v61  ;;  %v1299_v38 = vmax.f32 %v898_v30, 0.0  ;;  %v1300_v23 = vmax.f32 %v1067_v34, 0.0 }
 0x213   :  { %v1301_v40 = vmax.f32 %v563_v16, 0.0  ;;  %v1294_v41 = vmax.f32 %v727_v33, 0.0 }
 0x214   :  { %v1601_v52 = vadd.f32 %v1600_v19, %v1299_v38  ;;  %v1638_v59 = vadd.f32 %v1637_v20, %v1300_v23 }
 0x215   :  { %v1528_v42 = vadd.f32 %v1527_v35, %v1301_v40  ;;  %v1563_v37 = vadd.f32 %v1562_v36, %v1294_v41 }
 0x217   :  { %v900_v45 = vpop.f32.mrf.mxu2  ;;  %v1069_v46 = vpop.f32.mrf.mxu3 }
 0x218   :  { %v901_v50 = vadd.f32 %v900_v45, %v4582_v53  ;;  %v1070_v51 = vadd.f32 %v1069_v46, %v4584_v54  ;;  %v564_v55 = vpop.f32.mrf.mxu0  ;;  %v728_v57 = vpop.f32.mrf.mxu1 }
 0x219   :  { %v565_v0 = vadd.f32 %v564_v55, %v4575_v49  ;;  %v729_v61 = vadd.f32 %v728_v57, %v4597_v12 }
 0x21a   :  { %v1303_v43 = vmax.f32 %v901_v50, 0.0  ;;  %v1304_v44 = vmax.f32 %v1070_v51, 0.0 }
 0x21b   :  { %v1305_v1 = vmax.f32 %v565_v0, 0.0  ;;  %v1298_v2 = vmax.f32 %v729_v61, 0.0 }
 0x21c   :  { %v1602_v26 = vadd.f32 %v1601_v52, %v1303_v43  ;;  %v1639_v63 = vadd.f32 %v1638_v59, %v1304_v44 }
 0x21d   :  { %v1529_v62 = vadd.f32 %v1528_v42, %v1305_v1  ;;  %v1564_v17 = vadd.f32 %v1563_v37, %v1298_v2 }
 0x21f   :  { %v902_v3 = vpop.f32.mrf.mxu2  ;;  %v1071_v4 = vpop.f32.mrf.mxu3 }
 0x220   :  { %v567_v5 = vpop.f32.mrf.mxu0  ;;  %v731_v8 = vpop.f32.mrf.mxu1  ;;  %v903_v15 = vadd.f32 %v902_v3, %v4582_v53  ;;  %v1072_v13 = vadd.f32 %v1071_v4, %v4584_v54 }
 0x221   :  { %v568_v11 = vadd.f32 %v567_v5, %v4575_v49  ;;  %v732_v14 = vadd.f32 %v731_v8, %v4597_v12 }
 0x222   :  { %v1307_v60 = vmax.f32 %v903_v15, 0.0  ;;  %v1308_v10 = vmax.f32 %v1072_v13, 0.0 }
 0x223   :  { %v1309_v18 = vmax.f32 %v568_v11, 0.0  ;;  %v1302_v39 = vmax.f32 %v732_v14, 0.0 }
 0x224   :  { %v1603_v7 = vadd.f32 %v1602_v26, %v1307_v60  ;;  %v1640_v28 = vadd.f32 %v1639_v63, %v1308_v10 }
 0x225   :  { %v5177_v19 = vadd.f32 %v1529_v62, %v1309_v18  ;;  %v1565_v20 = vadd.f32 %v1564_v17, %v1302_v39  ;;  %v4171_v18 = vld [vmem:[%s6278_s7 + $0x4] sm:$0xf]  ;;  %v3487_v39 = vld [vmem:[%s6278_s7 + $0x8] sm:$0xf0] }
 0x226   :  { %v3490_v60 = vor.u32 %v4171_v18, %v3487_v39  ;;  %v3789_v39 = vld [vmem:[%s6279_s9 + $0x1e0] sm:$0xf] }
 0x227   :  { %v905_v6 = vpop.f32.mrf.mxu2  ;;  %v1074_v22 = vpop.f32.mrf.mxu3 }
 0x228   :  { %v906_v21 = vadd.f32 %v905_v6, %v4582_v53  ;;  %v5180_v24 = vpop.f32.mrf.mxu0  ;;  %v1075_v25 = vadd.f32 %v1074_v22, %v4584_v54  ;;  %v733_v58 = vpop.f32.mrf.mxu1  ;;  %1962 = vmatpush.bf16.msrb.mxu2 %v3490_v60  ;;  %v3485_v22 = vld [vmem:[%s6278_s7] sm:$0xf]  ;;  %v4248_v60 = vld [vmem:[%s6279_s9 + $0x1e4] sm:$0xf0] }
 0x229   :  { %v734_v16 = vadd.f32 %v733_v58, %v4597_v12 }
 0x22a   :  { %v1311_v27 = vmax.f32 %v906_v21, 0.0  ;;  %v1312_v29 = vmax.f32 %v1075_v25, 0.0  ;;  %v4172_v25 = vld [vmem:[%s6278_s7 + $0x4] sm:$0xf0] }
 0x22b   :  { %v1306_v35 = vmax.f32 %v734_v16, 0.0  ;;  %v3486_v58 = vor.u32 %v4172_v25, %v3485_v22 }
 0x22c   :  { %v1604_v30 = vadd.f32 %v1603_v7, %v1311_v27  ;;  %v1641_v33 = vadd.f32 %v1640_v28, %v1312_v29  ;;  %v3549_v7 = vld [vmem:[%s6279_s9] sm:$0xf]  ;;  %v4188_v27 = vld [vmem:[%s6279_s9 + $0x4] sm:$0xf0] }
 0x22d   :  { %v1566_v46 = vadd.f32 %v1565_v20, %v1306_v35  ;;  %v3550_v29 = vor.u32 %v4188_v27, %v3549_v7  ;;  %1949 = vmatpush.bf16.msra.mxu1 %v3486_v58  ;;  %v1396_v35 = vrot.slane %v4907_v9, 4  ;;  %v3790_v58 = vor.u32 %v4248_v60, %v3789_v39  ;;  %v3773_v39 = vld [vmem:[%s6279_s9 + $0x1c0] sm:$0xf] }
 0x22f   :  { %v907_v34 = vpop.f32.mrf.mxu2  ;;  %v1076_v40 = vpop.f32.mrf.mxu3  ;;  %2401 = vmatpush.bf16.msrb.mxu3 %v3550_v29 }
 0x230   :  { %v908_v36 = vadd.f32 %v907_v34, %v4582_v53  ;;  %v5185_v41 = vpop.f32.mrf.mxu0  ;;  %v1077_v38 = vadd.f32 %v1076_v40, %v4584_v54  ;;  %v736_v42 = vpop.f32.mrf.mxu1  ;;  %v4347_v34 = vmov 256.0  }
 0x231   :  { %v737_v23 = vadd.f32 %v736_v42, %v4597_v12  ;;  %4342 = vrcp.f32 %v4347_v34 }
 0x232   :  { %v1315_v37 = vmax.f32 %v908_v36, 0.0  ;;  %v1316_v45 = vmax.f32 %v1077_v38, 0.0 }
 0x233   :  { %v1310_v51 = vmax.f32 %v737_v23, 0.0 }
 0x234   :  { %v1605_v50 = vadd.f32 %v1604_v30, %v1315_v37  ;;  %v1642_v55 = vadd.f32 %v1641_v33, %v1316_v45  ;;  %v1470_v37 = vrot.slane %v4938_v31, 4  ;;  %v1397_v45 = vadd.f32 %v1396_v35, %v4907_v9  ;;  %v3717_v35 = vld [vmem:[%s6279_s9 + $0x150] sm:$0xf] }
 0x235   :  { %v1567_v57 = vadd.f32 %v1566_v46, %v1310_v51  ;;  %v3733_v51 = vld [vmem:[%s6279_s9 + $0x170] sm:$0xf] }
 0x237   :  { %v910_v52 = vpop.f32.mrf.mxu2  ;;  %v1079_v43 = vpop.f32.mrf.mxu3 }
 0x238   :  { %v911_v59 = vadd.f32 %v910_v52, %v4582_v53  ;;  %v5190_v44 = vpop.f32.mrf.mxu0  ;;  %v1080_v0 = vadd.f32 %v1079_v43, %v4584_v54  ;;  %v738_v61 = vpop.f32.mrf.mxu1  ;;  %v570_v52 = vadd.f32 %v5180_v24, %v4575_v49  ;;  %v1507_v43 = vrot.slane %v4940_v32, 4 }
 0x239   :  { %v739_v63 = vadd.f32 %v738_v61, %v4597_v12  ;;  %v5248_v42 = vpop.eup %4342  ;;  %v573_v24 = vadd.f32 %v5185_v41, %v4575_v49  ;;  %v575_v41 = vadd.f32 %v5190_v44, %v4575_v49 }
 0x23a   :  { %v1319_v26 = vmax.f32 %v911_v59, 0.0  ;;  %v1320_v1 = vmax.f32 %v1080_v0, 0.0  ;;  %v1662_v46 = vmul.f32 256.0, %v5248_v42  ;;  %v1398_v59 = vrot.slane %v1397_v45, 2 }
 0x23b   :  { %v1314_v3 = vmax.f32 %v739_v63, 0.0  ;;  %v5279_v63 = vadd.f32 %v4586_v56, %v4575_v49  ;;  %v4232_v56 = vld [vmem:[%s6279_s9 + $0x164] sm:$0xf0]  ;;  %v5304_v25 = vadd.f32 %v1507_v43, %v4940_v32  ;;  %v1317_v29 = vmax.f32 %v573_v24, 0.0  ;;  %v4230_v32 = vld [vmem:[%s6279_s9 + $0x154] sm:$0xf0] }
 0x23c   :  { %v5194_v2 = vadd.f32 %v1605_v50, %v1319_v26  ;;  %v5196_v4 = vadd.f32 %v1642_v55, %v1320_v1  ;;  %v1471_v50 = vadd.f32 %v1470_v37, %v4938_v31  ;;  %v4234_v55 = vld [vmem:[%s6279_s9 + $0x174] sm:$0xf0]  ;;  %v5275_v26 = vadd.f32 %v4573_v48, %v4575_v49  ;;  %v3725_v48 = vld [vmem:[%s6279_s9 + $0x160] sm:$0xf]  ;;  %v3781_v37 = vld [vmem:[%s6279_s9 + $0x1d0] sm:$0xf] }
 0x23d   :  { %v1568_v5 = vadd.f32 %v1567_v57, %v1314_v3  ;;  %v3797_v57 = vld [vmem:[%s6279_s9 + $0x1f0] sm:$0xf]  ;;  %v3734_v9 = vor.u32 %v4234_v55, %v3733_v51  ;;  %v4250_v31 = vld [vmem:[%s6279_s9 + $0x1f4] sm:$0xf0]  ;;  %v3726_v18 = vor.u32 %v4232_v56, %v3725_v48  ;;  %v1399_v22 = vadd.f32 %v1398_v59, %v1397_v45  ;;  %v4201_v48 = vld [vmem:[%s6279_s9 + $0x74] sm:$0xf] }
 0x23e   :  { %v3798_v61 = vor.u32 %v4250_v31, %v3797_v57  ;;  %v1357_v7 = vmax.f32 %v5275_v26, 0.0  ;;  %v1361_v27 = vmax.f32 %v5279_v63, 0.0  ;;  %v3718_v51 = vor.u32 %v4230_v32, %v3717_v35  ;;  %v4246_v55 = vld [vmem:[%s6279_s9 + $0x1d4] sm:$0xf0]  ;;  %v3607_v56 = vld [vmem:[%s6279_s9 + $0x78] sm:$0xf0] }
 0x23f   :  { %v5198_v8 = vpop.f32.mrf.mxu2  ;;  %v5200_v11 = vpop.f32.mrf.mxu3  ;;  %2420 = vmatpush.bf16.msrb.mxu1 %v3734_v9  ;;  %v1400_v57 = vrot.slane %v1399_v22, 1  ;;  %v3782_v59 = vor.u32 %v4246_v55, %v3781_v37  ;;  %vm1666_vm11 = vweird.f32 %v5248_v42  ;;  %v4244_v35 = vld [vmem:[%s6279_s9 + $0x1c4] sm:$0xf0]  ;;  %v4189_v26 = vld [vmem:[%s6279_s9 + $0x14] sm:$0xf] }
 0x240   :  { %v5202_v14 = vpop.f32.mrf.mxu0  ;;  %v741_v62 = vpop.f32.mrf.mxu1  ;;  %2433 = vmatpush.bf16.msra.mxu2 %v3798_v61  ;;  %v5329_v9 = vadd.f32 %v5198_v8, %v4582_v53  ;;  %v5341_v61 = vadd.f32 %v5200_v11, %v4584_v54 }
 0x241   :  { %v742_v15 = vadd.f32 %v741_v62, %v4597_v12  ;;  %v1472_v62 = vrot.slane %v1471_v50, 2 }
 0x242   :  { %v1323_v32 = vmax.f32 %v5329_v9, 0.0  ;;  %v1324_v55 = vmax.f32 %v5341_v61, 0.0 }
 0x243   :  { %v1318_v17 = vmax.f32 %v742_v15, 0.0  ;;  %2421 = vmatpush.bf16.msrb.mxu1 %v3726_v18  ;;  %v5309_v34 = vadd.f32 %v1472_v62, %v1471_v50  ;;  %v578_v50 = vadd.f32 %v5202_v14, %v4575_v49  ;;  %v4218_v14 = vld [vmem:[%s6279_s9 + $0xf4] sm:$0xf0]  ;;  %v4228_v18 = vld [vmem:[%s6279_s9 + $0x144] sm:$0xf0] }
 0x244   :  { %2434 = vmatpush.bf16.msra.mxu2 %v3790_v58 }
 0x245   :  { %v5205_v13 = vadd.f32 %v1568_v5, %v1318_v17  ;;  %v1663_v5 = vsub.f32 1.0, %v1662_v46  ;;  %v1313_v17 = vmax.f32 %v570_v52, 0.0  ;;  %v1321_v46 = vmax.f32 %v575_v41, 0.0  ;;  %v3709_v41 = vld [vmem:[%s6279_s9 + $0x140] sm:$0xf] }
 0x246   :  { %v1509_v52 = vrot.slane %v5304_v25, 2  ;;  %v1474_v60 = vrot.slane %v5309_v34, 1 }
 0x247   :  { %v5213_v20 = vpop.f32.mrf.mxu2  ;;  %v5215_v10 = vpop.f32.mrf.mxu3  ;;  %v1664_v44 = vmul.f32 %v5248_v42, %v1663_v5  ;;  %v1531_v45 = vadd.f32 %v5177_v19, %v1313_v17  ;;  %v3669_v19 = vld [vmem:[%s6279_s9 + $0xf0] sm:$0xf]  ;;  %2422 = vmatpush.bf16.msrb.mxu1 %v3718_v51  ;;  %v3774_v51 = vor.u32 %v4244_v35, %v3773_v39 }
 0x248   :  { %v5217_v6 = vpop.f32.mrf.mxu0  ;;  %v5219_v21 = vpop.f32.mrf.mxu1  ;;  %v3670_v62 = vor.u32 %v4218_v14, %v3669_v19  ;;  %2435 = vmatpush.bf16.msra.mxu2 %v3782_v59  ;;  %v5375_v37 = vadd.f32 %v5213_v20, %v4582_v53  ;;  %v4199_v59 = vld [vmem:[%s6279_s9 + $0x64] sm:$0xf]  ;;  %v3599_v19 = vld [vmem:[%s6279_s9 + $0x68] sm:$0xf0]  ;;  %v1401_v14 = vadd.f32 %v1400_v57, %v1399_v22  ;;  %v1433_v22 = vrot.slane %v4949_v47, 4 }
 0x249   :  { %v1532_v43 = vadd.f32 %v1531_v45, %v1317_v29  ;;  %v5345_v8 = vadd.f32 %v5217_v6, %v4575_v49  ;;  %v1665_v11 = vadd.f32 %v5248_v42, %v1664_v44  ;;  %v3610_v6 = vor.u32 %v4201_v48, %v3607_v56  ;;  %v4242_v56 = vld [vmem:[%s6279_s9 + $0x1b4] sm:$0xf0] }
 0x24a   :  { %v1325_v29 = vmax.f32 %v578_v50, 0.0  ;;  %2407 = vmatpush.bf16.msra.mxu0 %v3670_v62  ;;  %v3710_v44 = vor.u32 %v4228_v18, %v3709_v41  ;;  %v4216_v50 = vld [vmem:[%s6279_s9 + $0xe4] sm:$0xf0]  ;;  %v3602_v61 = vor.u32 %v4199_v59, %v3599_v19  ;;  %v3765_v62 = vld [vmem:[%s6279_s9 + $0x1b0] sm:$0xf] }
 0x24b   :  { %v1533_v58 = vadd.f32 %v1532_v43, %v1321_v46  ;;  %2446 = vmatpush.bf16.msra.mxu3 %v3610_v6  ;;  %v3661_v46 = vld [vmem:[%s6279_s9 + $0xe0] sm:$0xf]  ;;  %v1329_v9 = vmax.f32 %v5345_v8, 0.0  ;;  %v5400_v43 = vsel %vm1666_vm11, %v5248_v42, %v1665_v11  ;;  %v4226_v8 = vld [vmem:[%s6279_s9 + $0x134] sm:$0xf0]  ;;  %v1085_v42 = vadd.f32 %v5215_v10, %v4584_v54 }
 0x24c   :  { %2423 = vmatpush.bf16.msrb.mxu1 %v3710_v44  ;;  %2436 = vmatpush.bf16.msra.mxu2 %v3774_v51  ;;  %v1327_v11 = vmax.f32 %v5375_v37, 0.0  ;;  %v3766_v39 = vor.u32 %v4242_v56, %v3765_v62  ;;  %v3653_v10 = vld [vmem:[%s6279_s9 + $0xd0] sm:$0xf]  ;;  %v4197_v51 = vld [vmem:[%s6279_s9 + $0x54] sm:$0xf] }
 0x24d   :  { %v1534_v57 = vadd.f32 %v1533_v58, %v1325_v29  ;;  %v4214_v58 = vld [vmem:[%s6279_s9 + $0xd4] sm:$0xf0]  ;;  %v5430_v29 = vadd.f32 %v5219_v21, %v4597_v12  ;;  %v1607_v21 = vadd.f32 %v5194_v2, %v1323_v32  ;;  %v3693_v59 = vld [vmem:[%s6279_s9 + $0x120] sm:$0xf]  ;;  %v4224_v19 = vld [vmem:[%s6279_s9 + $0x124] sm:$0xf0] }
 0x24e   :  { %v1328_v2 = vmax.f32 %v1085_v42, 0.0  ;;  %v3645_v42 = vld [vmem:[%s6279_s9 + $0xc0] sm:$0xf] }
 0x24f   :  { %v5233_v28 = vpop.f32.mrf.mxu2  ;;  %v5235_v30 = vpop.f32.mrf.mxu3  ;;  %2447 = vmatpush.bf16.msra.mxu3 %v3602_v61  ;;  %v3757_v61 = vld [vmem:[%s6279_s9 + $0x1a0] sm:$0xf] }
 0x250   :  { %v5237_v16 = vpop.f32.mrf.mxu0  ;;  %v5239_v33 = vpop.f32.mrf.mxu1  ;;  %2437 = vmatpush.bf16.msra.mxu2 %v3766_v39  ;;  %v1087_v32 = vadd.f32 %v5235_v30, %v4584_v54  ;;  %v1322_v30 = vmax.f32 %v5430_v29, 0.0  ;;  %v3583_v39 = vld [vmem:[%s6279_s9 + $0x48] sm:$0xf0] }
 0x251   :  { %v583_v45 = vadd.f32 %v5237_v16, %v4575_v49  ;;  %v3662_v16 = vor.u32 %v4216_v50, %v3661_v46  ;;  %v3591_v46 = vld [vmem:[%s6279_s9 + $0x58] sm:$0xf0]  ;;  %v1644_v50 = vadd.f32 %v5196_v4, %v1324_v55  ;;  %v918_v4 = vadd.f32 %v5233_v28, %v4582_v53  ;;  %v4212_v28 = vld [vmem:[%s6279_s9 + $0xc4] sm:$0xf0] }
 0x252   :  { %v3694_v55 = vor.u32 %v4224_v19, %v3693_v59 }
 0x253   :  { %2408 = vmatpush.bf16.msra.mxu0 %v3662_v16  ;;  %v1333_v6 = vmax.f32 %v583_v45, 0.0  ;;  %v3654_v45 = vor.u32 %v4214_v58, %v3653_v10  ;;  %v3594_v16 = vor.u32 %v4197_v51, %v3591_v46  ;;  %v5482_v10 = vmul.f32 %v5400_v43, %v1401_v14 }
 0x254   :  { %v1608_v58 = vadd.f32 %v1607_v21, %v1327_v11  ;;  %v1645_v51 = vadd.f32 %v1644_v50, %v1328_v2  ;;  %v1331_v46 = vmax.f32 %v918_v4, 0.0  ;;  %v1332_v14 = vmax.f32 %v1087_v32, 0.0  ;;  %v3637_v50 = vld [vmem:[%s6279_s9 + $0xb0] sm:$0xf] }
 0x255   :  { %2448 = vmatpush.bf16.msra.mxu3 %v3594_v16 }
 0x257   :  { %v5242_v36 = vpop.f32.mrf.mxu2  ;;  %v5244_v40 = vpop.f32.mrf.mxu3  ;;  %2409 = vmatpush.bf16.msra.mxu0 %v3654_v45  ;;  %v3749_v45 = vld [vmem:[%s6279_s9 + $0x190] sm:$0xf] }
 0x258   :  { %v5246_v38 = vpop.f32.mrf.mxu0  ;;  %v5251_v23 = vpop.f32.mrf.mxu1  ;;  %v921_v21 = vadd.f32 %v5242_v36, %v4582_v53  ;;  %v1090_v4 = vadd.f32 %v5244_v40, %v4584_v54  ;;  %v5521_v40 = vadd.f32 %v1509_v52, %v5304_v25  ;;  %v3741_v25 = vld [vmem:[%s6279_s9 + $0x180] sm:$0xf]  ;;  %v1570_v52 = vadd.f32 %v5205_v13, %v1322_v30 }
 0x259   :  { %v5389_v20 = vadd.f32 %v5246_v38, %v4575_v49  ;;  %v3701_v38 = vld [vmem:[%s6279_s9 + $0x130] sm:$0xf]  ;;  %v749_v36 = vadd.f32 %v5251_v23, %v4597_v12  ;;  %v4336_v13 = vld [vmem:[%s6283_s6] ss:$0 sm:$0xff] }
 0x25a   :  { %v3702_v48 = vor.u32 %v4226_v8, %v3701_v38  ;;  %v3629_v30 = vld [vmem:[%s6279_s9 + $0xa0] sm:$0xf] }
 0x25b   :  { %v1337_v44 = vmax.f32 %v5389_v20, 0.0  ;;  %v1535_v20 = vadd.f32 %v1534_v57, %v1329_v9  ;;  %v4240_v9 = vld [vmem:[%s6279_s9 + $0x1a4] sm:$0xf0] }
 0x25c   :  { %2424 = vmatpush.bf16.msrb.mxu1 %v3702_v48  ;;  %v3758_v57 = vor.u32 %v4240_v9, %v3757_v61  ;;  %v747_v48 = vadd.f32 %v5239_v33, %v4597_v12  ;;  %v3685_v33 = vld [vmem:[%s6279_s9 + $0x110] sm:$0xf]  ;;  %v4210_v61 = vld [vmem:[%s6279_s9 + $0xb4] sm:$0xf0] }
 0x25d   :  { %v1536_v38 = vadd.f32 %v1535_v20, %v1333_v6  ;;  %v3646_v6 = vor.u32 %v4212_v28, %v3645_v42  ;;  %v3638_v9 = vor.u32 %v4210_v61, %v3637_v50  ;;  %v3677_v28 = vld [vmem:[%s6279_s9 + $0x100] sm:$0xf] }
 0x25e   :  { %2438 = vmatpush.bf16.msra.mxu2 %v3758_v57  ;;  %v1326_v2 = vmax.f32 %v747_v48, 0.0  ;;  %v4220_v48 = vld [vmem:[%s6279_s9 + $0x104] sm:$0xf0] }
 0x25f   :  { %v5271_v0 = vpop.f32.mrf.mxu2  ;;  %v5283_v1 = vpop.f32.mrf.mxu3  ;;  %v1537_v29 = vadd.f32 %v1536_v38, %v1337_v44  ;;  %2410 = vmatpush.bf16.msra.mxu0 %v3646_v6  ;;  %v4238_v44 = vld [vmem:[%s6279_s9 + $0x194] sm:$0xf0]  ;;  %v4193_v38 = vld [vmem:[%s6279_s9 + $0x34] sm:$0xf]  ;;  %v3678_v6 = vor.u32 %v4220_v48, %v3677_v28 }
 0x260   :  { %v5285_v3 = vpop.f32.mrf.mxu0  ;;  %v5287_v15 = vpop.f32.mrf.mxu1  ;;  %2425 = vmatpush.bf16.msrb.mxu1 %v3694_v55  ;;  %v3750_v19 = vor.u32 %v4238_v44, %v3749_v45  ;;  %v1336_v45 = vmax.f32 %v1090_v4, 0.0  ;;  %v923_v44 = vadd.f32 %v5271_v0, %v4582_v53  ;;  %v4208_v0 = vld [vmem:[%s6279_s9 + $0xa4] sm:$0xf0]  ;;  %v4206_v4 = vld [vmem:[%s6279_s9 + $0x94] sm:$0xf0] }
 0x261   :  { %v588_v41 = vadd.f32 %v5285_v3, %v4575_v49 }
 0x262   :  { %2439 = vmatpush.bf16.msra.mxu2 %v3750_v19 }
 0x263   :  { %v1341_v8 = vmax.f32 %v588_v41, 0.0  ;;  %v4195_v41 = vld [vmem:[%s6279_s9 + $0x44] sm:$0xf]  ;;  %2411 = vmatpush.bf16.msra.mxu0 %v3638_v9 }
 0x265   :  { %v1538_v20 = vadd.f32 %v1537_v29, %v1341_v8  ;;  %v3575_v8 = vld [vmem:[%s6279_s9 + $0x38] sm:$0xf0] }
 0x266   :  { %v3578_v42 = vor.u32 %v4193_v38, %v3575_v8 }
 0x267   :  { %v5331_v31 = vpop.f32.mrf.mxu2  ;;  %v5347_v24 = vpop.f32.mrf.mxu3 }
 0x268   :  { %v589_v5 = vpop.f32.mrf.mxu0  ;;  %v5357_v17 = vpop.f32.mrf.mxu1 }
 0x269   :  { %v5434_v3 = vadd.f32 %v589_v5, %v4575_v49 }
 0x26b   :  { %v1345_v56 = vmax.f32 %v5434_v3, 0.0  ;;  %v4222_v3 = vld [vmem:[%s6279_s9 + $0x114] sm:$0xf0] }
 0x26c   :  { %v3686_v11 = vor.u32 %v4222_v3, %v3685_v33  ;;  %v1571_v3 = vadd.f32 %v1570_v52, %v1326_v2 }
 0x26e   :  { %2426 = vmatpush.bf16.msrb.mxu1 %v3686_v11  ;;  %v1330_v11 = vmax.f32 %v749_v36, 0.0 }
 0x26f   :  { %v5420_v18 = vpop.f32.mrf.mxu2  ;;  %v5436_v35 = vpop.f32.mrf.mxu3 }
 0x270   :  { %v592_v37 = vpop.f32.mrf.mxu0  ;;  %v5446_v5 = vpop.f32.mrf.mxu1  ;;  %v5572_v50 = vadd.f32 %v5420_v18, %v4582_v53  ;;  %v5576_v61 = vadd.f32 %v5436_v35, %v4584_v54  ;;  %v1339_v18 = vmax.f32 %v923_v44, 0.0  ;;  %v4187_v44 = vld [vmem:[%s6279_s9 + $0x4] sm:$0xf] }
 0x271   :  { %v593_v62 = vadd.f32 %v592_v37, %v4575_v49  ;;  %v3586_v37 = vor.u32 %v4195_v41, %v3583_v39  ;;  %v4236_v41 = vld [vmem:[%s6279_s9 + $0x184] sm:$0xf0]  ;;  %v1335_v39 = vmax.f32 %v921_v21, 0.0  ;;  %v4191_v21 = vld [vmem:[%s6279_s9 + $0x24] sm:$0xf]  ;;  %v757_v63 = vadd.f32 %v5446_v5, %v4597_v12 }
 0x272   :  { %v3742_v33 = vor.u32 %v4236_v41, %v3741_v25  ;;  %2427 = vmatpush.bf16.msrb.mxu1 %v3678_v6  ;;  %v1348_v6 = vmax.f32 %v5576_v61, 0.0  ;;  %v3613_v5 = vld [vmem:[%s6279_s9 + $0x80] sm:$0xf] }
 0x273   :  { %v1349_v16 = vmax.f32 %v593_v62, 0.0  ;;  %2449 = vmatpush.bf16.msra.mxu3 %v3586_v37  ;;  %v1539_v62 = vadd.f32 %v1538_v20, %v1345_v56  ;;  %v1609_v56 = vadd.f32 %v1608_v58, %v1331_v46  ;;  %v1092_v58 = vadd.f32 %v5283_v1, %v4584_v54  ;;  %v3567_v1 = vld [vmem:[%s6279_s9 + $0x28] sm:$0xf0] }
 0x274   :  { %v926_v46 = vadd.f32 %v5331_v31, %v4582_v53  ;;  %2440 = vmatpush.bf16.msra.mxu2 %v3742_v33  ;;  %v5568_v31 = vadd.f32 %v5357_v17, %v4597_v12  ;;  %v3630_v20 = vor.u32 %v4208_v0, %v3629_v30  ;;  %v3621_v17 = vld [vmem:[%s6279_s9 + $0x90] sm:$0xf]  ;;  %v5625_v33 = vadd.f32 %v1433_v22, %v4949_v47  ;;  %v4217_v30 = vld [vmem:[%s6279_s9 + $0xf4] sm:$0xf]  ;;  %v3671_v0 = vld [vmem:[%s6279_s9 + $0xf8] sm:$0xf0] }
 0x275   :  { %v1540_v29 = vadd.f32 %v1539_v62, %v1349_v16  ;;  %v3570_v16 = vor.u32 %v4191_v21, %v3567_v1  ;;  %v1610_v19 = vadd.f32 %v1609_v56, %v1335_v39  ;;  %v3622_v35 = vor.u32 %v4206_v4, %v3621_v17  ;;  %v4215_v4 = vld [vmem:[%s6279_s9 + $0xe4] sm:$0xf] }
 0x276   :  { %2412 = vmatpush.bf16.msra.mxu0 %v3630_v20  ;;  %v1340_v8 = vmax.f32 %v1092_v58, 0.0  ;;  %v1343_v25 = vmax.f32 %v926_v46, 0.0  ;;  %v1338_v56 = vmax.f32 %v5568_v31, 0.0  ;;  %v3799_v46 = vld [vmem:[%s6279_s9 + $0x1f8] sm:$0xf0]  ;;  %v3674_v20 = vor.u32 %v4217_v30, %v3671_v0 }
 0x277   :  { %v5498_v59 = vpop.f32.mrf.mxu2  ;;  %v5510_v32 = vpop.f32.mrf.mxu3  ;;  %2450 = vmatpush.bf16.msra.mxu3 %v3578_v42  ;;  %v1611_v39 = vadd.f32 %v1610_v19, %v1339_v18 }
 0x278   :  { %v594_v55 = vpop.f32.mrf.mxu0  ;;  %v5524_v57 = vpop.f32.mrf.mxu1  ;;  %v1100_v21 = vadd.f32 %v5510_v32, %v4584_v54  ;;  %v3663_v32 = vld [vmem:[%s6279_s9 + $0xe8] sm:$0xf0] }
 0x279   :  { %v595_v23 = vadd.f32 %v594_v55, %v4575_v49  ;;  %v1646_v49 = vadd.f32 %v1645_v51, %v1332_v14  ;;  %v752_v51 = vadd.f32 %v5287_v15, %v4597_v12  ;;  %v5564_v15 = vadd.f32 %v5347_v24, %v4584_v54 }
 0x27a   :  { %v1572_v55 = vadd.f32 %v1571_v3, %v1330_v11  ;;  %2413 = vmatpush.bf16.msra.mxu0 %v3622_v35  ;;  %v1612_v22 = vadd.f32 %v1611_v39, %v1343_v25  ;;  %v1352_v25 = vmax.f32 %v1100_v21, 0.0 }
 0x27b   :  { %v1353_v37 = vmax.f32 %v595_v23, 0.0  ;;  %v1647_v36 = vadd.f32 %v1646_v49, %v1336_v45  ;;  %2451 = vmatpush.bf16.msra.mxu3 %v3570_v16  ;;  %v1334_v48 = vmax.f32 %v752_v51, 0.0  ;;  %v1344_v52 = vmax.f32 %v5564_v15, 0.0  ;;  %v4249_v51 = vld [vmem:[%s6279_s9 + $0x1f4] sm:$0xf] }
 0x27c   :  { %v1347_v49 = vmax.f32 %v5572_v50, 0.0  ;;  %v1968_v45 = vpack.c.bf16 %v5482_v10, %v5482_v10  ;;  %v1342_v50 = vmax.f32 %v757_v63, 0.0  ;;  %v3802_v35 = vor.u32 %v4249_v51, %v3799_v46  ;;  %v3775_v10 = vld [vmem:[%s6279_s9 + $0x1c8] sm:$0xf0] }
 0x27d   :  { %v1541_v14 = vadd.f32 %v1540_v29, %v1353_v37  ;;  %v5609_v29 = vld [vmem:[%s6279_s9 + $0x174] sm:$0xf]  ;;  %v5614_v37 = vld [vmem:[%s6279_s9 + $0x178] sm:$0xf0]  ;;  %v1648_v58 = vadd.f32 %v1647_v36, %v1340_v8  ;;  %v1573_v47 = vadd.f32 %v1572_v55, %v1334_v48  ;;  %v3666_v48 = vor.u32 %v4215_v4, %v3663_v32  ;;  %v3711_v4 = vld [vmem:[%s6279_s9 + $0x148] sm:$0xf0] }
 0x27e   :  { %v1613_v39 = vadd.f32 %v1612_v22, %v1347_v49 }
 0x27f   :  { %v1542_v2 = vadd.f32 %v1541_v14, %v1357_v7  ;;  %v932_v24 = vpop.f32.mrf.mxu2  ;;  %v1101_v9 = vpop.f32.mrf.mxu3  ;;  %v3559_v7 = vld [vmem:[%s6279_s9 + $0x18] sm:$0xf0]  ;;  %v1649_v16 = vadd.f32 %v1648_v58, %v1344_v52  ;;  %v1574_v19 = vadd.f32 %v1573_v47, %v1338_v56 }
 0x280   :  { %v1834_v38 = vpop.f32.mrf.mxu0  ;;  %v5594_v23 = vpop.f32.mrf.mxu1  ;;  %v3562_v28 = vor.u32 %v4189_v26, %v3559_v7  ;;  %v933_v15 = vadd.f32 %v932_v24, %v4582_v53  ;;  %v1102_v55 = vadd.f32 %v1101_v9, %v4584_v54  ;;  %v4231_v26 = vld [vmem:[%s6279_s9 + $0x164] sm:$0xf]  ;;  %v759_v7 = vadd.f32 %v5524_v57, %v4597_v12  ;;  %v3727_v9 = vld [vmem:[%s6279_s9 + $0x168] sm:$0xf0] }
 0x281   :  { %v1543_v62 = vadd.f32 %v1542_v2, %v1361_v27  ;;  %v1835_v42 = vadd.f32 %v4336_v13, %v1834_v38  ;;  %v5604_v27 = vadd.f32 %v5498_v59, %v4582_v53  ;;  %v4204_v59 = vld [vmem:[%s6279_s9 + $0x84] sm:$0xf0]  ;;  %v3551_v13 = vld [vmem:[%s6279_s9 + $0x8] sm:$0xf0]  ;;  %v3738_v38 = vor.u32 %v5609_v29, %v5614_v37  ;;  %v3719_v29 = vld [vmem:[%s6279_s9 + $0x158] sm:$0xf0] }
 0x282   :  { %2452 = vmatpush.bf16.msra.mxu3 %v3562_v28  ;;  %v3614_v11 = vor.u32 %v4204_v59, %v3613_v5  ;;  %v3554_v14 = vor.u32 %v4187_v44, %v3551_v13  ;;  %v3791_v28 = vld [vmem:[%s6279_s9 + $0x1e8] sm:$0xf0]  ;;  %v1355_v56 = vmax.f32 %v933_v15, 0.0  ;;  %v1650_v63 = vadd.f32 %v1649_v16, %v1348_v6  ;;  %v4213_v37 = vld [vmem:[%s6279_s9 + $0xd4] sm:$0xf] }
 0x283   :  { %v1544_v41 = vrot.slane %v1543_v62, 4  ;;  %4344 = vtanh.f32 %v1835_v42  ;;  %v1351_v61 = vmax.f32 %v5604_v27, 0.0  ;;  %v4247_v42 = vld [vmem:[%s6279_s9 + $0x1e4] sm:$0xf]  ;;  %v1575_v27 = vadd.f32 %v1574_v19, %v1342_v50  ;;  %v3655_v5 = vld [vmem:[%s6279_s9 + $0xd8] sm:$0xf0] }
 0x284   :  { %2414 = vmatpush.bf16.msra.mxu0 %v3614_v11  ;;  %v3730_v49 = vor.u32 %v4231_v26, %v3727_v9  ;;  %v3794_v6 = vor.u32 %v4247_v42, %v3791_v28  ;;  %v4245_v11 = vld [vmem:[%s6279_s9 + $0x1d4] sm:$0xf]  ;;  %v3783_v44 = vld [vmem:[%s6279_s9 + $0x1d8] sm:$0xf0]  ;;  %v1346_v30 = vmax.f32 %v759_v7, 0.0  ;;  %v3658_v47 = vor.u32 %v4213_v37, %v3655_v5 }
 0x285   :  { %v1545_v3 = vadd.f32 %v1544_v41, %v1543_v62  ;;  %v5679_v41 = vld [vmem:[%s6279_s9 + $0x154] sm:$0xf]  ;;  %v1614_v13 = vadd.f32 %v1613_v39, %v1351_v61  ;;  %v1651_v22 = vadd.f32 %v1650_v63, %v1352_v25  ;;  %v762_v51 = vadd.f32 %v5594_v23, %v4597_v12  ;;  %v4211_v16 = vld [vmem:[%s6279_s9 + $0xc4] sm:$0xf]  ;;  %v3647_v19 = vld [vmem:[%s6279_s9 + $0xc8] sm:$0xf0] }
 0x286   :  { %2453 = vmatpush.bf16.msra.mxu3 %v3554_v14  ;;  %v4209_v9 = vld [vmem:[%s6279_s9 + $0xb4] sm:$0xf]  ;;  %v3639_v42 = vld [vmem:[%s6279_s9 + $0xb8] sm:$0xf0]  ;;  %v1475_v37 = vadd.f32 %v1474_v60, %v5309_v34  ;;  %v1511_v5 = vrot.slane %v5521_v40, 1 }
 0x287   :  { %v1546_v1 = vrot.slane %v1545_v3, 2  ;;  %v935_v31 = vpop.f32.mrf.mxu2  ;;  %v1104_v2 = vpop.f32.mrf.mxu3  ;;  %v1615_v21 = vadd.f32 %v1614_v13, %v1355_v56  ;;  %v1350_v7 = vmax.f32 %v762_v51, 0.0  ;;  %v3703_v56 = vld [vmem:[%s6279_s9 + $0x138] sm:$0xf0]  ;;  %v4241_v63 = vld [vmem:[%s6279_s9 + $0x1b4] sm:$0xf] }
 0x288   :  { %v1836_v17 = vpop.f32.mrf.mxu0  ;;  %v763_v18 = vpop.f32.mrf.mxu1  ;;  %2459 = vmatpush.bf16.msrb.mxu0 %v3674_v20  ;;  %v936_v62 = vadd.f32 %v935_v31, %v4582_v53  ;;  %v1105_v57 = vadd.f32 %v1104_v2, %v4584_v54  ;;  %v3722_v31 = vor.u32 %v5679_v41, %v3719_v29  ;;  %v3786_v20 = vor.u32 %v4245_v11, %v3783_v44 }
 0x289   :  { %v4345_v24 = vpop.eup %4344  ;;  %v1547_v36 = vadd.f32 %v1546_v1, %v1545_v3  ;;  %v1356_v3 = vmax.f32 %v1102_v55, 0.0  ;;  %v4227_v17 = vld [vmem:[%s6279_s9 + $0x144] sm:$0xf]  ;;  %v1576_v55 = vadd.f32 %v1575_v27, %v1346_v30  ;;  %v3767_v27 = vld [vmem:[%s6279_s9 + $0x1b8] sm:$0xf0]  ;;  %v3642_v29 = vor.u32 %v4209_v9, %v3639_v42 }
 0x28a   :  { %v1839_v8 = vpack.c.bf16 %v4345_v24, %v4345_v24  ;;  %v1359_v58 = vmax.f32 %v936_v62, 0.0  ;;  %v1360_v46 = vmax.f32 %v1105_v57, 0.0  ;;  %v764_v24 = vadd.f32 %v763_v18, %v4597_v12  ;;  %v4219_v9 = vld [vmem:[%s6279_s9 + $0x104] sm:$0xf] }
 0x28b   :  { %v1548_v52 = vrot.slane %v1547_v36, 1  ;;  %v1652_v23 = vadd.f32 %v1651_v22, %v1356_v3  ;;  %v3714_v18 = vor.u32 %v4227_v17, %v3711_v4  ;;  %v4207_v3 = vld [vmem:[%s6279_s9 + $0xa4] sm:$0xf]  ;;  %v1577_v11 = vadd.f32 %v1576_v55, %v1350_v7  ;;  %v3695_v22 = vld [vmem:[%s6279_s9 + $0x128] sm:$0xf0] }
 0x28c   :  { %1950 = vmatmul.bf16.vlgmr.msra.gmra.mxu1 %v1839_v8  ;;  %1963 = vmatmul.bf16.vlgmr.msrb.gmra.mxu2 %v1839_v8  ;;  %v1616_v32 = vadd.f32 %v1615_v21, %v1359_v58  ;;  %v1354_v57 = vmax.f32 %v764_v24, 0.0  ;;  %v3770_v58 = vor.u32 %v4241_v63, %v3767_v27  ;;  %v3759_v21 = vld [vmem:[%s6279_s9 + $0x1a8] sm:$0xf0]  ;;  %v1670_v17 = vmul.f32 %v5400_v43, %v1475_v37  ;;  %v4237_v24 = vld [vmem:[%s6279_s9 + $0x194] sm:$0xf] }
 0x28d   :  { %v1549_v59 = vadd.f32 %v1548_v52, %v1547_v36  ;;  %2472 = vmatpush.bf16.msra.mxu1 %v3738_v38  ;;  %2485 = vmatpush.bf16.msrb.mxu2 %v3802_v35  ;;  %v4243_v36 = vld [vmem:[%s6279_s9 + $0x1c4] sm:$0xf]  ;;  %v1653_v38 = vadd.f32 %v1652_v23, %v1360_v46  ;;  %v4225_v52 = vld [vmem:[%s6279_s9 + $0x134] sm:$0xf] }
 0x28e   :  { %2460 = vmatpush.bf16.msrb.mxu0 %v3666_v48  ;;  %v3778_v25 = vor.u32 %v4243_v36, %v3775_v10  ;;  %v3706_v60 = vor.u32 %v4225_v52, %v3703_v56  ;;  %v1578_v51 = vadd.f32 %v1577_v11, %v1354_v57  ;;  %v4203_v55 = vld [vmem:[%s6279_s9 + $0x84] sm:$0xf]  ;;  %v1970_v42 = vpack.c.bf16 %v1670_v17, %v1670_v17  ;;  %v3743_v56 = vld [vmem:[%s6279_s9 + $0x188] sm:$0xf0] }
 0x28f   :  { %v937_v14 = vpop.f32.mrf.mxu2  ;;  %v1672_v0 = vmul.f32 %v5400_v43, %v1549_v59  ;;  %v1106_v15 = vpop.f32.mrf.mxu3  ;;  %v4235_v52 = vld [vmem:[%s6279_s9 + $0x184] sm:$0xf] }
 0x290   :  { %v938_v1 = vadd.f32 %v937_v14, %v4582_v53  ;;  %v1107_v50 = vadd.f32 %v1106_v15, %v4584_v54  ;;  %v766_v61 = vpop.f32.mrf.mxu1  ;;  %v2054_v53 = vunpack.c.l.b16 %v1968_v45  ;;  %v3650_v45 = vor.u32 %v4211_v16, %v3647_v19 }
 0x291   :  { %v1972_v2 = vpack.c.bf16 %v1672_v0, %v1672_v0  ;;  %2473 = vmatpush.bf16.msra.mxu1 %v3730_v49  ;;  %2486 = vmatpush.bf16.msrb.mxu2 %v3794_v6  ;;  %v767_v62 = vadd.f32 %v766_v61, %v4597_v12  ;;  %v3631_v49 = vld [vmem:[%s6279_s9 + $0xa8] sm:$0xf0]  ;;  %v1435_v6 = vrot.slane %v5625_v33, 2  ;;  %v4239_v0 = vld [vmem:[%s6279_s9 + $0x1a4] sm:$0xf]  ;;  %v1512_v15 = vadd.f32 %v1511_v5, %v5521_v40 }
 0x292   :  { %v1363_v54 = vmax.f32 %v938_v1, 0.0  ;;  %2461 = vmatpush.bf16.msrb.mxu0 %v3658_v47  ;;  %v1364_v35 = vmax.f32 %v1107_v50, 0.0  ;;  %v4223_v47 = vld [vmem:[%s6279_s9 + $0x124] sm:$0xf]  ;;  %v3634_v1 = vor.u32 %v4207_v3, %v3631_v49  ;;  %v3623_v50 = vld [vmem:[%s6279_s9 + $0x98] sm:$0xf0]  ;;  %v3746_v3 = vor.u32 %v4235_v52, %v3743_v56 }
 0x293   :  { %v2058_v26 = vunpack.c.l.b16 %v1972_v2  ;;  %v1358_v13 = vmax.f32 %v767_v62, 0.0  ;;  %v3698_v2 = vor.u32 %v4223_v47, %v3695_v22  ;;  %v4221_v40 = vld [vmem:[%s6279_s9 + $0x114] sm:$0xf]  ;;  %v1671_v10 = vmul.f32 %v5400_v43, %v1512_v15  ;;  %v3927_v52 = vld [vmem:[%s6284_s12 + $0xf8] sm:$0xf0] }
 0x294   :  { %v1617_v8 = vadd.f32 %v1616_v32, %v1363_v54  ;;  %v1654_v28 = vadd.f32 %v1653_v38, %v1364_v35  ;;  %v3751_v54 = vld [vmem:[%s6279_s9 + $0x198] sm:$0xf0]  ;;  %v3615_v38 = vld [vmem:[%s6279_s9 + $0x88] sm:$0xf0]  ;;  %v2056_v49 = vunpack.c.l.b16 %v1970_v42  ;;  %v3821_v56 = vld [vmem:[%s6284_s12 + $0x20] sm:$0xf] }
 0x295   :  { %v2062_v48 = vsel %vm1773_vm10, %v2058_v26, %v2054_v53  ;;  %2474 = vmatpush.bf16.msra.mxu1 %v3722_v31  ;;  %2487 = vmatpush.bf16.msrb.mxu2 %v3786_v20  ;;  %v1436_v20 = vadd.f32 %v1435_v6, %v5625_v33  ;;  %v1579_v19 = vadd.f32 %v1578_v51, %v1358_v13  ;;  %v3687_v33 = vld [vmem:[%s6279_s9 + $0x118] sm:$0xf0] }
 0x296   :  { %v1618_v41 = vrot.slane %v1617_v8, 4  ;;  %v5738_v39 = vpack.c.b16 %v2062_v48, %v2062_v48  ;;  %2462 = vmatpush.bf16.msrb.mxu0 %v3650_v45  ;;  %v1655_v59 = vrot.slane %v1654_v28, 4  ;;  %v3762_v53 = vor.u32 %v4239_v0, %v3759_v21  ;;  %v3831_v42 = vld [vmem:[%s6284_s12 + $0x38] sm:$0xf0] }
 0x297   :  { %v1437_v35 = vrot.slane %v1436_v20, 1  ;;  %v3690_v62 = vor.u32 %v4221_v40, %v3687_v33  ;;  %v3618_v57 = vor.u32 %v4203_v55, %v3615_v38  ;;  %v3845_v40 = vld [vmem:[%s6284_s12 + $0x50] sm:$0xf]  ;;  %v4294_v33 = vld [vmem:[%s6284_s12 + $0x54] sm:$0xf0] }
 0x298   :  { %v1619_v44 = vadd.f32 %v1618_v41, %v1617_v8  ;;  %2402 = vmatmul.bf16.vlgmr.msrb.gmra.mxu3 %v5738_v39  ;;  %v1656_v30 = vadd.f32 %v1655_v59, %v1654_v28  ;;  %v768_v34 = vpop.f32.mrf.mxu1  ;;  %v1971_v41 = vpack.c.bf16 %v1671_v10, %v1671_v10  ;;  %v4292_v10 = vld [vmem:[%s6284_s12 + $0x44] sm:$0xf0]  ;;  %v3839_v38 = vld [vmem:[%s6284_s12 + $0x48] sm:$0xf0] }
 0x299   :  { %2475 = vmatpush.bf16.msra.mxu1 %v3714_v18  ;;  %2488 = vmatpush.bf16.msrb.mxu2 %v3778_v25  ;;  %v769_v14 = vadd.f32 %v768_v34, %v4597_v12  ;;  %v4205_v12 = vld [vmem:[%s6279_s9 + $0x94] sm:$0xf]  ;;  %v3754_v18 = vor.u32 %v4237_v24, %v3751_v54  ;;  %v3679_v25 = vld [vmem:[%s6279_s9 + $0x108] sm:$0xf0]  ;;  %v1438_v27 = vadd.f32 %v1437_v35, %v1436_v20  ;;  %v4298_v20 = vld [vmem:[%s6284_s12 + $0x74] sm:$0xf0] }
 0x29a   :  { %v1620_v46 = vrot.slane %v1619_v44, 2  ;;  %2463 = vmatpush.bf16.msrb.mxu0 %v3642_v29  ;;  %v1657_v31 = vrot.slane %v1656_v30, 2  ;;  %v3626_v36 = vor.u32 %v4205_v12, %v3623_v50  ;;  %v3682_v59 = vor.u32 %v4219_v9, %v3679_v25  ;;  %v3853_v12 = vld [vmem:[%s6284_s12 + $0x60] sm:$0xf]  ;;  %v4296_v50 = vld [vmem:[%s6284_s12 + $0x64] sm:$0xf0] }
 0x29b   :  { %v1362_v23 = vmax.f32 %v769_v14, 0.0  ;;  %v3846_v24 = vor.u32 %v4294_v33, %v3845_v40  ;;  %v4289_v9 = vld [vmem:[%s6284_s12 + $0x34] sm:$0xf] }
 0x29c   :  { %v1621_v16 = vadd.f32 %v1620_v46, %v1619_v44  ;;  %v1658_v61 = vadd.f32 %v1657_v31, %v1656_v30  ;;  %v2057_v44 = vunpack.c.l.b16 %v1971_v41  ;;  %v1669_v30 = vmul.f32 %v5400_v43, %v1438_v27  ;;  %v3861_v31 = vld [vmem:[%s6284_s12 + $0x70] sm:$0xf]  ;;  %v4313_v25 = vld [vmem:[%s6284_s12 + $0xf4] sm:$0xf]  ;;  %v4288_v41 = vld [vmem:[%s6284_s12 + $0x24] sm:$0xf0] }
 0x29d   :  { %2476 = vmatpush.bf16.msra.mxu1 %v3706_v60  ;;  %2489 = vmatpush.bf16.msrb.mxu2 %v3770_v58  ;;  %v1580_v32 = vadd.f32 %v1579_v19, %v1362_v23  ;;  %v3863_v19 = vld [vmem:[%s6284_s12 + $0x78] sm:$0xf0]  ;;  %v4312_v27 = vld [vmem:[%s6284_s12 + $0xe4] sm:$0xf0]  ;;  %v4265_v40 = vld [vmem:[%s6285_s11 + $0x74] sm:$0xf] }
 0x29e   :  { %v1622_v4 = vrot.slane %v1621_v16, 1  ;;  %2464 = vmatpush.bf16.msrb.mxu0 %v3634_v1  ;;  %v1659_v45 = vrot.slane %v1658_v61, 1  ;;  %v1969_v46 = vpack.c.bf16 %v1669_v30, %v1669_v30  ;;  %v3909_v30 = vld [vmem:[%s6284_s12 + $0xd0] sm:$0xf] }
 0x29f   :  { %v1581_v7 = vrot.slane %v1580_v32, 4 }
 0x2a0   :  { %v1623_v26 = vadd.f32 %v1622_v4, %v1621_v16  ;;  %v1660_v8 = vadd.f32 %v1659_v45, %v1658_v61  ;;  %v2055_v21 = vunpack.c.l.b16 %v1969_v46  ;;  %v3862_v16 = vor.u32 %v4298_v20, %v3861_v31  ;;  %v4295_v61 = vld [vmem:[%s6284_s12 + $0x64] sm:$0xf]  ;;  %v4293_v4 = vld [vmem:[%s6284_s12 + $0x54] sm:$0xf]  ;;  %v4308_v20 = vld [vmem:[%s6284_s12 + $0xc4] sm:$0xf0] }
 0x2a1   :  { %2477 = vmatpush.bf16.msra.mxu1 %v3698_v2  ;;  %2490 = vmatpush.bf16.msrb.mxu2 %v3762_v53  ;;  %v1582_v48 = vadd.f32 %v1581_v7, %v1580_v32  ;;  %v3854_v2 = vor.u32 %v4296_v50, %v3853_v12  ;;  %v3855_v53 = vld [vmem:[%s6284_s12 + $0x68] sm:$0xf0]  ;;  %v3847_v32 = vld [vmem:[%s6284_s12 + $0x58] sm:$0xf0]  ;;  %v4291_v45 = vld [vmem:[%s6284_s12 + $0x44] sm:$0xf] }
 0x2a2   :  { %v1674_v28 = vmul.f32 %v5400_v43, %v1623_v26  ;;  %2465 = vmatpush.bf16.msrb.mxu0 %v3626_v36  ;;  %v1675_v63 = vmul.f32 %v5400_v43, %v1660_v8  ;;  %2726 = vmatpush.bf16.msrb.mxu3 %v3862_v16  ;;  %v3858_v17 = vor.u32 %v4295_v61, %v3855_v53  ;;  %v3837_v36 = vld [vmem:[%s6284_s12 + $0x40] sm:$0xf]  ;;  %v3829_v26 = vld [vmem:[%s6284_s12 + $0x30] sm:$0xf]  ;;  %v4290_v7 = vld [vmem:[%s6284_s12 + $0x34] sm:$0xf0] }
 0x2a3   :  { %v1583_v37 = vrot.slane %v1582_v48, 2  ;;  %v3850_v54 = vor.u32 %v4293_v4, %v3847_v32  ;;  %v3838_v55 = vor.u32 %v4292_v10, %v3837_v36  ;;  %v3842_v35 = vor.u32 %v4291_v45, %v3839_v38  ;;  %v3925_v8 = vld [vmem:[%s6284_s12 + $0xf0] sm:$0xf]  ;;  %v4309_v46 = vld [vmem:[%s6284_s12 + $0xd4] sm:$0xf] }
 0x2a4   :  { %v1974_v29 = vpack.c.bf16 %v1674_v28, %v1674_v28  ;;  %v1975_v5 = vpack.c.bf16 %v1675_v63, %v1675_v63  ;;  %v3917_v63 = vld [vmem:[%s6284_s12 + $0xe0] sm:$0xf]  ;;  %v3807_v16 = vld [vmem:[%s6284_s12 + $0x8] sm:$0xf0]  ;;  %v4307_v12 = vld [vmem:[%s6284_s12 + $0xc4] sm:$0xf] }
 0x2a5   :  { %2478 = vmatpush.bf16.msra.mxu1 %v3690_v62  ;;  %2491 = vmatpush.bf16.msrb.mxu2 %v3754_v18  ;;  %v1584_v11 = vadd.f32 %v1583_v37, %v1582_v48  ;;  %v3830_v62 = vor.u32 %v4290_v7, %v3829_v26  ;;  %v4314_v18 = vld [vmem:[%s6284_s12 + $0xf4] sm:$0xf0]  ;;  %v3834_v48 = vor.u32 %v4289_v9, %v3831_v42  ;;  %v3903_v50 = vld [vmem:[%s6284_s12 + $0xc8] sm:$0xf0]  ;;  %v3893_v32 = vld [vmem:[%s6284_s12 + $0xb0] sm:$0xf] }
 0x2a6   :  { %v2060_v6 = vunpack.c.l.b16 %v1974_v29  ;;  %2466 = vmatpush.bf16.msrb.mxu0 %v3618_v57  ;;  %v2061_v13 = vunpack.c.l.b16 %v1975_v5  ;;  %2727 = vmatpush.bf16.msrb.mxu3 %v3854_v2  ;;  %v3926_v28 = vor.u32 %v4314_v18, %v3925_v8  ;;  %v3930_v57 = vor.u32 %v4313_v25, %v3927_v52  ;;  %v4287_v5 = vld [vmem:[%s6284_s12 + $0x24] sm:$0xf]  ;;  %v3989_v2 = vld [vmem:[%s6285_s11 + $0x70] sm:$0xf]  ;;  %v4266_v53 = vld [vmem:[%s6285_s11 + $0x74] sm:$0xf0] }
 0x2a7   :  { %v1585_v34 = vrot.slane %v1584_v11, 1  ;;  %v3822_v29 = vor.u32 %v4288_v41, %v3821_v56  ;;  %v3918_v37 = vor.u32 %v4312_v27, %v3917_v63  ;;  %v3906_v61 = vor.u32 %v4307_v12, %v3903_v50  ;;  %v3895_v10 = vld [vmem:[%s6284_s12 + $0xb8] sm:$0xf0]  ;;  %v3981_v45 = vld [vmem:[%s6285_s11 + $0x60] sm:$0xf] }
 0x2a8   :  { %2454 = vmatmul.bf16.vlgmr.msra.gmra.mxu3 %v5738_v39  ;;  %v2064_v60 = vsel %vm1773_vm10, %v2060_v6, %v2056_v49  ;;  %v2065_v47 = vsel %vm1773_vm10, %v2061_v13, %v2057_v44  ;;  %v3919_v6 = vld [vmem:[%s6284_s12 + $0xe8] sm:$0xf0]  ;;  %v3813_v44 = vld [vmem:[%s6284_s12 + $0x10] sm:$0xf]  ;;  %v4286_v13 = vld [vmem:[%s6284_s12 + $0x14] sm:$0xf0]  ;;  %v3990_v33 = vor.u32 %v4266_v53, %v3989_v2 }
 0x2a9   :  { %v2068_v58 = vpack.c.b16 %v2064_v60, %v2064_v60  ;;  %2479 = vmatpush.bf16.msra.mxu1 %v3682_v59  ;;  %2492 = vmatpush.bf16.msrb.mxu2 %v3746_v3  ;;  %v1586_v22 = vadd.f32 %v1585_v34, %v1584_v11  ;;  %v2069_v51 = vpack.c.b16 %v2065_v47, %v2065_v47  ;;  %v3823_v59 = vld [vmem:[%s6284_s12 + $0x28] sm:$0xf0]  ;;  %v4311_v3 = vld [vmem:[%s6284_s12 + $0xe4] sm:$0xf]  ;;  %v4310_v60 = vld [vmem:[%s6284_s12 + $0xd4] sm:$0xf0] }
 0x2aa   :  { %2728 = vmatpush.bf16.msrb.mxu3 %v3846_v24  ;;  %v3826_v49 = vor.u32 %v4287_v5, %v3823_v59  ;;  %v3922_v11 = vor.u32 %v4311_v3, %v3919_v6  ;;  %v3814_v34 = vor.u32 %v4286_v13, %v3813_v44  ;;  %v3815_v47 = vld [vmem:[%s6284_s12 + $0x18] sm:$0xf0]  ;;  %v4306_v24 = vld [vmem:[%s6284_s12 + $0xb4] sm:$0xf0]  ;;  %v4263_v7 = vld [vmem:[%s6285_s11 + $0x64] sm:$0xf] }
 0x2ab   :  { %2428 = vmatmul.bf16.vlgmr.msrb.gmra.mxu1 %v2068_v58  ;;  %v1673_v14 = vmul.f32 %v5400_v43, %v1586_v22  ;;  %2441 = vmatmul.bf16.vlgmr.msra.gmra.mxu2 %v2069_v51  ;;  %v4297_v43 = vld [vmem:[%s6284_s12 + $0x74] sm:$0xf]  ;;  %v3910_v22 = vor.u32 %v4310_v60, %v3909_v30  ;;  %v3894_v36 = vor.u32 %v4306_v24, %v3893_v32  ;;  %v3983_v8 = vld [vmem:[%s6285_s11 + $0x68] sm:$0xf0]  ;;  %v3885_v9 = vld [vmem:[%s6284_s12 + $0xa0] sm:$0xf] }
 0x2ac   :  { %v3866_v23 = vor.u32 %v4297_v43, %v3863_v19  ;;  %v4283_v43 = vld [vmem:[%s6284_s12 + $0x4] sm:$0xf]  ;;  %v4304_v42 = vld [vmem:[%s6284_s12 + $0xa4] sm:$0xf0]  ;;  %v3887_v25 = vld [vmem:[%s6284_s12 + $0xa8] sm:$0xf0] }
 0x2ad   :  { %v1973_v0 = vpack.c.bf16 %v1673_v14, %v1673_v14  ;;  %2765 = vmatpush.bf16.msra.mxu2 %v3930_v57  ;;  %v3911_v14 = vld [vmem:[%s6284_s12 + $0xd8] sm:$0xf0]  ;;  %v3973_v52 = vld [vmem:[%s6285_s11 + $0x50] sm:$0xf]  ;;  %v4262_v56 = vld [vmem:[%s6285_s11 + $0x54] sm:$0xf0] }
 0x2ae   :  { %2752 = vmatpush.bf16.msrb.mxu1 %v3866_v23  ;;  %2729 = vmatpush.bf16.msrb.mxu3 %v3838_v55  ;;  %v3810_v23 = vor.u32 %v4283_v43, %v3807_v16  ;;  %v4264_v55 = vld [vmem:[%s6285_s11 + $0x64] sm:$0xf0]  ;;  %v3974_v41 = vor.u32 %v4262_v56, %v3973_v52  ;;  %v4261_v63 = vld [vmem:[%s6285_s11 + $0x54] sm:$0xf]  ;;  %v3975_v27 = vld [vmem:[%s6285_s11 + $0x58] sm:$0xf0] }
 0x2af   :  { %v2059_v1 = vunpack.c.l.b16 %v1973_v0  ;;  %v3914_v0 = vor.u32 %v4309_v46, %v3911_v14  ;;  %v3982_v26 = vor.u32 %v4264_v55, %v3981_v45  ;;  %v4302_v5 = vld [vmem:[%s6284_s12 + $0x94] sm:$0xf0]  ;;  %v4301_v59 = vld [vmem:[%s6284_s12 + $0x94] sm:$0xf]  ;;  %v3965_v6 = vld [vmem:[%s6285_s11 + $0x40] sm:$0xf] }
 0x2b0   :  { %v3967_v60 = vld [vmem:[%s6285_s11 + $0x48] sm:$0xf0]  ;;  %v4282_v43 = vld [vmem:[%s6285_s11 + $0xf4] sm:$0xf0]  ;;  %v4257_v16 = vld [vmem:[%s6285_s11 + $0x34] sm:$0xf] }
 0x2b1   :  { %v2063_v15 = vsel %vm1773_vm10, %v2059_v1, %v2055_v21  ;;  %2766 = vmatpush.bf16.msra.mxu2 %v3922_v11  ;;  %v3805_v21 = vld [vmem:[%s6284_s12] sm:$0xf]  ;;  %v4284_v1 = vld [vmem:[%s6284_s12 + $0x4] sm:$0xf0]  ;;  %v3871_v14 = vld [vmem:[%s6284_s12 + $0x88] sm:$0xf0] }
 0x2b2   :  { %v2067_v39 = vpack.c.b16 %v2063_v15, %v2063_v15  ;;  %2753 = vmatpush.bf16.msrb.mxu1 %v3858_v17  ;;  %2730 = vmatpush.bf16.msrb.mxu3 %v3830_v62  ;;  %v3901_v15 = vld [vmem:[%s6284_s12 + $0xc0] sm:$0xf]  ;;  %v3806_v31 = vor.u32 %v4284_v1, %v3805_v21  ;;  %v3991_v17 = vld [vmem:[%s6285_s11 + $0x78] sm:$0xf0]  ;;  %v3986_v62 = vor.u32 %v4263_v7, %v3983_v8  ;;  %v4260_v11 = vld [vmem:[%s6285_s11 + $0x44] sm:$0xf0] }
 0x2b3   :  { %v3902_v19 = vor.u32 %v4308_v20, %v3901_v15  ;;  %v3994_v4 = vor.u32 %v4265_v40, %v3991_v17  ;;  %v3966_v30 = vor.u32 %v4260_v11, %v3965_v6  ;;  %v4258_v21 = vld [vmem:[%s6285_s11 + $0x34] sm:$0xf0]  ;;  %v4053_v20 = vld [vmem:[%s6285_s11 + $0xf0] sm:$0xf]  ;;  %v4281_v12 = vld [vmem:[%s6285_s11 + $0xf4] sm:$0xf] }
 0x2b4   :  { %2415 = vmatmul.bf16.vlgmr.msra.gmra.mxu0 %v2067_v39  ;;  %v4055_v50 = vld [vmem:[%s6285_s11 + $0xf8] sm:$0xf0]  ;;  %v3949_v53 = vld [vmem:[%s6285_s11 + $0x20] sm:$0xf]  ;;  %v4256_v40 = vld [vmem:[%s6285_s11 + $0x24] sm:$0xf0] }
 0x2b5   :  { %2739 = vmatpush.bf16.msra.mxu0 %v3926_v28  ;;  %2767 = vmatpush.bf16.msra.mxu2 %v3914_v0  ;;  %v4303_v28 = vld [vmem:[%s6284_s12 + $0xa4] sm:$0xf]  ;;  %v3957_v0 = vld [vmem:[%s6285_s11 + $0x30] sm:$0xf]  ;;  %v4058_v2 = vor.u32 %v4281_v12, %v4055_v50  ;;  %v3950_v17 = vor.u32 %v4256_v40, %v3949_v53  ;;  %v3951_v24 = vld [vmem:[%s6285_s11 + $0x28] sm:$0xf0] }
 0x2b6   :  { %2754 = vmatpush.bf16.msrb.mxu1 %v3850_v54  ;;  %2731 = vmatpush.bf16.msrb.mxu3 %v3822_v29  ;;  %v4305_v54 = vld [vmem:[%s6284_s12 + $0xb4] sm:$0xf]  ;;  %v3890_v57 = vor.u32 %v4303_v28, %v3887_v25  ;;  %v3978_v29 = vor.u32 %v4261_v63, %v3975_v27  ;;  %v4255_v32 = vld [vmem:[%s6285_s11 + $0x24] sm:$0xf]  ;;  %v4047_v45 = vld [vmem:[%s6285_s11 + $0xe8] sm:$0xf0] }
 0x2b7   :  { %v4037_v7 = vld [vmem:[%s6285_s11 + $0xd0] sm:$0xf]  ;;  %v4277_v25 = vld [vmem:[%s6285_s11 + $0xd4] sm:$0xf]  ;;  %v4039_v52 = vld [vmem:[%s6285_s11 + $0xd8] sm:$0xf0] }
 0x2b8   :  { %v4042_v56 = vor.u32 %v4277_v25, %v4039_v52  ;;  %v4029_v63 = vld [vmem:[%s6285_s11 + $0xc0] sm:$0xf]  ;;  %v4275_v6 = vld [vmem:[%s6285_s11 + $0xc4] sm:$0xf]  ;;  %v4031_v11 = vld [vmem:[%s6285_s11 + $0xc8] sm:$0xf0] }
 0x2b9   :  { %2740 = vmatpush.bf16.msra.mxu0 %v3918_v37  ;;  %2768 = vmatpush.bf16.msra.mxu2 %v3906_v61  ;;  %v3877_v37 = vld [vmem:[%s6284_s12 + $0x90] sm:$0xf]  ;;  %v4269_v12 = vld [vmem:[%s6285_s11 + $0x94] sm:$0xf]  ;;  %v4007_v50 = vld [vmem:[%s6285_s11 + $0x98] sm:$0xf0] }
 0x2ba   :  { %2755 = vmatpush.bf16.msrb.mxu1 %v3842_v35  ;;  %2732 = vmatpush.bf16.msrb.mxu3 %v3814_v34  ;;  %v3898_v35 = vor.u32 %v4305_v54, %v3895_v10  ;;  %v3878_v3 = vor.u32 %v4302_v5, %v3877_v37  ;;  %v4259_v34 = vld [vmem:[%s6285_s11 + $0x44] sm:$0xf]  ;;  %v3935_v5 = vld [vmem:[%s6285_s11 + $0x8] sm:$0xf0] }
 0x2bb   :  { %2480 = vmatmul.bf16.vlgmr.msra.gmra.mxu1 %v2068_v58  ;;  %2493 = vmatmul.bf16.vlgmr.msrb.gmra.mxu2 %v2069_v51  ;;  %v4285_v58 = vld [vmem:[%s6284_s12 + $0x14] sm:$0xf]  ;;  %v4279_v10 = vld [vmem:[%s6285_s11 + $0xe4] sm:$0xf] }
 0x2bc   :  { %v3818_v51 = vor.u32 %v4285_v58, %v3815_v47  ;;  %v3970_v58 = vor.u32 %v4259_v34, %v3967_v60  ;;  %v3869_v47 = vld [vmem:[%s6284_s12 + $0x80] sm:$0xf]  ;;  %v4050_v55 = vor.u32 %v4279_v10, %v4047_v45  ;;  %v4251_v37 = vld [vmem:[%s6285_s11 + $0x4] sm:$0xf]  ;;  %v4274_v34 = vld [vmem:[%s6285_s11 + $0xb4] sm:$0xf0] }
 0x2bd   :  { %2741 = vmatpush.bf16.msra.mxu0 %v3910_v22  ;;  %2769 = vmatpush.bf16.msra.mxu2 %v3898_v35  ;;  %v4300_v22 = vld [vmem:[%s6284_s12 + $0x84] sm:$0xf0]  ;;  %v3941_v35 = vld [vmem:[%s6285_s11 + $0x10] sm:$0xf]  ;;  %v4273_v60 = vld [vmem:[%s6285_s11 + $0xb4] sm:$0xf] }
 0x2be   :  { %2756 = vmatpush.bf16.msrb.mxu1 %v3834_v48  ;;  %2733 = vmatpush.bf16.msrb.mxu3 %v3806_v31  ;;  %v3886_v48 = vor.u32 %v4304_v42, %v3885_v9  ;;  %v3870_v46 = vor.u32 %v4300_v22, %v3869_v47  ;;  %v3958_v31 = vor.u32 %v4258_v21, %v3957_v0  ;;  %v4253_v9 = vld [vmem:[%s6285_s11 + $0x14] sm:$0xf]  ;;  %v3943_v42 = vld [vmem:[%s6285_s11 + $0x18] sm:$0xf0]  ;;  %v4271_v0 = vld [vmem:[%s6285_s11 + $0xa4] sm:$0xf] }
 0x2bf   :  { %v4023_v22 = vld [vmem:[%s6285_s11 + $0xb8] sm:$0xf0] }
 0x2c1   :  { %2742 = vmatpush.bf16.msra.mxu0 %v3902_v19  ;;  %2770 = vmatpush.bf16.msra.mxu2 %v3890_v57  ;;  %v4054_v19 = vor.u32 %v4282_v43, %v4053_v20  ;;  %v3933_v57 = vld [vmem:[%s6285_s11] sm:$0xf] }
 0x2c2   :  { %2757 = vmatpush.bf16.msrb.mxu1 %v3826_v49  ;;  %2938 = vmatpush.bf16.msra.mxu3 %v3990_v33  ;;  %v3879_v49 = vld [vmem:[%s6284_s12 + $0x98] sm:$0xf0]  ;;  %v4045_v33 = vld [vmem:[%s6285_s11 + $0xe0] sm:$0xf] }
 0x2c3   :  { %v3882_v13 = vor.u32 %v4301_v59, %v3879_v49  ;;  %v3938_v49 = vor.u32 %v4251_v37, %v3935_v5 }
 0x2c4   :  { %2467 = vmatmul.bf16.vlgmr.msrb.gmra.mxu0 %v2067_v39 }
 0x2c5   :  { %2743 = vmatpush.bf16.msra.mxu0 %v3894_v36  ;;  %2771 = vmatpush.bf16.msra.mxu2 %v3882_v13  ;;  %v3954_v36 = vor.u32 %v4255_v32, %v3951_v24  ;;  %v4034_v13 = vor.u32 %v4275_v6, %v4031_v11  ;;  %v4268_v32 = vld [vmem:[%s6285_s11 + $0x84] sm:$0xf0]  ;;  %v4329_v6 = vld [vmem:[%s6289_s14 + $0x70] sm:$0xff]  ;;  %v4319_v11 = vld [vmem:[%s6289_s14 + $0x20] sm:$0xff] }
 0x2c6   :  { %2758 = vmatpush.bf16.msrb.mxu1 %v3818_v51  ;;  %2939 = vmatpush.bf16.msra.mxu3 %v3982_v26  ;;  %v4299_v51 = vld [vmem:[%s6284_s12 + $0x84] sm:$0xf]  ;;  %v4254_v26 = vld [vmem:[%s6285_s11 + $0x14] sm:$0xf0] }
 0x2c7   :  { %v3874_v15 = vor.u32 %v4299_v51, %v3871_v14  ;;  %v4026_v51 = vor.u32 %v4273_v60, %v4023_v22  ;;  %v4272_v14 = vld [vmem:[%s6285_s11 + $0xa4] sm:$0xf0]  ;;  %v4326_v60 = vld [vmem:[%s6289_s14 + $0x58] sm:$0xff]  ;;  %v4325_v22 = vld [vmem:[%s6289_s14 + $0x50] sm:$0xff] }
 0x2c9   :  { %2744 = vmatpush.bf16.msra.mxu0 %v3886_v48  ;;  %2772 = vmatpush.bf16.msra.mxu2 %v3874_v15  ;;  %v3946_v48 = vor.u32 %v4253_v9, %v3943_v42  ;;  %v4015_v15 = vld [vmem:[%s6285_s11 + $0xa8] sm:$0xf0] }
 0x2ca   :  { %2759 = vmatpush.bf16.msrb.mxu1 %v3810_v23  ;;  %2940 = vmatpush.bf16.msra.mxu3 %v3974_v41  ;;  %v3959_v23 = vld [vmem:[%s6285_s11 + $0x38] sm:$0xf0]  ;;  %v4252_v41 = vld [vmem:[%s6285_s11 + $0x4] sm:$0xf0]  ;;  %v4018_v43 = vor.u32 %v4271_v0, %v4015_v15 }
 0x2cb   :  { %v3962_v61 = vor.u32 %v4257_v16, %v3959_v23  ;;  %v3934_v27 = vor.u32 %v4252_v41, %v3933_v57  ;;  %v4005_v16 = vld [vmem:[%s6285_s11 + $0x90] sm:$0xf] }
 0x2cd   :  { %2745 = vmatpush.bf16.msra.mxu0 %v3878_v3  ;;  %2977 = vmatpush.bf16.msrb.mxu2 %v4058_v2 }
 0x2ce   :  { %2964 = vmatpush.bf16.msra.mxu1 %v3994_v4  ;;  %2941 = vmatpush.bf16.msra.mxu3 %v3966_v30  ;;  %v4280_v4 = vld [vmem:[%s6285_s11 + $0xe4] sm:$0xf0]  ;;  %v4021_v30 = vld [vmem:[%s6285_s11 + $0xb0] sm:$0xf] }
 0x2cf   :  { %v4046_v54 = vor.u32 %v4280_v4, %v4045_v33  ;;  %v4022_v47 = vor.u32 %v4274_v34, %v4021_v30  ;;  %v3997_v4 = vld [vmem:[%s6285_s11 + $0x80] sm:$0xf]  ;;  %v4317_v34 = vld [vmem:[%s6289_s14 + $0x10] sm:$0xff] }
 0x2d0   :  { %v4327_v30 = vld [vmem:[%s6289_s14 + $0x60] sm:$0xff] }
 0x2d1   :  { %2746 = vmatpush.bf16.msra.mxu0 %v3870_v46  ;;  %2978 = vmatpush.bf16.msrb.mxu2 %v4050_v55  ;;  %v4013_v46 = vld [vmem:[%s6285_s11 + $0xa0] sm:$0xf] }
 0x2d2   :  { %2965 = vmatpush.bf16.msra.mxu1 %v3986_v62  ;;  %2942 = vmatpush.bf16.msra.mxu3 %v3958_v31  ;;  %v3942_v62 = vor.u32 %v4254_v26, %v3941_v35  ;;  %v4014_v31 = vor.u32 %v4272_v14, %v4013_v46  ;;  %v4324_v46 = vld [vmem:[%s6289_s14 + $0x48] sm:$0xff] }
 0x2d5   :  { %2951 = vmatpush.bf16.msrb.mxu0 %v4054_v19  ;;  %2979 = vmatpush.bf16.msrb.mxu2 %v4042_v56  ;;  %v4270_v19 = vld [vmem:[%s6285_s11 + $0x94] sm:$0xf0] }
 0x2d6   :  { %2966 = vmatpush.bf16.msra.mxu1 %v3978_v29  ;;  %2943 = vmatpush.bf16.msra.mxu3 %v3950_v17  ;;  %v4276_v29 = vld [vmem:[%s6285_s11 + $0xc4] sm:$0xf0]  ;;  %v4006_v53 = vor.u32 %v4270_v19, %v4005_v16  ;;  %v4010_v17 = vor.u32 %v4269_v12, %v4007_v50  ;;  %v2990_v12 = vld [vmem:[%s6290_s13] sm:$0x3] }
 0x2d7   :  { %v4030_v3 = vor.u32 %v4276_v29, %v4029_v63 }
 0x2d9   :  { %2952 = vmatpush.bf16.msrb.mxu0 %v4046_v54  ;;  %2980 = vmatpush.bf16.msrb.mxu2 %v4034_v13  ;;  %v3999_v54 = vld [vmem:[%s6285_s11 + $0x88] sm:$0xf0]  ;;  %v4318_v13 = vld [vmem:[%s6289_s14 + $0x18] sm:$0xff] }
 0x2da   :  { %2967 = vmatpush.bf16.msra.mxu1 %v3970_v58  ;;  %2944 = vmatpush.bf16.msra.mxu3 %v3942_v62  ;;  %v1856_v62 = vld [vmem:[%s6287_s8] sm:$0x3] }
 0x2db   :  { %v1859_v37 = vperm.slane %v1856_v62, 1 }
 0x2dd   :  { %2981 = vmatpush.bf16.msrb.mxu2 %v4026_v51  ;;  %v4315_v51 = vld [vmem:[%s6289_s14] sm:$0xff] }
 0x2de   :  { %2968 = vmatpush.bf16.msra.mxu1 %v3962_v61  ;;  %2945 = vmatpush.bf16.msra.mxu3 %v3934_v27 }
 0x2e1   :  { %2982 = vmatpush.bf16.msrb.mxu2 %v4018_v43 }
 0x2e2   :  { %2969 = vmatpush.bf16.msra.mxu1 %v3954_v36  ;;  %v3998_v36 = vor.u32 %v4268_v32, %v3997_v4 }
 0x2e5   :  { %2983 = vmatpush.bf16.msrb.mxu2 %v4010_v17 }
 0x2e6   :  { %2970 = vmatpush.bf16.msra.mxu1 %v3946_v48 }
 0x2ea   :  { %2971 = vmatpush.bf16.msra.mxu1 %v3938_v49  ;;  %v4330_v49 = vld [vmem:[%s6289_s14 + $0x78] sm:$0xff] }
 0x309   :  { %v5948_v39 = vpop.f32.mrf.mxu1 }
 0x30f   :  { %v5995_v38 = vpop.f32.mrf.mxu2 }
 0x310   :  { %v1965_v5 = vadd.f32 %v5995_v38, %v1859_v37  ;;  %v4320_v38 = vld [vmem:[%s6289_s14 + $0x28] sm:$0xff] }
 0x311   :  { %v1953_v18 = vpop.f32.mrf.mxu1 }
 0x312   :  { %v4278_v18 = vld [vmem:[%s6285_s11 + $0xd4] sm:$0xf0] }
 0x313   :  { %v4038_v28 = vor.u32 %v4278_v18, %v4037_v7 }
 0x315   :  { %2953 = vmatpush.bf16.msrb.mxu0 %v4038_v28  ;;  %v1858_v28 = vperm.slane %v1856_v62, 0 }
 0x317   :  { %v1966_v44 = vpop.f32.mrf.mxu2  ;;  %v1952_v56 = vadd.f32 %v5948_v39, %v1858_v28  ;;  %v4321_v39 = vld [vmem:[%s6289_s14 + $0x30] sm:$0xff] }
 0x318   :  { %v2040_v44 = vld [vmem:[%s6286_s10] sm:$0x3] }
 0x319   :  { %2954 = vmatpush.bf16.msrb.mxu0 %v4030_v3  ;;  %v2042_v21 = vperm.slane %v2040_v44, 0  ;;  %v2498_v27 = vpack.c.bf16 %v1952_v56, %v1952_v56  ;;  %v4322_v3 = vld [vmem:[%s6289_s14 + $0x38] sm:$0xff] }
 0x31b   :  { %v6069_v1 = vpop.f32.mrf.mxu3 }
 0x31c   :  { %v2404_v61 = vadd.f32 %v6069_v1, %v2042_v21  ;;  %v4267_v1 = vld [vmem:[%s6285_s11 + $0x84] sm:$0xf] }
 0x31d   :  { %2955 = vmatpush.bf16.msrb.mxu0 %v4022_v47  ;;  %v4002_v35 = vor.u32 %v4267_v1, %v3999_v54  ;;  %v4323_v21 = vld [vmem:[%s6289_s14 + $0x40] sm:$0xff]  ;;  %v2993_v54 = vperm.slane %v2990_v12, 1 }
 0x31f   :  { %2984 = vmatpush.bf16.msrb.mxu2 %v4002_v35 }
 0x321   :  { %2956 = vmatpush.bf16.msrb.mxu0 %v4014_v31 }
 0x323   :  { %v2405_v8 = vpop.f32.mrf.mxu3 }
 0x324   :  { %v2043_v8 = vperm.slane %v2040_v44, 1  ;;  %v4328_v44 = vld [vmem:[%s6289_s14 + $0x68] sm:$0xff] }
 0x325   :  { %2957 = vmatpush.bf16.msrb.mxu0 %v4006_v53 }
 0x328   :  { %v2429_v59 = vpop.f32.mrf.mxu1 }
 0x329   :  { %2958 = vmatpush.bf16.msrb.mxu0 %v3998_v36 }
 0x32b   :  { %v2455_v58 = vpop.f32.mrf.mxu3 }
 0x32c   :  { %v2456_v42 = vadd.f32 %v2455_v58, %v2043_v8  ;;  %v4316_v58 = vld [vmem:[%s6289_s14 + $0x8] sm:$0xff] }
 0x32e   :  { %v2442_v20 = vpop.f32.mrf.mxu2 }
 0x330   :  { %v2431_v23 = vpop.f32.mrf.mxu1 }
 0x331   :  { %v2416_v2 = vpop.f32.mrf.mxu0 }
 0x332   :  { %v2417_v40 = vadd.f32 %v2416_v2, %v2404_v61 }
 0x333   :  { %v2457_v33 = vpop.f32.mrf.mxu3 }
 0x334   :  { %v2430_v24 = vadd.f32 %v2429_v59, %v2417_v40  ;;  %v2499_v59 = vpack.c.bf16 %v1965_v5, %v1965_v5  ;;  %v2992_v40 = vperm.slane %v2990_v12, 0 }
 0x336   :  { %v2443_v10 = vadd.f32 %v2442_v20, %v2430_v24  ;;  %v2444_v45 = vpop.f32.mrf.mxu2 }
 0x338   :  { %v2481_v55 = vpop.f32.mrf.mxu1  ;;  %v2532_v26 = vpack.c.bf16 %v2443_v10, %v2443_v10 }
 0x339   :  { %v2418_v7 = vpop.f32.mrf.mxu0 }
 0x33a   :  { %2734 = vmatmul.bf16.vlgmr.msrb.gmra.mxu3 %v2532_v26  ;;  %2760 = vmatmul.bf16.vlgmr.msrb.gmra.mxu1 %v2532_v26  ;;  %v4337_v7 = vld [vmem:[%s6288_s15] ss:$0 sm:$0xff] }
 0x33b   :  { %3132 = vmatpush.bf16.msrb.mxu3 %v4322_v3 }
 0x33e   :  { %v2494_v18 = vpop.f32.mrf.mxu2 }
 0x33f   :  { %3133 = vmatpush.bf16.msrb.mxu3 %v4321_v39 }
 0x340   :  { %v2483_v9 = vpop.f32.mrf.mxu1 }
 0x341   :  { %v2468_v48 = vpop.f32.mrf.mxu0 }
 0x342   :  { %v2469_v25 = vadd.f32 %v2468_v48, %v2456_v42 }
 0x343   :  { %3134 = vmatpush.bf16.msrb.mxu3 %v4320_v38 }
 0x344   :  { %v2482_v52 = vadd.f32 %v2481_v55, %v2469_v25 }
 0x346   :  { %v2495_v57 = vadd.f32 %v2494_v18, %v2482_v52  ;;  %v2496_v41 = vpop.f32.mrf.mxu2 }
 0x347   :  { %3135 = vmatpush.bf16.msrb.mxu3 %v4319_v11 }
 0x348   :  { %v2533_v63 = vpack.c.bf16 %v2495_v57, %v2495_v57 }
 0x349   :  { %v2470_v29 = vpop.f32.mrf.mxu0 }
 0x34a   :  { %2747 = vmatmul.bf16.vlgmr.msra.gmra.mxu0 %v2533_v63  ;;  %2773 = vmatmul.bf16.vlgmr.msra.gmra.mxu2 %v2533_v63 }
 0x34b   :  { %2946 = vmatmul.bf16.vlgmr.msra.gmra.mxu3 %v2498_v27  ;;  %2972 = vmatmul.bf16.vlgmr.msra.gmra.mxu1 %v2498_v27 }
 0x34c   :  { %3145 = vmatpush.bf16.msra.mxu0 %v4330_v49  ;;  %3136 = vmatpush.bf16.msrb.mxu3 %v4318_v13 }
 0x350   :  { %3146 = vmatpush.bf16.msra.mxu0 %v4329_v6  ;;  %3137 = vmatpush.bf16.msrb.mxu3 %v4317_v34 }
 0x354   :  { %3147 = vmatpush.bf16.msra.mxu0 %v4328_v44  ;;  %3138 = vmatpush.bf16.msrb.mxu3 %v4316_v58 }
 0x358   :  { %3148 = vmatpush.bf16.msra.mxu0 %v4327_v30  ;;  %3139 = vmatpush.bf16.msrb.mxu3 %v4315_v51 }
 0x35a   :  { %2959 = vmatmul.bf16.vlgmr.msrb.gmra.mxu0 %v2499_v59  ;;  %2985 = vmatmul.bf16.vlgmr.msrb.gmra.mxu2 %v2499_v59 }
 0x35c   :  { %3149 = vmatpush.bf16.msra.mxu0 %v4326_v60 }
 0x360   :  { %3150 = vmatpush.bf16.msra.mxu0 %v4325_v22 }
 0x364   :  { %3151 = vmatpush.bf16.msra.mxu0 %v4324_v46 }
 0x368   :  { %3152 = vmatpush.bf16.msra.mxu0 %v4323_v21 }
 0x3b7   :  { %v2761_v47 = vpop.f32.mrf.mxu1 }
 0x3bd   :  { %v2735_v14 = vpop.f32.mrf.mxu3 }
 0x3bf   :  { %v2763_v0 = vpop.f32.mrf.mxu1 }
 0x3c5   :  { %v2737_v15 = vpop.f32.mrf.mxu3 }
 0x3c7   :  { %v2748_v31 = vpop.f32.mrf.mxu0 }
 0x3c8   :  { %v2973_v20 = vpop.f32.mrf.mxu1  ;;  %v2749_v50 = vadd.f32 %v2748_v31, %v2735_v14 }
 0x3cd   :  { %v2774_v43 = vpop.f32.mrf.mxu2 }
 0x3ce   :  { %v2947_v16 = vpop.f32.mrf.mxu3  ;;  %v2775_v17 = vadd.f32 %v2774_v43, %v2761_v47 }
 0x3cf   :  { %v2750_v19 = vpop.f32.mrf.mxu0  ;;  %v2948_v2 = vadd.f32 %v2947_v16, %v2749_v50 }
 0x3d0   :  { %v2975_v23 = vpop.f32.mrf.mxu1  ;;  %v2974_v1 = vadd.f32 %v2973_v20, %v2775_v17 }
 0x3d5   :  { %v2776_v61 = vpop.f32.mrf.mxu2 }
 0x3d6   :  { %v2949_v53 = vpop.f32.mrf.mxu3 }
 0x3d7   :  { %v2960_v33 = vpop.f32.mrf.mxu0 }
 0x3d8   :  { %v2961_v4 = vadd.f32 %v2960_v33, %v2948_v2 }
 0x3da   :  { %v2996_v32 = vadd.f32 %v2992_v40, %v2961_v4 }
 0x3dc   :  { %v2998_v24 = vpack.c.bf16 %v2996_v32, %v2996_v32 }
 0x3dd   :  { %v2986_v36 = vpop.f32.mrf.mxu2 }
 0x3de   :  { %v2987_v10 = vadd.f32 %v2986_v36, %v2974_v1  ;;  %3140 = vmatmul.bf16.vlgmr.msrb.gmra.mxu3 %v2998_v24 }
 0x3df   :  { %v2962_v45 = vpop.f32.mrf.mxu0 }
 0x3e0   :  { %v2997_v55 = vadd.f32 %v2993_v54, %v2987_v10 }
 0x3e2   :  { %v2999_v35 = vpack.c.bf16 %v2997_v55, %v2997_v55 }
 0x3e4   :  { %3153 = vmatmul.bf16.vlgmr.msra.gmra.mxu0 %v2999_v35 }
 0x3e5   :  { %v2988_v26 = vpop.f32.mrf.mxu2 }
 0x461   :  { %v3141_v8 = vpop.f32.mrf.mxu3  ;;  %v3154_v62 = vpop.f32.mrf.mxu0 }
 0x462   :  { %v3142_v18 = vadd.f32 %v4337_v7, %v3141_v8 }
 0x464   :  { %v3155_v9 = vadd.f32 %v3154_v62, %v3142_v18 }
 0x466   :  { %3158 = vst [vmem:[%s6291_s16] sm:$0x3] %v3155_v9 }
 0x469   :  { %v3143_v42 = vpop.f32.mrf.mxu3  ;;  %v3156_v28 = vpop.f32.mrf.mxu0 }

</bundles_post_ra>
